<compile_context>
chip_gen: v7x
topology: tpu7x:2x2x1
jax: 0.10.0
libtpu: 0.0.40
codegen_flags: <defaults>
</compile_context>

<pallas_src>
import jax
import jax.numpy as jnp
from jax.experimental import pallas as pl
from jax.experimental.pallas import tpu as pltpu

# ------------------------- module hyper-parameters -------------------------
IN_PLANES = 9
OUT_PLANES = 9            # == KERNEL_CONV**2 so the conv-branch mul/sum is well defined
KERNEL_ATT = 7
HEAD = 3                  # OUT_PLANES % HEAD == 0
KERNEL_CONV = 3
STRIDE = 1
DILATION = 1
HEAD_DIM = OUT_PLANES // HEAD
SCALE = HEAD_DIM ** (-0.5)
PAD_ATT = (DILATION * (KERNEL_ATT - 1) + 1) // 2          # = 3
KA2 = KERNEL_ATT * KERNEL_ATT                              # 49
KC2 = KERNEL_CONV * KERNEL_CONV                            # 9


# ------------------------------- kernels -----------------------------------
def _proj_kernel(x_ref, w_ref, b_ref, o_ref):
    """All 1x1 convs (conv_q / conv_k / conv_v / fc) as one wide matmul.

    x_ref: (C, b*L)   w_ref: (R, C)   b_ref: (R, 1)   o_ref: (R, b*L)
    """
    o_ref[...] = (
        jnp.dot(w_ref[...], x_ref[...], preferred_element_type=jnp.float32)
        + b_ref[...]
    )


def _acmix_kernel(q_ref, kwin_ref, vwin_ref, pe_ref, pewin_ref, fcw_ref,
                  xshift_ref, box_ref, rates_ref, o_ref):
    """Fused attention + shift-conv + combine for one batch element.

    q_ref:      (OUT_PLANES, L)        scaled queries (scale folded into wq/bq)
    kwin_ref:   (OUT_PLANES, KA2, L)   unfolded (reflection-padded) keys
    vwin_ref:   (OUT_PLANES, KA2, L)   unfolded (reflection-padded) values
    pe_ref:     (HEAD_DIM, L)          positional embedding at the query pos
    pewin_ref:  (HEAD_DIM, KA2, L)     unfolded positional embedding
    fcw_ref:    (KC2, OUT_PLANES, L)   fc logits, kernel-position major
    xshift_ref: (KC2, L)               per-channel shifted (zero-padded) input
    box_ref:    (L, L)                 constant 3x3 zero-pad box-filter matrix
    rates_ref:  (2,) in SMEM           rate1, rate2
    o_ref:      (OUT_PLANES, L)
    """
    L = q_ref.shape[-1]

    # ---------------- attention branch (per head, vectorized over KA2) ------
    # TODO(synk): reference does torch.bmm(3-D, 4-D) and adds
    # pe.unsqueeze(1) - pe.unsqueeze(2) with incompatible shapes; we implement
    # the canonical ACmix form  att = q . (k_win + pe_q - pe_win).
    att_rows = []
    for hh in range(HEAD):
        scores = jnp.zeros((KA2, L), jnp.float32)
        for d in range(HEAD_DIM):
            ch = hh * HEAD_DIM + d
            qrow = q_ref[pl.ds(ch, 1), :]                        # (1, L)
            scores = scores + qrow * (kwin_ref[ch]
                                      + pe_ref[pl.ds(d, 1), :]
                                      - pewin_ref[d])
        m = jnp.max(scores, axis=0, keepdims=True)               # (1, L)
        p = jnp.exp(scores - m)                                  # (KA2, L)
        inv = pl.reciprocal(jnp.sum(p, axis=0, keepdims=True), approx=True)
        for d in range(HEAD_DIM):
            ch = hh * HEAD_DIM + d
            att_rows.append(
                jnp.sum(p * vwin_ref[ch], axis=0, keepdims=True) * inv)
    att = jnp.concatenate(att_rows, axis=0)                      # (OUT_PLANES, L)

    # ---------------- convolution branch ------------------------------------
    # dep_conv1 with the fixed one-hot "shift" kernel: every output channel is
    # sum_i shift_i(x[:, i]); the host pre-shifted each channel (pure layout),
    # so this is a single sublane reduction.
    # TODO(synk): reference declares groups=in_planes but overrides the weight
    # with a (out, KC2, 3, 3) tensor; groups=1 is the only consistent reading.
    t = jnp.sum(xshift_ref[...], axis=0, keepdims=True)          # (1, L)
    t = jnp.maximum(t, 0.0)                                      # ReLU
    # dep_conv2 (same fixed kernel, channel-identical input) == a 3x3 zero-pad
    # box filter, expressed as one MXU matmul with a constant L x L matrix.
    y2 = jnp.dot(t, box_ref[...], preferred_element_type=jnp.float32)  # (1, L)

    # softmax over the KC2 kernel positions of the fc logits (vectorized over
    # the (OUT_PLANES, L) tile), then sum the probabilities over out-channels
    # (reference's torch.mul(out, weights).sum(dim=1); all conv replicas equal).
    m = fcw_ref[0]
    for kk in range(1, KC2):
        m = jnp.maximum(m, fcw_ref[kk])                          # (OUT_PLANES, L)
    den = jnp.zeros_like(m)
    for kk in range(KC2):
        den = den + jnp.exp(fcw_ref[kk] - m)
    inv = pl.reciprocal(den, approx=True)
    sw_rows = []
    for kk in range(KC2):
        e = jnp.exp(fcw_ref[kk] - m) * inv                       # (OUT_PLANES, L)
        sw_rows.append(jnp.sum(e, axis=0, keepdims=True))        # (1, L)
    sw = jnp.concatenate(sw_rows, axis=0)                        # (KC2, L)

    # ---------------- combine ------------------------------------------------
    r1 = rates_ref[0]
    r2 = rates_ref[1]
    o_ref[...] = r1 * att + r2 * (y2 * sw)


# ------------------------------ host wrapper --------------------------------
def _position(h, w):
    loc_w = jnp.broadcast_to(jnp.linspace(-1.0, 1.0, w)[None, :], (h, w))
    loc_h = jnp.broadcast_to(jnp.linspace(-1.0, 1.0, h)[:, None], (h, w))
    return jnp.stack([loc_w, loc_h], axis=0).astype(jnp.float32)   # (2, h, w)


def init_params(key):
    ks = jax.random.split(key, 9)
    s = 0.1
    f = lambda k, shape: jax.random.normal(k, shape, jnp.float32) * s
    return dict(
        wq=f(ks[0], (OUT_PLANES, IN_PLANES)), bq=f(ks[1], (OUT_PLANES,)),
        wk=f(ks[2], (OUT_PLANES, IN_PLANES)), bk=f(ks[3], (OUT_PLANES,)),
        wv=f(ks[4], (OUT_PLANES, IN_PLANES)), bv=f(ks[5], (OUT_PLANES,)),
        wp=f(ks[6], (HEAD_DIM, 2)),           bp=f(ks[7], (HEAD_DIM,)),
        # TODO(synk): reference builds fc as Conv2d(3*out_planes, kc*kc,
        # bias=False) yet feeds it x (in_planes ch) and views its output as
        # out_planes*kc*kc channels; we use the only consistent shape.
        wfc=f(ks[8], (OUT_PLANES * KC2, IN_PLANES)),
        rates=jnp.array([0.5, 0.5], jnp.float32),            # init_rate_half
    )


@jax.jit
def acmix_forward(x, params):
    b, c, h, w = x.shape
    l = h * w
    p = PAD_ATT

    # ---- (1) all 1x1 convs as ONE lane-dense matmul over the whole batch ----
    # The attention scale and the fc row permutation (kernel-position major,
    # so the fused kernel reads aligned (OUT_PLANES, L) tiles) are folded into
    # the weights -- free preprocessing.
    wq = params["wq"] * SCALE
    bq = params["bq"] * SCALE
    wfc = params["wfc"].reshape(OUT_PLANES, KC2, IN_PLANES)
    wfc = wfc.transpose(1, 0, 2).reshape(OUT_PLANES * KC2, IN_PLANES)
    wcat = jnp.concatenate([wq, params["wk"], params["wv"], wfc], axis=0)
    bcat = jnp.concatenate(
        [bq, params["bk"], params["bv"],
         jnp.zeros((OUT_PLANES * KC2,), jnp.float32)])[:, None]
    r = wcat.shape[0]

    x_cl = jnp.transpose(x, (1, 0, 2, 3)).reshape(c, b * l)      # (C, b*L)
    proj = pl.pallas_call(
        _proj_kernel,
        out_shape=jax.ShapeDtypeStruct((r, b * l), jnp.float32),
        grid=(1,),
        in_specs=[pl.BlockSpec((c, b * l), lambda i: (0, 0)),
                  pl.BlockSpec((r, c), lambda i: (0, 0)),
                  pl.BlockSpec((r, 1), lambda i: (0, 0))],
        out_specs=pl.BlockSpec((r, b * l), lambda i: (0, 0)),
    )(x_cl, wcat, bcat)
    proj = proj.reshape(r, b, l).transpose(1, 0, 2)              # (b, R, L)

    q = proj[:, 0:OUT_PLANES]                                    # (b, OP, L)
    k = proj[:, OUT_PLANES:2 * OUT_PLANES].reshape(b, OUT_PLANES, h, w)
    v = proj[:, 2 * OUT_PLANES:3 * OUT_PLANES].reshape(b, OUT_PLANES, h, w)
    fcw = proj[:, 3 * OUT_PLANES:].reshape(b, KC2, OUT_PLANES, l)

    # conv_p on the coordinate grid (tiny -> plain JAX glue).
    pos = _position(h, w)
    pe = (jnp.einsum("dc,chw->dhw", params["wp"], pos)
          + params["bp"][:, None, None]).astype(jnp.float32)     # (HEAD_DIM,h,w)

    # ---- host-side layout plumbing: ReflectionPad2d + Unfold (im2col) so the
    # fused kernel only does contiguous, lane-dense (KA2, h*w) tile reads. ----
    def unfold(a):                                     # a: (..., h+2p, w+2p)
        wins = jnp.stack(
            [a[..., dy:dy + h, dx:dx + w]
             for dy in range(KERNEL_ATT) for dx in range(KERNEL_ATT)],
            axis=-3)                                   # (..., KA2, h, w)
        return wins.reshape(wins.shape[:-2] + (l,))    # (..., KA2, h*w)

    kwin = unfold(jnp.pad(k, ((0, 0), (0, 0), (p, p), (p, p)), mode="reflect"))
    vwin = unfold(jnp.pad(v, ((0, 0), (0, 0), (p, p), (p, p)), mode="reflect"))
    pewin = unfold(jnp.pad(pe, ((0, 0), (p, p), (p, p)), mode="reflect"))
    pe_flat = pe.reshape(HEAD_DIM, l)

    # dep_conv1 "shift" unfold (zero padding=1): channel i shifted by its
    # one-hot kernel offset (i//3-1, i%3-1)  ->  (b, KC2, h*w).
    xzpad = jnp.pad(x, ((0, 0), (0, 0), (1, 1), (1, 1)))
    xshift = jnp.stack(
        [xzpad[:, i, i // KERNEL_CONV:i // KERNEL_CONV + h,
               i % KERNEL_CONV:i % KERNEL_CONV + w]
         for i in range(KC2)], axis=1).reshape(b, KC2, l)

    # constant 3x3 zero-padded box-filter matrix (dep_conv2 as one matmul).
    ry = jnp.abs(jnp.arange(h)[:, None] - jnp.arange(h)[None, :]) <= 1
    rx = jnp.abs(jnp.arange(w)[:, None] - jnp.arange(w)[None, :]) <= 1
    box = (ry[:, None, :, None] & rx[None, :, None, :]).reshape(l, l)
    box = box.astype(jnp.float32)

    # ---- (2) fused attention + shift-conv + combine, grid over batch ----
    out = pl.pallas_call(
        _acmix_kernel,
        out_shape=jax.ShapeDtypeStruct((b, OUT_PLANES, l), jnp.float32),
        grid=(b,),
        in_specs=[
            pl.BlockSpec((None, OUT_PLANES, l), lambda i: (i, 0, 0)),          # q
            pl.BlockSpec((None, OUT_PLANES, KA2, l), lambda i: (i, 0, 0, 0)),  # kwin
            pl.BlockSpec((None, OUT_PLANES, KA2, l), lambda i: (i, 0, 0, 0)),  # vwin
            pl.BlockSpec((HEAD_DIM, l), lambda i: (0, 0)),                     # pe
            pl.BlockSpec((HEAD_DIM, KA2, l), lambda i: (0, 0, 0)),             # pewin
            pl.BlockSpec((None, KC2, OUT_PLANES, l), lambda i: (i, 0, 0, 0)),  # fcw
            pl.BlockSpec((None, KC2, l), lambda i: (i, 0, 0)),                 # xshift
            pl.BlockSpec((l, l), lambda i: (0, 0)),                            # box
            pl.BlockSpec(memory_space=pltpu.MemorySpace.SMEM),                 # rates
        ],
        out_specs=pl.BlockSpec((None, OUT_PLANES, l), lambda i: (i, 0, 0)),
        compiler_params=pltpu.CompilerParams(
            dimension_semantics=("parallel",)),
    )(q, kwin, vwin, pe_flat, pewin, fcw, xshift, box, params["rates"])

    return out.reshape(b, OUT_PLANES, h, w)


if __name__ == "__main__":
    B, H, W = 2, 16, 16
    x = jax.random.normal(jax.random.PRNGKey(0), (B, IN_PLANES, H, W),
                          jnp.float32)
    params = init_params(jax.random.PRNGKey(1))

    out = acmix_forward(x, params)
    jax.block_until_ready(out)

    assert out.shape == (B, OUT_PLANES, H, W), out.shape
    assert bool(jnp.all(jnp.isfinite(out)))
    print("KERNEL_OK")
</pallas_src>

<mosaic_0001>
module attributes {stable_mosaic.version = 11 : i64} {
  func.func @_proj_kernel(%arg0: i32, %arg1: memref<9x512xf32, #tpu.memory_space<vmem>>, %arg2: memref<108x9xf32, #tpu.memory_space<vmem>>, %arg3: memref<108x1xf32, #tpu.memory_space<vmem>>, %arg4: memref<108x512xf32, #tpu.memory_space<vmem>>) attributes {dimension_semantics = [#tpu.dimension_semantics<arbitrary>], iteration_bounds = array<i64: 1>, scalar_prefetch = 0 : i64, scratch_operands = 0 : i64, tpu.core_type = #tpu.core_type<tc>, window_params = [{pipeline_mode = #tpu.pipeline_mode<synchronous>, transform_indices = @transform_0, window_bounds = array<i64: 9, 512>}, {pipeline_mode = #tpu.pipeline_mode<synchronous>, transform_indices = @transform_1, window_bounds = array<i64: 108, 9>}, {pipeline_mode = #tpu.pipeline_mode<synchronous>, transform_indices = @transform_2, window_bounds = array<i64: 108, 1>}, {pipeline_mode = #tpu.pipeline_mode<synchronous>, transform_indices = @transform_3, window_bounds = array<i64: 108, 512>}]} {
    %c0 = arith.constant 0 : index
    %c0_0 = arith.constant 0 : index
    %0 = vector.load %arg2[%c0, %c0_0] : memref<108x9xf32, #tpu.memory_space<vmem>>, vector<108x9xf32>
    %c0_1 = arith.constant 0 : index
    %c0_2 = arith.constant 0 : index
    %1 = vector.load %arg1[%c0_1, %c0_2] : memref<9x512xf32, #tpu.memory_space<vmem>>, vector<9x512xf32>
    %cst = arith.constant dense<0.000000e+00> : vector<108x512xf32>
    %2 = tpu.matmul %0, %1, %cst {dimension_numbers = #tpu.dot_dimension_numbers<[1], [0], [0], [1], [0, 0, 1, 1], [], []>} : vector<108x9xf32>, vector<9x512xf32>, vector<108x512xf32> -> vector<108x512xf32>
    %c0_3 = arith.constant 0 : index
    %c0_4 = arith.constant 0 : index
    %3 = vector.load %arg3[%c0_3, %c0_4] : memref<108x1xf32, #tpu.memory_space<vmem>>, vector<108x1xf32>
    %4 = vector.broadcast %3 : vector<108x1xf32> to vector<108x512xf32>
    %5 = arith.addf %2, %4 : vector<108x512xf32>
    %c0_5 = arith.constant 0 : index
    %c0_6 = arith.constant 0 : index
    %6 = vector.load %arg4[%c0_5, %c0_6] : memref<108x512xf32, #tpu.memory_space<vmem>>, vector<108x512xf32>
    tpu.vector_store %arg4[%c0_5, %c0_6], %5 {strides = array<i32>} : memref<108x512xf32, #tpu.memory_space<vmem>>, vector<108x512xf32>,
    return
  }
  func.func @transform_0(%arg0: i32) -> (i32, i32) {
    %c0_i32 = arith.constant 0 : i32
    %c0_i32_0 = arith.constant 0 : i32
    %c0_i32_1 = arith.constant 0 : i32
    return %c0_i32, %c0_i32_0 : i32, i32
  }
  func.func @transform_1(%arg0: i32) -> (i32, i32) {
    %c0_i32 = arith.constant 0 : i32
    %c0_i32_0 = arith.constant 0 : i32
    %c0_i32_1 = arith.constant 0 : i32
    return %c0_i32, %c0_i32_0 : i32, i32
  }
  func.func @transform_2(%arg0: i32) -> (i32, i32) {
    %c0_i32 = arith.constant 0 : i32
    %c0_i32_0 = arith.constant 0 : i32
    %c0_i32_1 = arith.constant 0 : i32
    return %c0_i32, %c0_i32_0 : i32, i32
  }
  func.func @transform_3(%arg0: i32) -> (i32, i32) {
    %c0_i32 = arith.constant 0 : i32
    %c0_i32_0 = arith.constant 0 : i32
    %c0_i32_1 = arith.constant 0 : i32
    return %c0_i32, %c0_i32_0 : i32, i32
  }
}

module attributes {stable_mosaic.version = 11 : i64} {
  func.func @_acmix_kernel(%arg0: i32, %arg1: memref<1x9x256xf32, #tpu.memory_space<vmem>>, %arg2: memref<1x9x49x256xf32, #tpu.memory_space<vmem>>, %arg3: memref<1x9x49x256xf32, #tpu.memory_space<vmem>>, %arg4: memref<3x256xf32, #tpu.memory_space<vmem>>, %arg5: memref<3x49x256xf32, #tpu.memory_space<vmem>>, %arg6: memref<1x9x9x256xf32, #tpu.memory_space<vmem>>, %arg7: memref<1x9x256xf32, #tpu.memory_space<vmem>>, %arg8: memref<256x256xf32, #tpu.memory_space<vmem>>, %arg9: memref<2xf32, #tpu.memory_space<smem>>, %arg10: memref<1x9x256xf32, #tpu.memory_space<vmem>>) attributes {dimension_semantics = [#tpu.dimension_semantics<parallel>], iteration_bounds = array<i64: 2>, scalar_prefetch = 0 : i64, scratch_operands = 0 : i64, tpu.core_type = #tpu.core_type<tc>, window_params = [{transform_indices = @transform_0, window_bounds = array<i64: 1, 9, 256>}, {transform_indices = @transform_1, window_bounds = array<i64: 1, 9, 49, 256>}, {transform_indices = @transform_2, window_bounds = array<i64: 1, 9, 49, 256>}, {pipeline_mode = #tpu.pipeline_mode<synchronous>, transform_indices = @transform_3, window_bounds = array<i64: 3, 256>}, {pipeline_mode = #tpu.pipeline_mode<synchronous>, transform_indices = @transform_4, window_bounds = array<i64: 3, 49, 256>}, {transform_indices = @transform_5, window_bounds = array<i64: 1, 9, 9, 256>}, {transform_indices = @transform_6, window_bounds = array<i64: 1, 9, 256>}, {pipeline_mode = #tpu.pipeline_mode<synchronous>, transform_indices = @transform_7, window_bounds = array<i64: 256, 256>}, {transform_indices = @transform_8, window_bounds = array<i64: 2>}, {transform_indices = @transform_9, window_bounds = array<i64: 1, 9, 256>}]} {
    %cst = arith.constant 0.000000e+00 : f32
    %0 = vector.broadcast %cst : f32 to vector<49x256xf32>
    %c0 = arith.constant 0 : index
    %c0_0 = arith.constant 0 : index
    %c0_1 = arith.constant 0 : index
    %1 = vector.load %arg1[%c0, %c0_0, %c0_1] : memref<1x9x256xf32, #tpu.memory_space<vmem>>, vector<1x1x256xf32>
    %2 = vector.shape_cast %1 : vector<1x1x256xf32> to vector<1x256xf32>
    %c0_2 = arith.constant 0 : index
    %c0_3 = arith.constant 0 : index
    %c0_4 = arith.constant 0 : index
    %c0_5 = arith.constant 0 : index
    %3 = vector.load %arg2[%c0_2, %c0_3, %c0_4, %c0_5] : memref<1x9x49x256xf32, #tpu.memory_space<vmem>>, vector<1x1x49x256xf32>
    %4 = vector.shape_cast %3 : vector<1x1x49x256xf32> to vector<49x256xf32>
    %c0_6 = arith.constant 0 : index
    %c0_7 = arith.constant 0 : index
    %5 = vector.load %arg4[%c0_6, %c0_7] : memref<3x256xf32, #tpu.memory_space<vmem>>, vector<1x256xf32>
    %6 = vector.broadcast %5 : vector<1x256xf32> to vector<49x256xf32>
    %7 = arith.addf %4, %6 : vector<49x256xf32>
    %c0_8 = arith.constant 0 : index
    %c0_9 = arith.constant 0 : index
    %c0_10 = arith.constant 0 : index
    %8 = vector.load %arg5[%c0_8, %c0_9, %c0_10] : memref<3x49x256xf32, #tpu.memory_space<vmem>>, vector<1x49x256xf32>
    %9 = vector.shape_cast %8 : vector<1x49x256xf32> to vector<49x256xf32>
    %10 = arith.subf %7, %9 : vector<49x256xf32>
    %11 = vector.broadcast %2 : vector<1x256xf32> to vector<49x256xf32>
    %12 = arith.mulf %11, %10 : vector<49x256xf32>
    %13 = arith.addf %0, %12 : vector<49x256xf32>
    %c0_11 = arith.constant 0 : index
    %c1 = arith.constant 1 : index
    %c0_12 = arith.constant 0 : index
    %14 = vector.load %arg1[%c0_11, %c1, %c0_12] : memref<1x9x256xf32, #tpu.memory_space<vmem>>, vector<1x1x256xf32>
    %15 = vector.shape_cast %14 : vector<1x1x256xf32> to vector<1x256xf32>
    %c0_13 = arith.constant 0 : index
    %c1_14 = arith.constant 1 : index
    %c0_15 = arith.constant 0 : index
    %c0_16 = arith.constant 0 : index
    %16 = vector.load %arg2[%c0_13, %c1_14, %c0_15, %c0_16] : memref<1x9x49x256xf32, #tpu.memory_space<vmem>>, vector<1x1x49x256xf32>
    %17 = vector.shape_cast %16 : vector<1x1x49x256xf32> to vector<49x256xf32>
    %c1_17 = arith.constant 1 : index
    %c0_18 = arith.constant 0 : index
    %18 = vector.load %arg4[%c1_17, %c0_18] : memref<3x256xf32, #tpu.memory_space<vmem>>, vector<1x256xf32>
    %19 = vector.broadcast %18 : vector<1x256xf32> to vector<49x256xf32>
    %20 = arith.addf %17, %19 : vector<49x256xf32>
    %c1_19 = arith.constant 1 : index
    %c0_20 = arith.constant 0 : index
    %c0_21 = arith.constant 0 : index
    %21 = vector.load %arg5[%c1_19, %c0_20, %c0_21] : memref<3x49x256xf32, #tpu.memory_space<vmem>>, vector<1x49x256xf32>
    %22 = vector.shape_cast %21 : vector<1x49x256xf32> to vector<49x256xf32>
    %23 = arith.subf %20, %22 : vector<49x256xf32>
    %24 = vector.broadcast %15 : vector<1x256xf32> to vector<49x256xf32>
    %25 = arith.mulf %24, %23 : vector<49x256xf32>
    %26 = arith.addf %13, %25 : vector<49x256xf32>
    %c0_22 = arith.constant 0 : index
    %c2 = arith.constant 2 : index
    %c0_23 = arith.constant 0 : index
    %27 = vector.load %arg1[%c0_22, %c2, %c0_23] : memref<1x9x256xf32, #tpu.memory_space<vmem>>, vector<1x1x256xf32>
    %28 = vector.shape_cast %27 : vector<1x1x256xf32> to vector<1x256xf32>
    %c0_24 = arith.constant 0 : index
    %c2_25 = arith.constant 2 : index
    %c0_26 = arith.constant 0 : index
    %c0_27 = arith.constant 0 : index
    %29 = vector.load %arg2[%c0_24, %c2_25, %c0_26, %c0_27] : memref<1x9x49x256xf32, #tpu.memory_space<vmem>>, vector<1x1x49x256xf32>
    %30 = vector.shape_cast %29 : vector<1x1x49x256xf32> to vector<49x256xf32>
    %c2_28 = arith.constant 2 : index
    %c0_29 = arith.constant 0 : index
    %31 = vector.load %arg4[%c2_28, %c0_29] : memref<3x256xf32, #tpu.memory_space<vmem>>, vector<1x256xf32>
    %32 = vector.broadcast %31 : vector<1x256xf32> to vector<49x256xf32>
    %33 = arith.addf %30, %32 : vector<49x256xf32>
    %c2_30 = arith.constant 2 : index
    %c0_31 = arith.constant 0 : index
    %c0_32 = arith.constant 0 : index
    %34 = vector.load %arg5[%c2_30, %c0_31, %c0_32] : memref<3x49x256xf32, #tpu.memory_space<vmem>>, vector<1x49x256xf32>
    %35 = vector.shape_cast %34 : vector<1x49x256xf32> to vector<49x256xf32>
    %36 = arith.subf %33, %35 : vector<49x256xf32>
    %37 = vector.broadcast %28 : vector<1x256xf32> to vector<49x256xf32>
    %38 = arith.mulf %37, %36 : vector<49x256xf32>
    %39 = arith.addf %26, %38 : vector<49x256xf32>
    %cst_33 = arith.constant dense<0xFF800000> : vector<256xf32>
    %40 = vector.multi_reduction <maximumf>, %39, %cst_33 [0] : vector<49x256xf32> to vector<256xf32>
    %41 = vector.shape_cast %40 : vector<256xf32> to vector<1x256xf32>
    %42 = vector.broadcast %41 : vector<1x256xf32> to vector<49x256xf32>
    %43 = arith.subf %39, %42 : vector<49x256xf32>
    %44 = math.exp %43 : vector<49x256xf32>
    %cst_34 = arith.constant dense<0.000000e+00> : vector<256xf32>
    %45 = vector.multi_reduction <add>, %44, %cst_34 [0] : vector<49x256xf32> to vector<256xf32>
    %46 = vector.shape_cast %45 : vector<256xf32> to vector<1x256xf32>
    %47 = tpu.reciprocal %46 {approx = true} : vector<1x256xf32> -> vector<1x256xf32>
    %c0_35 = arith.constant 0 : index
    %c0_36 = arith.constant 0 : index
    %c0_37 = arith.constant 0 : index
    %c0_38 = arith.constant 0 : index
    %48 = vector.load %arg3[%c0_35, %c0_36, %c0_37, %c0_38] : memref<1x9x49x256xf32, #tpu.memory_space<vmem>>, vector<1x1x49x256xf32>
    %49 = vector.shape_cast %48 : vector<1x1x49x256xf32> to vector<49x256xf32>
    %50 = arith.mulf %44, %49 : vector<49x256xf32>
    %cst_39 = arith.constant dense<0.000000e+00> : vector<256xf32>
    %51 = vector.multi_reduction <add>, %50, %cst_39 [0] : vector<49x256xf32> to vector<256xf32>
    %52 = vector.shape_cast %51 : vector<256xf32> to vector<1x256xf32>
    %53 = arith.mulf %52, %47 : vector<1x256xf32>
    %c0_40 = arith.constant 0 : index
    %c1_41 = arith.constant 1 : index
    %c0_42 = arith.constant 0 : index
    %c0_43 = arith.constant 0 : index
    %54 = vector.load %arg3[%c0_40, %c1_41, %c0_42, %c0_43] : memref<1x9x49x256xf32, #tpu.memory_space<vmem>>, vector<1x1x49x256xf32>
    %55 = vector.shape_cast %54 : vector<1x1x49x256xf32> to vector<49x256xf32>
    %56 = arith.mulf %44, %55 : vector<49x256xf32>
    %cst_44 = arith.constant dense<0.000000e+00> : vector<256xf32>
    %57 = vector.multi_reduction <add>, %56, %cst_44 [0] : vector<49x256xf32> to vector<256xf32>
    %58 = vector.shape_cast %57 : vector<256xf32> to vector<1x256xf32>
    %59 = arith.mulf %58, %47 : vector<1x256xf32>
    %c0_45 = arith.constant 0 : index
    %c2_46 = arith.constant 2 : index
    %c0_47 = arith.constant 0 : index
    %c0_48 = arith.constant 0 : index
    %60 = vector.load %arg3[%c0_45, %c2_46, %c0_47, %c0_48] : memref<1x9x49x256xf32, #tpu.memory_space<vmem>>, vector<1x1x49x256xf32>
    %61 = vector.shape_cast %60 : vector<1x1x49x256xf32> to vector<49x256xf32>
    %62 = arith.mulf %44, %61 : vector<49x256xf32>
    %cst_49 = arith.constant dense<0.000000e+00> : vector<256xf32>
    %63 = vector.multi_reduction <add>, %62, %cst_49 [0] : vector<49x256xf32> to vector<256xf32>
    %64 = vector.shape_cast %63 : vector<256xf32> to vector<1x256xf32>
    %65 = arith.mulf %64, %47 : vector<1x256xf32>
    %cst_50 = arith.constant 0.000000e+00 : f32
    %66 = vector.broadcast %cst_50 : f32 to vector<49x256xf32>
    %c0_51 = arith.constant 0 : index
    %c3 = arith.constant 3 : index
    %c0_52 = arith.constant 0 : index
    %67 = vector.load %arg1[%c0_51, %c3, %c0_52] : memref<1x9x256xf32, #tpu.memory_space<vmem>>, vector<1x1x256xf32>
    %68 = vector.shape_cast %67 : vector<1x1x256xf32> to vector<1x256xf32>
    %c0_53 = arith.constant 0 : index
    %c3_54 = arith.constant 3 : index
    %c0_55 = arith.constant 0 : index
    %c0_56 = arith.constant 0 : index
    %69 = vector.load %arg2[%c0_53, %c3_54, %c0_55, %c0_56] : memref<1x9x49x256xf32, #tpu.memory_space<vmem>>, vector<1x1x49x256xf32>
    %70 = vector.shape_cast %69 : vector<1x1x49x256xf32> to vector<49x256xf32>
    %c0_57 = arith.constant 0 : index
    %c0_58 = arith.constant 0 : index
    %71 = vector.load %arg4[%c0_57, %c0_58] : memref<3x256xf32, #tpu.memory_space<vmem>>, vector<1x256xf32>
    %72 = vector.broadcast %71 : vector<1x256xf32> to vector<49x256xf32>
    %73 = arith.addf %70, %72 : vector<49x256xf32>
    %c0_59 = arith.constant 0 : index
    %c0_60 = arith.constant 0 : index
    %c0_61 = arith.constant 0 : index
    %74 = vector.load %arg5[%c0_59, %c0_60, %c0_61] : memref<3x49x256xf32, #tpu.memory_space<vmem>>, vector<1x49x256xf32>
    %75 = vector.shape_cast %74 : vector<1x49x256xf32> to vector<49x256xf32>
    %76 = arith.subf %73, %75 : vector<49x256xf32>
    %77 = vector.broadcast %68 : vector<1x256xf32> to vector<49x256xf32>
    %78 = arith.mulf %77, %76 : vector<49x256xf32>
    %79 = arith.addf %66, %78 : vector<49x256xf32>
    %c0_62 = arith.constant 0 : index
    %c4 = arith.constant 4 : index
    %c0_63 = arith.constant 0 : index
    %80 = vector.load %arg1[%c0_62, %c4, %c0_63] : memref<1x9x256xf32, #tpu.memory_space<vmem>>, vector<1x1x256xf32>
    %81 = vector.shape_cast %80 : vector<1x1x256xf32> to vector<1x256xf32>
    %c0_64 = arith.constant 0 : index
    %c4_65 = arith.constant 4 : index
    %c0_66 = arith.constant 0 : index
    %c0_67 = arith.constant 0 : index
    %82 = vector.load %arg2[%c0_64, %c4_65, %c0_66, %c0_67] : memref<1x9x49x256xf32, #tpu.memory_space<vmem>>, vector<1x1x49x256xf32>
    %83 = vector.shape_cast %82 : vector<1x1x49x256xf32> to vector<49x256xf32>
    %c1_68 = arith.constant 1 : index
    %c0_69 = arith.constant 0 : index
    %84 = vector.load %arg4[%c1_68, %c0_69] : memref<3x256xf32, #tpu.memory_space<vmem>>, vector<1x256xf32>
    %85 = vector.broadcast %84 : vector<1x256xf32> to vector<49x256xf32>
    %86 = arith.addf %83, %85 : vector<49x256xf32>
    %c1_70 = arith.constant 1 : index
    %c0_71 = arith.constant 0 : index
    %c0_72 = arith.constant 0 : index
    %87 = vector.load %arg5[%c1_70, %c0_71, %c0_72] : memref<3x49x256xf32, #tpu.memory_space<vmem>>, vector<1x49x256xf32>
    %88 = vector.shape_cast %87 : vector<1x49x256xf32> to vector<49x256xf32>
    %89 = arith.subf %86, %88 : vector<49x256xf32>
    %90 = vector.broadcast %81 : vector<1x256xf32> to vector<49x256xf32>
    %91 = arith.mulf %90, %89 : vector<49x256xf32>
    %92 = arith.addf %79, %91 : vector<49x256xf32>
    %c0_73 = arith.constant 0 : index
    %c5 = arith.constant 5 : index
    %c0_74 = arith.constant 0 : index
    %93 = vector.load %arg1[%c0_73, %c5, %c0_74] : memref<1x9x256xf32, #tpu.memory_space<vmem>>, vector<1x1x256xf32>
    %94 = vector.shape_cast %93 : vector<1x1x256xf32> to vector<1x256xf32>
    %c0_75 = arith.constant 0 : index
    %c5_76 = arith.constant 5 : index
    %c0_77 = arith.constant 0 : index
    %c0_78 = arith.constant 0 : index
    %95 = vector.load %arg2[%c0_75, %c5_76, %c0_77, %c0_78] : memref<1x9x49x256xf32, #tpu.memory_space<vmem>>, vector<1x1x49x256xf32>
    %96 = vector.shape_cast %95 : vector<1x1x49x256xf32> to vector<49x256xf32>
    %c2_79 = arith.constant 2 : index
    %c0_80 = arith.constant 0 : index
    %97 = vector.load %arg4[%c2_79, %c0_80] : memref<3x256xf32, #tpu.memory_space<vmem>>, vector<1x256xf32>
    %98 = vector.broadcast %97 : vector<1x256xf32> to vector<49x256xf32>
    %99 = arith.addf %96, %98 : vector<49x256xf32>
    %c2_81 = arith.constant 2 : index
    %c0_82 = arith.constant 0 : index
    %c0_83 = arith.constant 0 : index
    %100 = vector.load %arg5[%c2_81, %c0_82, %c0_83] : memref<3x49x256xf32, #tpu.memory_space<vmem>>, vector<1x49x256xf32>
    %101 = vector.shape_cast %100 : vector<1x49x256xf32> to vector<49x256xf32>
    %102 = arith.subf %99, %101 : vector<49x256xf32>
    %103 = vector.broadcast %94 : vector<1x256xf32> to vector<49x256xf32>
    %104 = arith.mulf %103, %102 : vector<49x256xf32>
    %105 = arith.addf %92, %104 : vector<49x256xf32>
    %cst_84 = arith.constant dense<0xFF800000> : vector<256xf32>
    %106 = vector.multi_reduction <maximumf>, %105, %cst_84 [0] : vector<49x256xf32> to vector<256xf32>
    %107 = vector.shape_cast %106 : vector<256xf32> to vector<1x256xf32>
    %108 = vector.broadcast %107 : vector<1x256xf32> to vector<49x256xf32>
    %109 = arith.subf %105, %108 : vector<49x256xf32>
    %110 = math.exp %109 : vector<49x256xf32>
    %cst_85 = arith.constant dense<0.000000e+00> : vector<256xf32>
    %111 = vector.multi_reduction <add>, %110, %cst_85 [0] : vector<49x256xf32> to vector<256xf32>
    %112 = vector.shape_cast %111 : vector<256xf32> to vector<1x256xf32>
    %113 = tpu.reciprocal %112 {approx = true} : vector<1x256xf32> -> vector<1x256xf32>
    %c0_86 = arith.constant 0 : index
    %c3_87 = arith.constant 3 : index
    %c0_88 = arith.constant 0 : index
    %c0_89 = arith.constant 0 : index
    %114 = vector.load %arg3[%c0_86, %c3_87, %c0_88, %c0_89] : memref<1x9x49x256xf32, #tpu.memory_space<vmem>>, vector<1x1x49x256xf32>
    %115 = vector.shape_cast %114 : vector<1x1x49x256xf32> to vector<49x256xf32>
    %116 = arith.mulf %110, %115 : vector<49x256xf32>
    %cst_90 = arith.constant dense<0.000000e+00> : vector<256xf32>
    %117 = vector.multi_reduction <add>, %116, %cst_90 [0] : vector<49x256xf32> to vector<256xf32>
    %118 = vector.shape_cast %117 : vector<256xf32> to vector<1x256xf32>
    %119 = arith.mulf %118, %113 : vector<1x256xf32>
    %c0_91 = arith.constant 0 : index
    %c4_92 = arith.constant 4 : index
    %c0_93 = arith.constant 0 : index
    %c0_94 = arith.constant 0 : index
    %120 = vector.load %arg3[%c0_91, %c4_92, %c0_93, %c0_94] : memref<1x9x49x256xf32, #tpu.memory_space<vmem>>, vector<1x1x49x256xf32>
    %121 = vector.shape_cast %120 : vector<1x1x49x256xf32> to vector<49x256xf32>
    %122 = arith.mulf %110, %121 : vector<49x256xf32>
    %cst_95 = arith.constant dense<0.000000e+00> : vector<256xf32>
    %123 = vector.multi_reduction <add>, %122, %cst_95 [0] : vector<49x256xf32> to vector<256xf32>
    %124 = vector.shape_cast %123 : vector<256xf32> to vector<1x256xf32>
    %125 = arith.mulf %124, %113 : vector<1x256xf32>
    %c0_96 = arith.constant 0 : index
    %c5_97 = arith.constant 5 : index
    %c0_98 = arith.constant 0 : index
    %c0_99 = arith.constant 0 : index
    %126 = vector.load %arg3[%c0_96, %c5_97, %c0_98, %c0_99] : memref<1x9x49x256xf32, #tpu.memory_space<vmem>>, vector<1x1x49x256xf32>
    %127 = vector.shape_cast %126 : vector<1x1x49x256xf32> to vector<49x256xf32>
    %128 = arith.mulf %110, %127 : vector<49x256xf32>
    %cst_100 = arith.constant dense<0.000000e+00> : vector<256xf32>
    %129 = vector.multi_reduction <add>, %128, %cst_100 [0] : vector<49x256xf32> to vector<256xf32>
    %130 = vector.shape_cast %129 : vector<256xf32> to vector<1x256xf32>
    %131 = arith.mulf %130, %113 : vector<1x256xf32>
    %cst_101 = arith.constant 0.000000e+00 : f32
    %132 = vector.broadcast %cst_101 : f32 to vector<49x256xf32>
    %c0_102 = arith.constant 0 : index
    %c6 = arith.constant 6 : index
    %c0_103 = arith.constant 0 : index
    %133 = vector.load %arg1[%c0_102, %c6, %c0_103] : memref<1x9x256xf32, #tpu.memory_space<vmem>>, vector<1x1x256xf32>
    %134 = vector.shape_cast %133 : vector<1x1x256xf32> to vector<1x256xf32>
    %c0_104 = arith.constant 0 : index
    %c6_105 = arith.constant 6 : index
    %c0_106 = arith.constant 0 : index
    %c0_107 = arith.constant 0 : index
    %135 = vector.load %arg2[%c0_104, %c6_105, %c0_106, %c0_107] : memref<1x9x49x256xf32, #tpu.memory_space<vmem>>, vector<1x1x49x256xf32>
    %136 = vector.shape_cast %135 : vector<1x1x49x256xf32> to vector<49x256xf32>
    %c0_108 = arith.constant 0 : index
    %c0_109 = arith.constant 0 : index
    %137 = vector.load %arg4[%c0_108, %c0_109] : memref<3x256xf32, #tpu.memory_space<vmem>>, vector<1x256xf32>
    %138 = vector.broadcast %137 : vector<1x256xf32> to vector<49x256xf32>
    %139 = arith.addf %136, %138 : vector<49x256xf32>
    %c0_110 = arith.constant 0 : index
    %c0_111 = arith.constant 0 : index
    %c0_112 = arith.constant 0 : index
    %140 = vector.load %arg5[%c0_110, %c0_111, %c0_112] : memref<3x49x256xf32, #tpu.memory_space<vmem>>, vector<1x49x256xf32>
    %141 = vector.shape_cast %140 : vector<1x49x256xf32> to vector<49x256xf32>
    %142 = arith.subf %139, %141 : vector<49x256xf32>
    %143 = vector.broadcast %134 : vector<1x256xf32> to vector<49x256xf32>
    %144 = arith.mulf %143, %142 : vector<49x256xf32>
    %145 = arith.addf %132, %144 : vector<49x256xf32>
    %c0_113 = arith.constant 0 : index
    %c7 = arith.constant 7 : index
    %c0_114 = arith.constant 0 : index
    %146 = vector.load %arg1[%c0_113, %c7, %c0_114] : memref<1x9x256xf32, #tpu.memory_space<vmem>>, vector<1x1x256xf32>
    %147 = vector.shape_cast %146 : vector<1x1x256xf32> to vector<1x256xf32>
    %c0_115 = arith.constant 0 : index
    %c7_116 = arith.constant 7 : index
    %c0_117 = arith.constant 0 : index
    %c0_118 = arith.constant 0 : index
    %148 = vector.load %arg2[%c0_115, %c7_116, %c0_117, %c0_118] : memref<1x9x49x256xf32, #tpu.memory_space<vmem>>, vector<1x1x49x256xf32>
    %149 = vector.shape_cast %148 : vector<1x1x49x256xf32> to vector<49x256xf32>
    %c1_119 = arith.constant 1 : index
    %c0_120 = arith.constant 0 : index
    %150 = vector.load %arg4[%c1_119, %c0_120] : memref<3x256xf32, #tpu.memory_space<vmem>>, vector<1x256xf32>
    %151 = vector.broadcast %150 : vector<1x256xf32> to vector<49x256xf32>
    %152 = arith.addf %149, %151 : vector<49x256xf32>
    %c1_121 = arith.constant 1 : index
    %c0_122 = arith.constant 0 : index
    %c0_123 = arith.constant 0 : index
    %153 = vector.load %arg5[%c1_121, %c0_122, %c0_123] : memref<3x49x256xf32, #tpu.memory_space<vmem>>, vector<1x49x256xf32>
    %154 = vector.shape_cast %153 : vector<1x49x256xf32> to vector<49x256xf32>
    %155 = arith.subf %152, %154 : vector<49x256xf32>
    %156 = vector.broadcast %147 : vector<1x256xf32> to vector<49x256xf32>
    %157 = arith.mulf %156, %155 : vector<49x256xf32>
    %158 = arith.addf %145, %157 : vector<49x256xf32>
    %c0_124 = arith.constant 0 : index
    %c8 = arith.constant 8 : index
    %c0_125 = arith.constant 0 : index
    %159 = vector.load %arg1[%c0_124, %c8, %c0_125] : memref<1x9x256xf32, #tpu.memory_space<vmem>>, vector<1x1x256xf32>
    %160 = vector.shape_cast %159 : vector<1x1x256xf32> to vector<1x256xf32>
    %c0_126 = arith.constant 0 : index
    %c8_127 = arith.constant 8 : index
    %c0_128 = arith.constant 0 : index
    %c0_129 = arith.constant 0 : index
    %161 = vector.load %arg2[%c0_126, %c8_127, %c0_128, %c0_129] : memref<1x9x49x256xf32, #tpu.memory_space<vmem>>, vector<1x1x49x256xf32>
    %162 = vector.shape_cast %161 : vector<1x1x49x256xf32> to vector<49x256xf32>
    %c2_130 = arith.constant 2 : index
    %c0_131 = arith.constant 0 : index
    %163 = vector.load %arg4[%c2_130, %c0_131] : memref<3x256xf32, #tpu.memory_space<vmem>>, vector<1x256xf32>
    %164 = vector.broadcast %163 : vector<1x256xf32> to vector<49x256xf32>
    %165 = arith.addf %162, %164 : vector<49x256xf32>
    %c2_132 = arith.constant 2 : index
    %c0_133 = arith.constant 0 : index
    %c0_134 = arith.constant 0 : index
    %166 = vector.load %arg5[%c2_132, %c0_133, %c0_134] : memref<3x49x256xf32, #tpu.memory_space<vmem>>, vector<1x49x256xf32>
    %167 = vector.shape_cast %166 : vector<1x49x256xf32> to vector<49x256xf32>
    %168 = arith.subf %165, %167 : vector<49x256xf32>
    %169 = vector.broadcast %160 : vector<1x256xf32> to vector<49x256xf32>
    %170 = arith.mulf %169, %168 : vector<49x256xf32>
    %171 = arith.addf %158, %170 : vector<49x256xf32>
    %cst_135 = arith.constant dense<0xFF800000> : vector<256xf32>
    %172 = vector.multi_reduction <maximumf>, %171, %cst_135 [0] : vector<49x256xf32> to vector<256xf32>
    %173 = vector.shape_cast %172 : vector<256xf32> to vector<1x256xf32>
    %174 = vector.broadcast %173 : vector<1x256xf32> to vector<49x256xf32>
    %175 = arith.subf %171, %174 : vector<49x256xf32>
    %176 = math.exp %175 : vector<49x256xf32>
    %cst_136 = arith.constant dense<0.000000e+00> : vector<256xf32>
    %177 = vector.multi_reduction <add>, %176, %cst_136 [0] : vector<49x256xf32> to vector<256xf32>
    %178 = vector.shape_cast %177 : vector<256xf32> to vector<1x256xf32>
    %179 = tpu.reciprocal %178 {approx = true} : vector<1x256xf32> -> vector<1x256xf32>
    %c0_137 = arith.constant 0 : index
    %c6_138 = arith.constant 6 : index
    %c0_139 = arith.constant 0 : index
    %c0_140 = arith.constant 0 : index
    %180 = vector.load %arg3[%c0_137, %c6_138, %c0_139, %c0_140] : memref<1x9x49x256xf32, #tpu.memory_space<vmem>>, vector<1x1x49x256xf32>
    %181 = vector.shape_cast %180 : vector<1x1x49x256xf32> to vector<49x256xf32>
    %182 = arith.mulf %176, %181 : vector<49x256xf32>
    %cst_141 = arith.constant dense<0.000000e+00> : vector<256xf32>
    %183 = vector.multi_reduction <add>, %182, %cst_141 [0] : vector<49x256xf32> to vector<256xf32>
    %184 = vector.shape_cast %183 : vector<256xf32> to vector<1x256xf32>
    %185 = arith.mulf %184, %179 : vector<1x256xf32>
    %c0_142 = arith.constant 0 : index
    %c7_143 = arith.constant 7 : index
    %c0_144 = arith.constant 0 : index
    %c0_145 = arith.constant 0 : index
    %186 = vector.load %arg3[%c0_142, %c7_143, %c0_144, %c0_145] : memref<1x9x49x256xf32, #tpu.memory_space<vmem>>, vector<1x1x49x256xf32>
    %187 = vector.shape_cast %186 : vector<1x1x49x256xf32> to vector<49x256xf32>
    %188 = arith.mulf %176, %187 : vector<49x256xf32>
    %cst_146 = arith.constant dense<0.000000e+00> : vector<256xf32>
    %189 = vector.multi_reduction <add>, %188, %cst_146 [0] : vector<49x256xf32> to vector<256xf32>
    %190 = vector.shape_cast %189 : vector<256xf32> to vector<1x256xf32>
    %191 = arith.mulf %190, %179 : vector<1x256xf32>
    %c0_147 = arith.constant 0 : index
    %c8_148 = arith.constant 8 : index
    %c0_149 = arith.constant 0 : index
    %c0_150 = arith.constant 0 : index
    %192 = vector.load %arg3[%c0_147, %c8_148, %c0_149, %c0_150] : memref<1x9x49x256xf32, #tpu.memory_space<vmem>>, vector<1x1x49x256xf32>
    %193 = vector.shape_cast %192 : vector<1x1x49x256xf32> to vector<49x256xf32>
    %194 = arith.mulf %176, %193 : vector<49x256xf32>
    %cst_151 = arith.constant dense<0.000000e+00> : vector<256xf32>
    %195 = vector.multi_reduction <add>, %194, %cst_151 [0] : vector<49x256xf32> to vector<256xf32>
    %196 = vector.shape_cast %195 : vector<256xf32> to vector<1x256xf32>
    %197 = arith.mulf %196, %179 : vector<1x256xf32>
    %198 = tpu.concatenate %53, %59, %65, %119, %125, %131, %185, %191, %197 in 0 : vector<1x256xf32>, vector<1x256xf32>, vector<1x256xf32>, vector<1x256xf32>, vector<1x256xf32>, vector<1x256xf32>, vector<1x256xf32>, vector<1x256xf32>, vector<1x256xf32> -> vector<9x256xf32>
    %c0_152 = arith.constant 0 : index
    %c0_153 = arith.constant 0 : index
    %c0_154 = arith.constant 0 : index
    %199 = vector.load %arg7[%c0_152, %c0_153, %c0_154] : memref<1x9x256xf32, #tpu.memory_space<vmem>>, vector<1x9x256xf32>
    %200 = vector.shape_cast %199 : vector<1x9x256xf32> to vector<9x256xf32>
    %cst_155 = arith.constant dense<0.000000e+00> : vector<256xf32>
    %201 = vector.multi_reduction <add>, %200, %cst_155 [0] : vector<9x256xf32> to vector<256xf32>
    %202 = vector.shape_cast %201 : vector<256xf32> to vector<1x256xf32>
    %cst_156 = arith.constant 0.000000e+00 : f32
    %203 = vector.broadcast %cst_156 : f32 to vector<1x256xf32>
    %204 = arith.maximumf %202, %203 : vector<1x256xf32>
    %c0_157 = arith.constant 0 : index
    %c0_158 = arith.constant 0 : index
    %205 = vector.load %arg8[%c0_157, %c0_158] : memref<256x256xf32, #tpu.memory_space<vmem>>, vector<256x256xf32>
    %cst_159 = arith.constant dense<0.000000e+00> : vector<1x256xf32>
    %206 = tpu.matmul %204, %205, %cst_159 {dimension_numbers = #tpu.dot_dimension_numbers<[1], [0], [0], [1], [0, 0, 1, 1], [], []>} : vector<1x256xf32>, vector<256x256xf32>, vector<1x256xf32> -> vector<1x256xf32>
    %c0_160 = arith.constant 0 : index
    %c0_161 = arith.constant 0 : index
    %c0_162 = arith.constant 0 : index
    %c0_163 = arith.constant 0 : index
    %207 = vector.load %arg6[%c0_160, %c0_161, %c0_162, %c0_163] : memref<1x9x9x256xf32, #tpu.memory_space<vmem>>, vector<1x1x9x256xf32>
    %208 = vector.shape_cast %207 : vector<1x1x9x256xf32> to vector<9x256xf32>
    %c0_164 = arith.constant 0 : index
    %c1_165 = arith.constant 1 : index
    %c0_166 = arith.constant 0 : index
    %c0_167 = arith.constant 0 : index
    %209 = vector.load %arg6[%c0_164, %c1_165, %c0_166, %c0_167] : memref<1x9x9x256xf32, #tpu.memory_space<vmem>>, vector<1x1x9x256xf32>
    %210 = vector.shape_cast %209 : vector<1x1x9x256xf32> to vector<9x256xf32>
    %211 = arith.maximumf %208, %210 : vector<9x256xf32>
    %c0_168 = arith.constant 0 : index
    %c2_169 = arith.constant 2 : index
    %c0_170 = arith.constant 0 : index
    %c0_171 = arith.constant 0 : index
    %212 = vector.load %arg6[%c0_168, %c2_169, %c0_170, %c0_171] : memref<1x9x9x256xf32, #tpu.memory_space<vmem>>, vector<1x1x9x256xf32>
    %213 = vector.shape_cast %212 : vector<1x1x9x256xf32> to vector<9x256xf32>
    %214 = arith.maximumf %211, %213 : vector<9x256xf32>
    %c0_172 = arith.constant 0 : index
    %c3_173 = arith.constant 3 : index
    %c0_174 = arith.constant 0 : index
    %c0_175 = arith.constant 0 : index
    %215 = vector.load %arg6[%c0_172, %c3_173, %c0_174, %c0_175] : memref<1x9x9x256xf32, #tpu.memory_space<vmem>>, vector<1x1x9x256xf32>
    %216 = vector.shape_cast %215 : vector<1x1x9x256xf32> to vector<9x256xf32>
    %217 = arith.maximumf %214, %216 : vector<9x256xf32>
    %c0_176 = arith.constant 0 : index
    %c4_177 = arith.constant 4 : index
    %c0_178 = arith.constant 0 : index
    %c0_179 = arith.constant 0 : index
    %218 = vector.load %arg6[%c0_176, %c4_177, %c0_178, %c0_179] : memref<1x9x9x256xf32, #tpu.memory_space<vmem>>, vector<1x1x9x256xf32>
    %219 = vector.shape_cast %218 : vector<1x1x9x256xf32> to vector<9x256xf32>
    %220 = arith.maximumf %217, %219 : vector<9x256xf32>
    %c0_180 = arith.constant 0 : index
    %c5_181 = arith.constant 5 : index
    %c0_182 = arith.constant 0 : index
    %c0_183 = arith.constant 0 : index
    %221 = vector.load %arg6[%c0_180, %c5_181, %c0_182, %c0_183] : memref<1x9x9x256xf32, #tpu.memory_space<vmem>>, vector<1x1x9x256xf32>
    %222 = vector.shape_cast %221 : vector<1x1x9x256xf32> to vector<9x256xf32>
    %223 = arith.maximumf %220, %222 : vector<9x256xf32>
    %c0_184 = arith.constant 0 : index
    %c6_185 = arith.constant 6 : index
    %c0_186 = arith.constant 0 : index
    %c0_187 = arith.constant 0 : index
    %224 = vector.load %arg6[%c0_184, %c6_185, %c0_186, %c0_187] : memref<1x9x9x256xf32, #tpu.memory_space<vmem>>, vector<1x1x9x256xf32>
    %225 = vector.shape_cast %224 : vector<1x1x9x256xf32> to vector<9x256xf32>
    %226 = arith.maximumf %223, %225 : vector<9x256xf32>
    %c0_188 = arith.constant 0 : index
    %c7_189 = arith.constant 7 : index
    %c0_190 = arith.constant 0 : index
    %c0_191 = arith.constant 0 : index
    %227 = vector.load %arg6[%c0_188, %c7_189, %c0_190, %c0_191] : memref<1x9x9x256xf32, #tpu.memory_space<vmem>>, vector<1x1x9x256xf32>
    %228 = vector.shape_cast %227 : vector<1x1x9x256xf32> to vector<9x256xf32>
    %229 = arith.maximumf %226, %228 : vector<9x256xf32>
    %c0_192 = arith.constant 0 : index
    %c8_193 = arith.constant 8 : index
    %c0_194 = arith.constant 0 : index
    %c0_195 = arith.constant 0 : index
    %230 = vector.load %arg6[%c0_192, %c8_193, %c0_194, %c0_195] : memref<1x9x9x256xf32, #tpu.memory_space<vmem>>, vector<1x1x9x256xf32>
    %231 = vector.shape_cast %230 : vector<1x1x9x256xf32> to vector<9x256xf32>
    %232 = arith.maximumf %229, %231 : vector<9x256xf32>
    %cst_196 = arith.constant 0.000000e+00 : f32
    %233 = vector.broadcast %cst_196 : f32 to vector<9x256xf32>
    %c0_197 = arith.constant 0 : index
    %c0_198 = arith.constant 0 : index
    %c0_199 = arith.constant 0 : index
    %c0_200 = arith.constant 0 : index
    %234 = vector.load %arg6[%c0_197, %c0_198, %c0_199, %c0_200] : memref<1x9x9x256xf32, #tpu.memory_space<vmem>>, vector<1x1x9x256xf32>
    %235 = vector.shape_cast %234 : vector<1x1x9x256xf32> to vector<9x256xf32>
    %236 = arith.subf %235, %232 : vector<9x256xf32>
    %237 = math.exp %236 : vector<9x256xf32>
    %238 = arith.addf %233, %237 : vector<9x256xf32>
    %c0_201 = arith.constant 0 : index
    %c1_202 = arith.constant 1 : index
    %c0_203 = arith.constant 0 : index
    %c0_204 = arith.constant 0 : index
    %239 = vector.load %arg6[%c0_201, %c1_202, %c0_203, %c0_204] : memref<1x9x9x256xf32, #tpu.memory_space<vmem>>, vector<1x1x9x256xf32>
    %240 = vector.shape_cast %239 : vector<1x1x9x256xf32> to vector<9x256xf32>
    %241 = arith.subf %240, %232 : vector<9x256xf32>
    %242 = math.exp %241 : vector<9x256xf32>
    %243 = arith.addf %238, %242 : vector<9x256xf32>
    %c0_205 = arith.constant 0 : index
    %c2_206 = arith.constant 2 : index
    %c0_207 = arith.constant 0 : index
    %c0_208 = arith.constant 0 : index
    %244 = vector.load %arg6[%c0_205, %c2_206, %c0_207, %c0_208] : memref<1x9x9x256xf32, #tpu.memory_space<vmem>>, vector<1x1x9x256xf32>
    %245 = vector.shape_cast %244 : vector<1x1x9x256xf32> to vector<9x256xf32>
    %246 = arith.subf %245, %232 : vector<9x256xf32>
    %247 = math.exp %246 : vector<9x256xf32>
    %248 = arith.addf %243, %247 : vector<9x256xf32>
    %c0_209 = arith.constant 0 : index
    %c3_210 = arith.constant 3 : index
    %c0_211 = arith.constant 0 : index
    %c0_212 = arith.constant 0 : index
    %249 = vector.load %arg6[%c0_209, %c3_210, %c0_211, %c0_212] : memref<1x9x9x256xf32, #tpu.memory_space<vmem>>, vector<1x1x9x256xf32>
    %250 = vector.shape_cast %249 : vector<1x1x9x256xf32> to vector<9x256xf32>
    %251 = arith.subf %250, %232 : vector<9x256xf32>
    %252 = math.exp %251 : vector<9x256xf32>
    %253 = arith.addf %248, %252 : vector<9x256xf32>
    %c0_213 = arith.constant 0 : index
    %c4_214 = arith.constant 4 : index
    %c0_215 = arith.constant 0 : index
    %c0_216 = arith.constant 0 : index
    %254 = vector.load %arg6[%c0_213, %c4_214, %c0_215, %c0_216] : memref<1x9x9x256xf32, #tpu.memory_space<vmem>>, vector<1x1x9x256xf32>
    %255 = vector.shape_cast %254 : vector<1x1x9x256xf32> to vector<9x256xf32>
    %256 = arith.subf %255, %232 : vector<9x256xf32>
    %257 = math.exp %256 : vector<9x256xf32>
    %258 = arith.addf %253, %257 : vector<9x256xf32>
    %c0_217 = arith.constant 0 : index
    %c5_218 = arith.constant 5 : index
    %c0_219 = arith.constant 0 : index
    %c0_220 = arith.constant 0 : index
    %259 = vector.load %arg6[%c0_217, %c5_218, %c0_219, %c0_220] : memref<1x9x9x256xf32, #tpu.memory_space<vmem>>, vector<1x1x9x256xf32>
    %260 = vector.shape_cast %259 : vector<1x1x9x256xf32> to vector<9x256xf32>
    %261 = arith.subf %260, %232 : vector<9x256xf32>
    %262 = math.exp %261 : vector<9x256xf32>
    %263 = arith.addf %258, %262 : vector<9x256xf32>
    %c0_221 = arith.constant 0 : index
    %c6_222 = arith.constant 6 : index
    %c0_223 = arith.constant 0 : index
    %c0_224 = arith.constant 0 : index
    %264 = vector.load %arg6[%c0_221, %c6_222, %c0_223, %c0_224] : memref<1x9x9x256xf32, #tpu.memory_space<vmem>>, vector<1x1x9x256xf32>
    %265 = vector.shape_cast %264 : vector<1x1x9x256xf32> to vector<9x256xf32>
    %266 = arith.subf %265, %232 : vector<9x256xf32>
    %267 = math.exp %266 : vector<9x256xf32>
    %268 = arith.addf %263, %267 : vector<9x256xf32>
    %c0_225 = arith.constant 0 : index
    %c7_226 = arith.constant 7 : index
    %c0_227 = arith.constant 0 : index
    %c0_228 = arith.constant 0 : index
    %269 = vector.load %arg6[%c0_225, %c7_226, %c0_227, %c0_228] : memref<1x9x9x256xf32, #tpu.memory_space<vmem>>, vector<1x1x9x256xf32>
    %270 = vector.shape_cast %269 : vector<1x1x9x256xf32> to vector<9x256xf32>
    %271 = arith.subf %270, %232 : vector<9x256xf32>
    %272 = math.exp %271 : vector<9x256xf32>
    %273 = arith.addf %268, %272 : vector<9x256xf32>
    %c0_229 = arith.constant 0 : index
    %c8_230 = arith.constant 8 : index
    %c0_231 = arith.constant 0 : index
    %c0_232 = arith.constant 0 : index
    %274 = vector.load %arg6[%c0_229, %c8_230, %c0_231, %c0_232] : memref<1x9x9x256xf32, #tpu.memory_space<vmem>>, vector<1x1x9x256xf32>
    %275 = vector.shape_cast %274 : vector<1x1x9x256xf32> to vector<9x256xf32>
    %276 = arith.subf %275, %232 : vector<9x256xf32>
    %277 = math.exp %276 : vector<9x256xf32>
    %278 = arith.addf %273, %277 : vector<9x256xf32>
    %279 = tpu.reciprocal %278 {approx = true} : vector<9x256xf32> -> vector<9x256xf32>
    %c0_233 = arith.constant 0 : index
    %c0_234 = arith.constant 0 : index
    %c0_235 = arith.constant 0 : index
    %c0_236 = arith.constant 0 : index
    %280 = vector.load %arg6[%c0_233, %c0_234, %c0_235, %c0_236] : memref<1x9x9x256xf32, #tpu.memory_space<vmem>>, vector<1x1x9x256xf32>
    %281 = vector.shape_cast %280 : vector<1x1x9x256xf32> to vector<9x256xf32>
    %282 = arith.subf %281, %232 : vector<9x256xf32>
    %283 = math.exp %282 : vector<9x256xf32>
    %284 = arith.mulf %283, %279 : vector<9x256xf32>
    %cst_237 = arith.constant dense<0.000000e+00> : vector<256xf32>
    %285 = vector.multi_reduction <add>, %284, %cst_237 [0] : vector<9x256xf32> to vector<256xf32>
    %286 = vector.shape_cast %285 : vector<256xf32> to vector<1x256xf32>
    %c0_238 = arith.constant 0 : index
    %c1_239 = arith.constant 1 : index
    %c0_240 = arith.constant 0 : index
    %c0_241 = arith.constant 0 : index
    %287 = vector.load %arg6[%c0_238, %c1_239, %c0_240, %c0_241] : memref<1x9x9x256xf32, #tpu.memory_space<vmem>>, vector<1x1x9x256xf32>
    %288 = vector.shape_cast %287 : vector<1x1x9x256xf32> to vector<9x256xf32>
    %289 = arith.subf %288, %232 : vector<9x256xf32>
    %290 = math.exp %289 : vector<9x256xf32>
    %291 = arith.mulf %290, %279 : vector<9x256xf32>
    %cst_242 = arith.constant dense<0.000000e+00> : vector<256xf32>
    %292 = vector.multi_reduction <add>, %291, %cst_242 [0] : vector<9x256xf32> to vector<256xf32>
    %293 = vector.shape_cast %292 : vector<256xf32> to vector<1x256xf32>
    %c0_243 = arith.constant 0 : index
    %c2_244 = arith.constant 2 : index
    %c0_245 = arith.constant 0 : index
    %c0_246 = arith.constant 0 : index
    %294 = vector.load %arg6[%c0_243, %c2_244, %c0_245, %c0_246] : memref<1x9x9x256xf32, #tpu.memory_space<vmem>>, vector<1x1x9x256xf32>
    %295 = vector.shape_cast %294 : vector<1x1x9x256xf32> to vector<9x256xf32>
    %296 = arith.subf %295, %232 : vector<9x256xf32>
    %297 = math.exp %296 : vector<9x256xf32>
    %298 = arith.mulf %297, %279 : vector<9x256xf32>
    %cst_247 = arith.constant dense<0.000000e+00> : vector<256xf32>
    %299 = vector.multi_reduction <add>, %298, %cst_247 [0] : vector<9x256xf32> to vector<256xf32>
    %300 = vector.shape_cast %299 : vector<256xf32> to vector<1x256xf32>
    %c0_248 = arith.constant 0 : index
    %c3_249 = arith.constant 3 : index
    %c0_250 = arith.constant 0 : index
    %c0_251 = arith.constant 0 : index
    %301 = vector.load %arg6[%c0_248, %c3_249, %c0_250, %c0_251] : memref<1x9x9x256xf32, #tpu.memory_space<vmem>>, vector<1x1x9x256xf32>
    %302 = vector.shape_cast %301 : vector<1x1x9x256xf32> to vector<9x256xf32>
    %303 = arith.subf %302, %232 : vector<9x256xf32>
    %304 = math.exp %303 : vector<9x256xf32>
    %305 = arith.mulf %304, %279 : vector<9x256xf32>
    %cst_252 = arith.constant dense<0.000000e+00> : vector<256xf32>
    %306 = vector.multi_reduction <add>, %305, %cst_252 [0] : vector<9x256xf32> to vector<256xf32>
    %307 = vector.shape_cast %306 : vector<256xf32> to vector<1x256xf32>
    %c0_253 = arith.constant 0 : index
    %c4_254 = arith.constant 4 : index
    %c0_255 = arith.constant 0 : index
    %c0_256 = arith.constant 0 : index
    %308 = vector.load %arg6[%c0_253, %c4_254, %c0_255, %c0_256] : memref<1x9x9x256xf32, #tpu.memory_space<vmem>>, vector<1x1x9x256xf32>
    %309 = vector.shape_cast %308 : vector<1x1x9x256xf32> to vector<9x256xf32>
    %310 = arith.subf %309, %232 : vector<9x256xf32>
    %311 = math.exp %310 : vector<9x256xf32>
    %312 = arith.mulf %311, %279 : vector<9x256xf32>
    %cst_257 = arith.constant dense<0.000000e+00> : vector<256xf32>
    %313 = vector.multi_reduction <add>, %312, %cst_257 [0] : vector<9x256xf32> to vector<256xf32>
    %314 = vector.shape_cast %313 : vector<256xf32> to vector<1x256xf32>
    %c0_258 = arith.constant 0 : index
    %c5_259 = arith.constant 5 : index
    %c0_260 = arith.constant 0 : index
    %c0_261 = arith.constant 0 : index
    %315 = vector.load %arg6[%c0_258, %c5_259, %c0_260, %c0_261] : memref<1x9x9x256xf32, #tpu.memory_space<vmem>>, vector<1x1x9x256xf32>
    %316 = vector.shape_cast %315 : vector<1x1x9x256xf32> to vector<9x256xf32>
    %317 = arith.subf %316, %232 : vector<9x256xf32>
    %318 = math.exp %317 : vector<9x256xf32>
    %319 = arith.mulf %318, %279 : vector<9x256xf32>
    %cst_262 = arith.constant dense<0.000000e+00> : vector<256xf32>
    %320 = vector.multi_reduction <add>, %319, %cst_262 [0] : vector<9x256xf32> to vector<256xf32>
    %321 = vector.shape_cast %320 : vector<256xf32> to vector<1x256xf32>
    %c0_263 = arith.constant 0 : index
    %c6_264 = arith.constant 6 : index
    %c0_265 = arith.constant 0 : index
    %c0_266 = arith.constant 0 : index
    %322 = vector.load %arg6[%c0_263, %c6_264, %c0_265, %c0_266] : memref<1x9x9x256xf32, #tpu.memory_space<vmem>>, vector<1x1x9x256xf32>
    %323 = vector.shape_cast %322 : vector<1x1x9x256xf32> to vector<9x256xf32>
    %324 = arith.subf %323, %232 : vector<9x256xf32>
    %325 = math.exp %324 : vector<9x256xf32>
    %326 = arith.mulf %325, %279 : vector<9x256xf32>
    %cst_267 = arith.constant dense<0.000000e+00> : vector<256xf32>
    %327 = vector.multi_reduction <add>, %326, %cst_267 [0] : vector<9x256xf32> to vector<256xf32>
    %328 = vector.shape_cast %327 : vector<256xf32> to vector<1x256xf32>
    %c0_268 = arith.constant 0 : index
    %c7_269 = arith.constant 7 : index
    %c0_270 = arith.constant 0 : index
    %c0_271 = arith.constant 0 : index
    %329 = vector.load %arg6[%c0_268, %c7_269, %c0_270, %c0_271] : memref<1x9x9x256xf32, #tpu.memory_space<vmem>>, vector<1x1x9x256xf32>
    %330 = vector.shape_cast %329 : vector<1x1x9x256xf32> to vector<9x256xf32>
    %331 = arith.subf %330, %232 : vector<9x256xf32>
    %332 = math.exp %331 : vector<9x256xf32>
    %333 = arith.mulf %332, %279 : vector<9x256xf32>
    %cst_272 = arith.constant dense<0.000000e+00> : vector<256xf32>
    %334 = vector.multi_reduction <add>, %333, %cst_272 [0] : vector<9x256xf32> to vector<256xf32>
    %335 = vector.shape_cast %334 : vector<256xf32> to vector<1x256xf32>
    %c0_273 = arith.constant 0 : index
    %c8_274 = arith.constant 8 : index
    %c0_275 = arith.constant 0 : index
    %c0_276 = arith.constant 0 : index
    %336 = vector.load %arg6[%c0_273, %c8_274, %c0_275, %c0_276] : memref<1x9x9x256xf32, #tpu.memory_space<vmem>>, vector<1x1x9x256xf32>
    %337 = vector.shape_cast %336 : vector<1x1x9x256xf32> to vector<9x256xf32>
    %338 = arith.subf %337, %232 : vector<9x256xf32>
    %339 = math.exp %338 : vector<9x256xf32>
    %340 = arith.mulf %339, %279 : vector<9x256xf32>
    %cst_277 = arith.constant dense<0.000000e+00> : vector<256xf32>
    %341 = vector.multi_reduction <add>, %340, %cst_277 [0] : vector<9x256xf32> to vector<256xf32>
    %342 = vector.shape_cast %341 : vector<256xf32> to vector<1x256xf32>
    %343 = tpu.concatenate %286, %293, %300, %307, %314, %321, %328, %335, %342 in 0 : vector<1x256xf32>, vector<1x256xf32>, vector<1x256xf32>, vector<1x256xf32>, vector<1x256xf32>, vector<1x256xf32>, vector<1x256xf32>, vector<1x256xf32>, vector<1x256xf32> -> vector<9x256xf32>
    %c0_278 = arith.constant 0 : index
    %344 = memref.load %arg9[%c0_278] : memref<2xf32, #tpu.memory_space<smem>>
    %c1_279 = arith.constant 1 : index
    %345 = memref.load %arg9[%c1_279] : memref<2xf32, #tpu.memory_space<smem>>
    %346 = vector.broadcast %344 : f32 to vector<9x256xf32>
    %347 = arith.mulf %346, %198 : vector<9x256xf32>
    %348 = vector.broadcast %206 : vector<1x256xf32> to vector<9x256xf32>
    %349 = arith.mulf %348, %343 : vector<9x256xf32>
    %350 = vector.broadcast %345 : f32 to vector<9x256xf32>
    %351 = arith.mulf %350, %349 : vector<9x256xf32>
    %352 = arith.addf %347, %351 : vector<9x256xf32>
    %c0_280 = arith.constant 0 : index
    %c0_281 = arith.constant 0 : index
    %c0_282 = arith.constant 0 : index
    %353 = vector.load %arg10[%c0_280, %c0_281, %c0_282] : memref<1x9x256xf32, #tpu.memory_space<vmem>>, vector<1x9x256xf32>
    %354 = vector.shape_cast %353 : vector<1x9x256xf32> to vector<9x256xf32>
    %355 = vector.shape_cast %352 : vector<9x256xf32> to vector<1x9x256xf32>
    tpu.vector_store %arg10[%c0_280, %c0_281, %c0_282], %355 {strides = array<i32>} : memref<1x9x256xf32, #tpu.memory_space<vmem>>, vector<1x9x256xf32>,
    return
  }
  func.func @transform_0(%arg0: i32) -> (i32, i32, i32) {
    %c0_i32 = arith.constant 0 : i32
    %c0_i32_0 = arith.constant 0 : i32
    %c0_i32_1 = arith.constant 0 : i32
    return %arg0, %c0_i32, %c0_i32_0 : i32, i32, i32
  }
  func.func @transform_1(%arg0: i32) -> (i32, i32, i32, i32) {
    %c0_i32 = arith.constant 0 : i32
    %c0_i32_0 = arith.constant 0 : i32
    %c0_i32_1 = arith.constant 0 : i32
    %c0_i32_2 = arith.constant 0 : i32
    return %arg0, %c0_i32, %c0_i32_0, %c0_i32_1 : i32, i32, i32, i32
  }
  func.func @transform_2(%arg0: i32) -> (i32, i32, i32, i32) {
    %c0_i32 = arith.constant 0 : i32
    %c0_i32_0 = arith.constant 0 : i32
    %c0_i32_1 = arith.constant 0 : i32
    %c0_i32_2 = arith.constant 0 : i32
    return %arg0, %c0_i32, %c0_i32_0, %c0_i32_1 : i32, i32, i32, i32
  }
  func.func @transform_3(%arg0: i32) -> (i32, i32) {
    %c0_i32 = arith.constant 0 : i32
    %c0_i32_0 = arith.constant 0 : i32
    %c0_i32_1 = arith.constant 0 : i32
    return %c0_i32, %c0_i32_0 : i32, i32
  }
  func.func @transform_4(%arg0: i32) -> (i32, i32, i32) {
    %c0_i32 = arith.constant 0 : i32
    %c0_i32_0 = arith.constant 0 : i32
    %c0_i32_1 = arith.constant 0 : i32
    %c0_i32_2 = arith.constant 0 : i32
    return %c0_i32, %c0_i32_0, %c0_i32_1 : i32, i32, i32
  }
  func.func @transform_5(%arg0: i32) -> (i32, i32, i32, i32) {
    %c0_i32 = arith.constant 0 : i32
    %c0_i32_0 = arith.constant 0 : i32
    %c0_i32_1 = arith.constant 0 : i32
    %c0_i32_2 = arith.constant 0 : i32
    return %arg0, %c0_i32, %c0_i32_0, %c0_i32_1 : i32, i32, i32, i32
  }
  func.func @transform_6(%arg0: i32) -> (i32, i32, i32) {
    %c0_i32 = arith.constant 0 : i32
    %c0_i32_0 = arith.constant 0 : i32
    %c0_i32_1 = arith.constant 0 : i32
    return %arg0, %c0_i32, %c0_i32_0 : i32, i32, i32
  }
  func.func @transform_7(%arg0: i32) -> (i32, i32) {
    %c0_i32 = arith.constant 0 : i32
    %c0_i32_0 = arith.constant 0 : i32
    %c0_i32_1 = arith.constant 0 : i32
    return %c0_i32, %c0_i32_0 : i32, i32
  }
  func.func @transform_8(%arg0: i32) -> i32 {
    %c0_i32 = arith.constant 0 : i32
    %c0_i32_0 = arith.constant 0 : i32
    return %c0_i32 : i32
  }
  func.func @transform_9(%arg0: i32) -> (i32, i32, i32) {
    %c0_i32 = arith.constant 0 : i32
    %c0_i32_0 = arith.constant 0 : i32
    %c0_i32_1 = arith.constant 0 : i32
    return %arg0, %c0_i32, %c0_i32_0 : i32, i32, i32
  }
}

</mosaic_0001>

<bundles_post_ra>
// kernel: acmix_forward.2
= control target key start
LH: loop header
LB: loop body
LE: loop exit
PB: predicated region body
PF: predicated region fallthrough
CT: control target
= control target key end

     0   :  { %vm163_vm0 = vcmask 1040384   ;;  %vm583_vm1 = vmmov 1   ;;  %v584_v3 = vmov 0.0   ;;  %v585_v8 = vmov 0   ;;  %s950_s0 = inlined_call_operand.vmem [shape: f32[9,512], index: 0, kind: input, shape index: {}]   ;;  %s951_s1 = inlined_call_operand.vmem [shape: f32[108,9], index: 1, kind: input, shape index: {}]   ;;  %s952_s2 = inlined_call_operand.vmem [shape: f32[108,1], index: 2, kind: input, shape index: {}]   ;;  %s953_s3 = inlined_call_operand.vmem [shape: f32[108,512], index: 3, kind: output, shape index: {}]  }
   0x1   :  { %v29_v0 = vld [vmem:[%s950_s0 + $0x8] sm:$0xff]  ;;  %vm612_vm2 = vmpackc.low %vm163_vm0, %vm583_vm1  ;;  %240 = vmatprep.mubr.f32.mxu0 %v584_v3  ;;  %389 = vmatprep.mubr.f32.mxu1 %v584_v3  ;;  %v31_v5 = vld [vmem:[%s950_s0 + $0x18] sm:$0xff]  ;;  %vm120_vm3 = vcmask 72704  }
   0x2   :  { %v33_v1 = vld [vmem:[%s950_s0 + $0x28] sm:$0x1]  ;;  %v35_v6 = vld [vmem:[%s950_s0 + $0x38] sm:$0x1]  ;;  %v28_v7 = vld [vmem:[%s950_s0] sm:$0xff]  ;;  %581 = vset.pattern.permute.xlu0 %v585_v8  ;;  %582 = vset.pattern.permute.xlu1 %v585_v8 }
   0x3   :  { %v566_v4 = vpack.c.bf16 %v33_v1, %v29_v0  ;;  %v572_v9 = vpack.c.bf16 %v35_v6, %v31_v5  ;;  %v32_v10 = vld [vmem:[%s950_s0 + $0x20] sm:$0x1]  ;;  %v30_v11 = vld [vmem:[%s950_s0 + $0x10] sm:$0xff]  ;;  %v15_v18 = vld [vmem:[%s951_s1 + $0x8] sm:$0xff] }
   0x4   :  { %v34_v12 = vld [vmem:[%s950_s0 + $0x30] sm:$0x1]  ;;  %v569_v13 = vpack.c.bf16 %v32_v10, %v28_v7  ;;  %v14_v15 = vld [vmem:[%s951_s1] sm:$0xff]  ;;  %v37_v19 = vld [vmem:[%s952_s2 + $0x8] sm:$0xff] }
   0x5   :  { %568 = vmatprep.subr.msk.bf16.mxu0 %vm612_vm2, %v566_v4  ;;  %v575_v14 = vpack.c.bf16 %v34_v12, %v30_v11  ;;  %574 = vmatprep.subr.msk.bf16.mxu1 %vm612_vm2, %v572_v9  ;;  %v36_v16 = vld [vmem:[%s952_s2] sm:$0xff]  ;;  %v38_v17 = vld [vmem:[%s952_s2 + $0x10] sm:$0xff]  ;;  %v39_v20 = vld [vmem:[%s952_s2 + $0x18] sm:$0xff] }
   0x6   :  { %571 = vmatpush1.bf16.msk.msra.mxu0 %vm612_vm2, %v569_v13  ;;  %52 = vperm.xlu0 %581, %v36_v16   ;;  %v16_v21 = vld [vmem:[%s951_s1 + $0x10] sm:$0xff]  ;;  %v41_v22 = vld [vmem:[%s952_s2 + $0x28] sm:$0xff]  ;;  %v40_v23 = vld [vmem:[%s952_s2 + $0x20] sm:$0xff] }
   0x7   :  { %577 = vmatpush1.bf16.msk.msra.mxu1 %vm612_vm2, %v575_v14  ;;  %62 = vperm.xlu1 %582, %v38_v17   ;;  %v17_v24 = vld [vmem:[%s951_s1 + $0x18] sm:$0xff]  ;;  %v42_v26 = vld [vmem:[%s952_s2 + $0x30] sm:$0xff]  ;;  %v18_v27 = vld [vmem:[%s951_s1 + $0x20] sm:$0xff] }
   0x8   :  { %v43_v25 = vld [vmem:[%s952_s2 + $0x38] sm:$0xff]  ;;  %v45_v28 = vld [vmem:[%s952_s2 + $0x48] sm:$0xff]  ;;  %v44_v29 = vld [vmem:[%s952_s2 + $0x40] sm:$0xff] }
   0x9   :  { %536 = vmatmul.mubr.msk.f32.vlgmr.msra.gmra.mrb[0].mxu0 %vm120_vm3, %v14_v15  ;;  %v19_v30 = vld [vmem:[%s951_s1 + $0x28] sm:$0xff]  ;;  %v47_v31 = vld [vmem:[%s952_s2 + $0x58] sm:$0xff]  ;;  %v46_v32 = vld [vmem:[%s952_s2 + $0x50] sm:$0xff] }
   0xa   :  { %552 = vmatmul.mubr.msk.f32.vlgmr.msra.gmra.mrb[0].mxu1 %vm120_vm3, %v14_v15  ;;  %246 = vmatprep.mubr.f32.mxu0 %v584_v3  ;;  %v20_v33 = vld [vmem:[%s951_s1 + $0x30] sm:$0xff]  ;;  %v49_v34 = vld [vmem:[%s952_s2 + $0x68] sm:$0xf]  ;;  %v48_v35 = vld [vmem:[%s952_s2 + $0x60] sm:$0xff] }
   0xb   :  { %395 = vmatprep.mubr.f32.mxu1 %v584_v3  ;;  %57 = vperm.xlu0 %581, %v37_v19   ;;  %v21_v36 = vld [vmem:[%s951_s1 + $0x38] sm:$0xff]  ;;  %v22_v37 = vld [vmem:[%s951_s1 + $0x40] sm:$0xff]  ;;  %v23_v38 = vld [vmem:[%s951_s1 + $0x48] sm:$0xff] }
   0xc   :  { %67 = vperm.xlu1 %582, %v39_v20   ;;  %v24_v39 = vld [vmem:[%s951_s1 + $0x50] sm:$0xff]  ;;  %v25_v40 = vld [vmem:[%s951_s1 + $0x58] sm:$0xff]  ;;  %v26_v41 = vld [vmem:[%s951_s1 + $0x60] sm:$0xff] }
   0xd   :  { %537 = vmatmul.mubr.msk.f32.gmra.mrb[2].mxu0 %vm120_vm3, %v15_v18  ;;  %v27_v42 = vld [vmem:[%s951_s1 + $0x68] sm:$0xf] }
   0xe   :  { %553 = vmatmul.mubr.msk.f32.gmra.mrb[2].mxu1 %vm120_vm3, %v15_v18  ;;  %252 = vmatprep.mubr.f32.mxu0 %v584_v3 }
   0xf   :  { %401 = vmatprep.mubr.f32.mxu1 %v584_v3  ;;  %72 = vperm.xlu0 %581, %v40_v23  }
  0x10   :  { %77 = vperm.xlu1 %582, %v41_v22  }
  0x11   :  { %538 = vmatmul.mubr.msk.f32.gmra.mrb[4].mxu0 %vm120_vm3, %v16_v21 }
  0x12   :  { %554 = vmatmul.mubr.msk.f32.gmra.mrb[4].mxu1 %vm120_vm3, %v16_v21  ;;  %258 = vmatprep.mubr.f32.mxu0 %v584_v3 }
  0x13   :  { %407 = vmatprep.mubr.f32.mxu1 %v584_v3  ;;  %82 = vperm.xlu0 %581, %v42_v26  }
  0x14   :  { %87 = vperm.xlu1 %582, %v43_v25  }
  0x15   :  { %539 = vmatmul.mubr.msk.f32.gmra.mrb[6].mxu0 %vm120_vm3, %v17_v24 }
  0x16   :  { %555 = vmatmul.mubr.msk.f32.gmra.mrb[6].mxu1 %vm120_vm3, %v17_v24  ;;  %264 = vmatprep.mubr.f32.mxu0 %v584_v3 }
  0x17   :  { %413 = vmatprep.mubr.f32.mxu1 %v584_v3  ;;  %92 = vperm.xlu0 %581, %v44_v29  }
  0x18   :  { %97 = vperm.xlu1 %582, %v45_v28  }
  0x19   :  { %540 = vmatmul.mubr.msk.f32.gmra.mrb[8].mxu0 %vm120_vm3, %v18_v27 }
  0x1a   :  { %556 = vmatmul.mubr.msk.f32.gmra.mrb[8].mxu1 %vm120_vm3, %v18_v27  ;;  %270 = vmatprep.mubr.f32.mxu0 %v584_v3 }
  0x1b   :  { %419 = vmatprep.mubr.f32.mxu1 %v584_v3  ;;  %102 = vperm.xlu0 %581, %v46_v32  }
  0x1c   :  { %107 = vperm.xlu1 %582, %v47_v31  }
  0x1d   :  { %541 = vmatmul.mubr.msk.f32.gmra.mrb[10].mxu0 %vm120_vm3, %v19_v30 }
  0x1e   :  { %557 = vmatmul.mubr.msk.f32.gmra.mrb[10].mxu1 %vm120_vm3, %v19_v30  ;;  %276 = vmatprep.mubr.f32.mxu0 %v584_v3 }
  0x1f   :  { %425 = vmatprep.mubr.f32.mxu1 %v584_v3  ;;  %112 = vperm.xlu0 %581, %v48_v35  }
  0x20   :  { %117 = vperm.xlu1 %582, %v49_v34  }
  0x21   :  { %542 = vmatmul.mubr.msk.f32.gmra.mrb[12].mxu0 %vm120_vm3, %v20_v33 }
  0x22   :  { %558 = vmatmul.mubr.msk.f32.gmra.mrb[12].mxu1 %vm120_vm3, %v20_v33  ;;  %282 = vmatprep.mubr.f32.mxu0 %v584_v3 }
  0x23   :  { %431 = vmatprep.mubr.f32.mxu1 %v584_v3 }
  0x25   :  { %543 = vmatmul.mubr.msk.f32.gmra.mrb[14].mxu0 %vm120_vm3, %v21_v36 }
  0x26   :  { %559 = vmatmul.mubr.msk.f32.gmra.mrb[14].mxu1 %vm120_vm3, %v21_v36  ;;  %288 = vmatprep.mubr.f32.mxu0 %v584_v3 }
  0x27   :  { %437 = vmatprep.mubr.f32.mxu1 %v584_v3 }
  0x29   :  { %544 = vmatmul.mubr.msk.f32.gmra.mrb[16].mxu0 %vm120_vm3, %v22_v37 }
  0x2a   :  { %560 = vmatmul.mubr.msk.f32.gmra.mrb[16].mxu1 %vm120_vm3, %v22_v37  ;;  %294 = vmatprep.mubr.f32.mxu0 %v584_v3 }
  0x2b   :  { %443 = vmatprep.mubr.f32.mxu1 %v584_v3 }
  0x2d   :  { %545 = vmatmul.mubr.msk.f32.gmra.mrb[18].mxu0 %vm120_vm3, %v23_v38 }
  0x2e   :  { %561 = vmatmul.mubr.msk.f32.gmra.mrb[18].mxu1 %vm120_vm3, %v23_v38  ;;  %300 = vmatprep.mubr.f32.mxu0 %v584_v3 }
  0x2f   :  { %449 = vmatprep.mubr.f32.mxu1 %v584_v3 }
  0x31   :  { %546 = vmatmul.mubr.msk.f32.gmra.mrb[20].mxu0 %vm120_vm3, %v24_v39 }
  0x32   :  { %562 = vmatmul.mubr.msk.f32.gmra.mrb[20].mxu1 %vm120_vm3, %v24_v39  ;;  %306 = vmatprep.mubr.f32.mxu0 %v584_v3 }
  0x33   :  { %455 = vmatprep.mubr.f32.mxu1 %v584_v3 }
  0x35   :  { %547 = vmatmul.mubr.msk.f32.gmra.mrb[22].mxu0 %vm120_vm3, %v25_v40 }
  0x36   :  { %563 = vmatmul.mubr.msk.f32.gmra.mrb[22].mxu1 %vm120_vm3, %v25_v40  ;;  %312 = vmatprep.mubr.f32.mxu0 %v584_v3 }
  0x37   :  { %461 = vmatprep.mubr.f32.mxu1 %v584_v3 }
  0x39   :  { %548 = vmatmul.mubr.msk.f32.gmra.mrb[24].mxu0 %vm120_vm3, %v26_v41 }
  0x3a   :  { %564 = vmatmul.mubr.msk.f32.gmra.mrb[24].mxu1 %vm120_vm3, %v26_v41  ;;  %318 = vmatprep.mubr.f32.mxu0 %v584_v3 }
  0x3b   :  { %467 = vmatprep.mubr.f32.mxu1 %v584_v3 }
  0x3d   :  { %549 = vmatmul.mubr.msk.f32.gmra.mrb[26].mxu0 %vm120_vm3, %v27_v42 }
  0x3e   :  { %565 = vmatmul.mubr.msk.f32.gmra.mrb[26].mxu1 %vm120_vm3, %v27_v42 }
  0x85   :  { %v53_v43 = vpop.permute.xlu0 %52 }
  0x86   :  { %v63_v53 = vpop.permute.xlu1 %62 }
  0x8a   :  { %v58_v52 = vpop.permute.xlu0 %57 }
  0x8b   :  { %v68_v6 = vpop.permute.xlu1 %67 }
  0x8e   :  { %v73_v15 = vpop.permute.xlu0 %72 }
  0x8f   :  { %v78_v24 = vpop.permute.xlu1 %77 }
  0x92   :  { %v83_v33 = vpop.permute.xlu0 %82 }
  0x93   :  { %v88_v42 = vpop.permute.xlu1 %87 }
  0xdc   :  { %v242_v44 = vpop.f32.mrb[0].mxu0 }
  0xdd   :  { %v391_v45 = vpop.f32.mrb[0].mxu1  ;;  %v243_v46 = vadd.f32 %v242_v44, %v53_v43  ;;  %v244_v48 = vpop.f32.mrb[1].mxu0 }
  0xde   :  { %v392_v47 = vadd.f32 %v391_v45, %v53_v43  ;;  %v393_v49 = vpop.f32.mrb[1].mxu1  ;;  %v245_v50 = vadd.f32 %v244_v48, %v53_v43 }
  0xdf   :  { %v394_v51 = vadd.f32 %v393_v49, %v53_v43  ;;  %474 = vst [vmem:[%s953_s3] sm:$0xff] %v243_v46 }
  0xe0   :  { %476 = vst [vmem:[%s953_s3 + $0x10] sm:$0xff] %v392_v47  ;;  %475 = vst [vmem:[%s953_s3 + $0x8] sm:$0xff] %v245_v50  ;;  %v248_v54 = vpop.f32.mrb[2].mxu0 }
  0xe1   :  { %477 = vst [vmem:[%s953_s3 + $0x18] sm:$0xff] %v394_v51  ;;  %v397_v55 = vpop.f32.mrb[2].mxu1  ;;  %v249_v56 = vadd.f32 %v248_v54, %v58_v52  ;;  %v250_v58 = vpop.f32.mrb[3].mxu0 }
  0xe2   :  { %v398_v57 = vadd.f32 %v397_v55, %v58_v52  ;;  %v399_v59 = vpop.f32.mrb[3].mxu1  ;;  %v251_v60 = vadd.f32 %v250_v58, %v58_v52  ;;  %v93_v51 = vpop.permute.xlu0 %92 }
  0xe3   :  { %v400_v61 = vadd.f32 %v399_v59, %v58_v52  ;;  %478 = vst [vmem:[%s953_s3 + $0x20] sm:$0xff] %v249_v56 }
  0xe4   :  { %480 = vst [vmem:[%s953_s3 + $0x30] sm:$0xff] %v398_v57  ;;  %479 = vst [vmem:[%s953_s3 + $0x28] sm:$0xff] %v251_v60  ;;  %v254_v62 = vpop.f32.mrb[4].mxu0  ;;  %v98_v60 = vpop.permute.xlu1 %97 }
  0xe5   :  { %481 = vst [vmem:[%s953_s3 + $0x38] sm:$0xff] %v400_v61  ;;  %v403_v63 = vpop.f32.mrb[4].mxu1  ;;  %v255_v0 = vadd.f32 %v254_v62, %v63_v53  ;;  %v256_v2 = vpop.f32.mrb[5].mxu0 }
  0xe6   :  { %v404_v1 = vadd.f32 %v403_v63, %v63_v53  ;;  %v405_v3 = vpop.f32.mrb[5].mxu1  ;;  %v257_v4 = vadd.f32 %v256_v2, %v63_v53 }
  0xe7   :  { %v406_v5 = vadd.f32 %v405_v3, %v63_v53  ;;  %482 = vst [vmem:[%s953_s3 + $0x40] sm:$0xff] %v255_v0 }
  0xe8   :  { %484 = vst [vmem:[%s953_s3 + $0x50] sm:$0xff] %v404_v1  ;;  %483 = vst [vmem:[%s953_s3 + $0x48] sm:$0xff] %v257_v4  ;;  %v260_v7 = vpop.f32.mrb[6].mxu0 }
  0xe9   :  { %485 = vst [vmem:[%s953_s3 + $0x58] sm:$0xff] %v406_v5  ;;  %v409_v8 = vpop.f32.mrb[6].mxu1  ;;  %v261_v9 = vadd.f32 %v260_v7, %v68_v6  ;;  %v262_v11 = vpop.f32.mrb[7].mxu0 }
  0xea   :  { %v410_v10 = vadd.f32 %v409_v8, %v68_v6  ;;  %v411_v12 = vpop.f32.mrb[7].mxu1  ;;  %v263_v13 = vadd.f32 %v262_v11, %v68_v6  ;;  %v103_v5 = vpop.permute.xlu0 %102 }
  0xeb   :  { %v412_v14 = vadd.f32 %v411_v12, %v68_v6  ;;  %486 = vst [vmem:[%s953_s3 + $0x60] sm:$0xff] %v261_v9 }
  0xec   :  { %488 = vst [vmem:[%s953_s3 + $0x70] sm:$0xff] %v410_v10  ;;  %487 = vst [vmem:[%s953_s3 + $0x68] sm:$0xff] %v263_v13  ;;  %v266_v16 = vpop.f32.mrb[8].mxu0 }
  0xed   :  { %489 = vst [vmem:[%s953_s3 + $0x78] sm:$0xff] %v412_v14  ;;  %v415_v17 = vpop.f32.mrb[8].mxu1  ;;  %v267_v18 = vadd.f32 %v266_v16, %v73_v15  ;;  %v268_v20 = vpop.f32.mrb[9].mxu0 }
  0xee   :  { %v416_v19 = vadd.f32 %v415_v17, %v73_v15  ;;  %v417_v21 = vpop.f32.mrb[9].mxu1  ;;  %v269_v22 = vadd.f32 %v268_v20, %v73_v15  ;;  %v108_v14 = vpop.permute.xlu1 %107 }
  0xef   :  { %v418_v23 = vadd.f32 %v417_v21, %v73_v15  ;;  %490 = vst [vmem:[%s953_s3 + $0x80] sm:$0xff] %v267_v18 }
  0xf0   :  { %492 = vst [vmem:[%s953_s3 + $0x90] sm:$0xff] %v416_v19  ;;  %491 = vst [vmem:[%s953_s3 + $0x88] sm:$0xff] %v269_v22  ;;  %v272_v25 = vpop.f32.mrb[10].mxu0 }
  0xf1   :  { %493 = vst [vmem:[%s953_s3 + $0x98] sm:$0xff] %v418_v23  ;;  %v421_v26 = vpop.f32.mrb[10].mxu1  ;;  %v273_v27 = vadd.f32 %v272_v25, %v78_v24  ;;  %v274_v29 = vpop.f32.mrb[11].mxu0 }
  0xf2   :  { %v422_v28 = vadd.f32 %v421_v26, %v78_v24  ;;  %v423_v30 = vpop.f32.mrb[11].mxu1  ;;  %v275_v31 = vadd.f32 %v274_v29, %v78_v24  ;;  %v113_v23 = vpop.permute.xlu0 %112 }
  0xf3   :  { %v424_v32 = vadd.f32 %v423_v30, %v78_v24  ;;  %494 = vst [vmem:[%s953_s3 + $0xa0] sm:$0xff] %v273_v27 }
  0xf4   :  { %496 = vst [vmem:[%s953_s3 + $0xb0] sm:$0xff] %v422_v28  ;;  %495 = vst [vmem:[%s953_s3 + $0xa8] sm:$0xff] %v275_v31  ;;  %v278_v34 = vpop.f32.mrb[12].mxu0 }
  0xf5   :  { %497 = vst [vmem:[%s953_s3 + $0xb8] sm:$0xff] %v424_v32  ;;  %v427_v35 = vpop.f32.mrb[12].mxu1  ;;  %v279_v36 = vadd.f32 %v278_v34, %v83_v33  ;;  %v280_v38 = vpop.f32.mrb[13].mxu0 }
  0xf6   :  { %v428_v37 = vadd.f32 %v427_v35, %v83_v33  ;;  %v429_v39 = vpop.f32.mrb[13].mxu1  ;;  %v281_v40 = vadd.f32 %v280_v38, %v83_v33  ;;  %v118_v32 = vpop.permute.xlu1 %117 }
  0xf7   :  { %v430_v41 = vadd.f32 %v429_v39, %v83_v33  ;;  %498 = vst [vmem:[%s953_s3 + $0xc0] sm:$0xff] %v279_v36 }
  0xf8   :  { %500 = vst [vmem:[%s953_s3 + $0xd0] sm:$0xff] %v428_v37  ;;  %499 = vst [vmem:[%s953_s3 + $0xc8] sm:$0xff] %v281_v40  ;;  %v284_v43 = vpop.f32.mrb[14].mxu0 }
  0xf9   :  { %501 = vst [vmem:[%s953_s3 + $0xd8] sm:$0xff] %v430_v41  ;;  %v433_v44 = vpop.f32.mrb[14].mxu1  ;;  %v285_v45 = vadd.f32 %v284_v43, %v88_v42  ;;  %v286_v47 = vpop.f32.mrb[15].mxu0 }
  0xfa   :  { %v434_v46 = vadd.f32 %v433_v44, %v88_v42  ;;  %v435_v48 = vpop.f32.mrb[15].mxu1  ;;  %v287_v49 = vadd.f32 %v286_v47, %v88_v42 }
  0xfb   :  { %v436_v50 = vadd.f32 %v435_v48, %v88_v42  ;;  %502 = vst [vmem:[%s953_s3 + $0xe0] sm:$0xff] %v285_v45 }
  0xfc   :  { %504 = vst [vmem:[%s953_s3 + $0xf0] sm:$0xff] %v434_v46  ;;  %503 = vst [vmem:[%s953_s3 + $0xe8] sm:$0xff] %v287_v49  ;;  %v290_v52 = vpop.f32.mrb[16].mxu0 }
  0xfd   :  { %505 = vst [vmem:[%s953_s3 + $0xf8] sm:$0xff] %v436_v50  ;;  %v439_v53 = vpop.f32.mrb[16].mxu1  ;;  %v291_v54 = vadd.f32 %v290_v52, %v93_v51  ;;  %v292_v56 = vpop.f32.mrb[17].mxu0 }
  0xfe   :  { %v440_v55 = vadd.f32 %v439_v53, %v93_v51  ;;  %v441_v57 = vpop.f32.mrb[17].mxu1  ;;  %v293_v58 = vadd.f32 %v292_v56, %v93_v51 }
  0xff   :  { %v442_v59 = vadd.f32 %v441_v57, %v93_v51  ;;  %506 = vst [vmem:[%s953_s3 + $0x100] sm:$0xff] %v291_v54 }
 0x100   :  { %508 = vst [vmem:[%s953_s3 + $0x110] sm:$0xff] %v440_v55  ;;  %507 = vst [vmem:[%s953_s3 + $0x108] sm:$0xff] %v293_v58  ;;  %v296_v61 = vpop.f32.mrb[18].mxu0 }
 0x101   :  { %509 = vst [vmem:[%s953_s3 + $0x118] sm:$0xff] %v442_v59  ;;  %v445_v62 = vpop.f32.mrb[18].mxu1  ;;  %v297_v63 = vadd.f32 %v296_v61, %v98_v60  ;;  %v298_v1 = vpop.f32.mrb[19].mxu0 }
 0x102   :  { %v446_v0 = vadd.f32 %v445_v62, %v98_v60  ;;  %v447_v2 = vpop.f32.mrb[19].mxu1  ;;  %v299_v3 = vadd.f32 %v298_v1, %v98_v60 }
 0x103   :  { %v448_v4 = vadd.f32 %v447_v2, %v98_v60  ;;  %510 = vst [vmem:[%s953_s3 + $0x120] sm:$0xff] %v297_v63 }
 0x104   :  { %512 = vst [vmem:[%s953_s3 + $0x130] sm:$0xff] %v446_v0  ;;  %511 = vst [vmem:[%s953_s3 + $0x128] sm:$0xff] %v299_v3  ;;  %v302_v6 = vpop.f32.mrb[20].mxu0 }
 0x105   :  { %513 = vst [vmem:[%s953_s3 + $0x138] sm:$0xff] %v448_v4  ;;  %v451_v7 = vpop.f32.mrb[20].mxu1  ;;  %v303_v8 = vadd.f32 %v302_v6, %v103_v5  ;;  %v304_v10 = vpop.f32.mrb[21].mxu0 }
 0x106   :  { %v452_v9 = vadd.f32 %v451_v7, %v103_v5  ;;  %v453_v11 = vpop.f32.mrb[21].mxu1  ;;  %v305_v12 = vadd.f32 %v304_v10, %v103_v5 }
 0x107   :  { %v454_v13 = vadd.f32 %v453_v11, %v103_v5  ;;  %514 = vst [vmem:[%s953_s3 + $0x140] sm:$0xff] %v303_v8 }
 0x108   :  { %516 = vst [vmem:[%s953_s3 + $0x150] sm:$0xff] %v452_v9  ;;  %515 = vst [vmem:[%s953_s3 + $0x148] sm:$0xff] %v305_v12  ;;  %v308_v15 = vpop.f32.mrb[22].mxu0 }
 0x109   :  { %517 = vst [vmem:[%s953_s3 + $0x158] sm:$0xff] %v454_v13  ;;  %v457_v16 = vpop.f32.mrb[22].mxu1  ;;  %v309_v17 = vadd.f32 %v308_v15, %v108_v14  ;;  %v310_v19 = vpop.f32.mrb[23].mxu0 }
 0x10a   :  { %v458_v18 = vadd.f32 %v457_v16, %v108_v14  ;;  %v459_v20 = vpop.f32.mrb[23].mxu1  ;;  %v311_v21 = vadd.f32 %v310_v19, %v108_v14 }
 0x10b   :  { %v460_v22 = vadd.f32 %v459_v20, %v108_v14  ;;  %518 = vst [vmem:[%s953_s3 + $0x160] sm:$0xff] %v309_v17 }
 0x10c   :  { %520 = vst [vmem:[%s953_s3 + $0x170] sm:$0xff] %v458_v18  ;;  %519 = vst [vmem:[%s953_s3 + $0x168] sm:$0xff] %v311_v21  ;;  %v314_v24 = vpop.f32.mrb[24].mxu0 }
 0x10d   :  { %521 = vst [vmem:[%s953_s3 + $0x178] sm:$0xff] %v460_v22  ;;  %v463_v25 = vpop.f32.mrb[24].mxu1  ;;  %v315_v26 = vadd.f32 %v314_v24, %v113_v23  ;;  %v316_v28 = vpop.f32.mrb[25].mxu0 }
 0x10e   :  { %v464_v27 = vadd.f32 %v463_v25, %v113_v23  ;;  %v465_v29 = vpop.f32.mrb[25].mxu1  ;;  %v317_v30 = vadd.f32 %v316_v28, %v113_v23 }
 0x10f   :  { %v466_v31 = vadd.f32 %v465_v29, %v113_v23  ;;  %522 = vst [vmem:[%s953_s3 + $0x180] sm:$0xff] %v315_v26 }
 0x110   :  { %524 = vst [vmem:[%s953_s3 + $0x190] sm:$0xff] %v464_v27  ;;  %523 = vst [vmem:[%s953_s3 + $0x188] sm:$0xff] %v317_v30  ;;  %v320_v33 = vpop.f32.mrb[26].mxu0 }
 0x111   :  { %525 = vst [vmem:[%s953_s3 + $0x198] sm:$0xff] %v466_v31  ;;  %v469_v34 = vpop.f32.mrb[26].mxu1  ;;  %v321_v35 = vadd.f32 %v320_v33, %v118_v32  ;;  %v322_v37 = vpop.f32.mrb[27].mxu0 }
 0x112   :  { %v470_v36 = vadd.f32 %v469_v34, %v118_v32  ;;  %v471_v38 = vpop.f32.mrb[27].mxu1  ;;  %v323_v39 = vadd.f32 %v322_v37, %v118_v32 }
 0x113   :  { %v472_v40 = vadd.f32 %v471_v38, %v118_v32  ;;  %526 = vst [vmem:[%s953_s3 + $0x1a0] sm:$0xf] %v321_v35 }
 0x114   :  { %528 = vst [vmem:[%s953_s3 + $0x1b0] sm:$0xf] %v470_v36  ;;  %527 = vst [vmem:[%s953_s3 + $0x1a8] sm:$0xf] %v323_v39 }
 0x115   :  { %529 = vst [vmem:[%s953_s3 + $0x1b8] sm:$0xf] %v472_v40 }

// kernel: acmix_forward.3
= control target key start
LH: loop header
LB: loop body
LE: loop exit
PB: predicated region body
PF: predicated region fallthrough
CT: control target
= control target key end

     0   :  { %14 = vsyncpa [#allocation3], 0  ;;  %s3496_s30 = smov 0   ;;  %s6319_s0 = inlined_call_operand.vmem [shape: f32[2,9,256], index: 0, kind: input, shape index: {}]   ;;  %s6320_s1 = inlined_call_operand.vmem [shape: f32[2,9,49,256], index: 1, kind: input, shape index: {}]   ;;  %s6321_s2 = inlined_call_operand.vmem [shape: f32[2,9,49,256], index: 2, kind: input, shape index: {}]   ;;  %s6322_s3 = inlined_call_operand.vmem [shape: f32[3,256], index: 3, kind: input, shape index: {}]   ;;  %s6323_s4 = inlined_call_operand.vmem [shape: f32[3,49,256], index: 4, kind: input, shape index: {}]   ;;  %s6324_s5 = inlined_call_operand.vmem [shape: f32[2,9,9,256], index: 5, kind: input, shape index: {}]   ;;  %s6325_s6 = inlined_call_operand.vmem [shape: f32[2,9,256], index: 6, kind: input, shape index: {}]   ;;  %s6326_s7 = inlined_call_operand.vmem [shape: f32[256,256], index: 7, kind: input, shape index: {}]   ;;  %s6327_s8 = inlined_call_operand.vmem [shape: f32[2], index: 8, kind: input, shape index: {}]   ;;  %s6328_s9 = inlined_call_operand.vmem [shape: f32[2,9,256], index: 9, kind: output, shape index: {}]  }
   0x1 LB: > { %s3502_s10 = sadd.s32 4294967295, %s3443_s30   ;;  %p2808_p0 = scmp.ge.s32.totalorder %s3443_s30, 1  ;;  %s3443_s30 = sphi %s3496_s30, %s20_s30  }
   0x2   : > { %p265_p1 = scmp.lt.s32.totalorder %s3443_s30, 3  ;;  %s287_s13 = sshll.u32 %s6327_s8, 4  ;;  %s288_s13 = int_to_ptr.vmem [resolvable:$true] %s287_s13 }
   0x3   : > { %p3196_p3 = scmp.eq.s32.totalorder %s3502_s10, 0  ;;  %s3418_s15 = scalar_lea.vmem %s288_s13, 16 }
   0x4   : > { %p3509_p2 = pnand %p2808_p0, %p265_p1  ;;  %p3419_p6 = scmp.ne.s32.totalorder %s288_s13, %s3418_s15 }
   0x5   : > { %p3426_p10 = scmp.lt.s32.totalorder %s288_s13, %s288_s13  ;;  %p3427_p11 = scmp.lt.s32.totalorder %s3418_s15, %s3418_s15 }
   0x6   : > { %p3192_p4 = pneg %p3509_p2 }
   0x7   : > { %p3428_p12 = por %p3427_p11, %p3426_p10 }
   0x8   : > { %p3193_p5 = pnand %p3196_p3, %p3192_p4 }
   0xa   : > { %p3420_p7 = pneg %p3193_p5 }
   0xc   : > { %p3421_p8 = pnand %p3420_p7, %p3419_p6 }
   0xe   : > { %p3422_p9 = pneg %p3421_p8 }
  0x10   : > { %p3429_p13 = pnand %p3428_p12, %p3422_p9 }
  0x12   : > { %3432 = shalt.err (!%p3429_p13)
}
  0x13   : > { %s3445_s16 = smov [#allocation2]   ;;  %340 = sbr.rel (%p3509_p2) target bundleno = 478 (0x1de), region = 56 }
  0x14   : > { %3195 = dma.vmem_to_smem (!%p3193_p5), %s288_s13, 16, %s3445_s16, [#allocation3]  }
  0x1a   : > { %3438 = dma.done.wait (%p3196_p3), [#allocation3], 16  }
  0x1b   : > { %3440 = vsyncadd (%p3196_p3), [#allocation3], 4294967280 }
  0x1c   : > { %346 = sfence }
  0x1d   : > { %v2107_v0 = vld [vmem:[%s6326_s7 + $0x8] sm:$0xff]  ;;  %v2109_v1 = vld [vmem:[%s6326_s7 + $0x18] sm:$0xff]  ;;  %v2106_v2 = vld [vmem:[%s6326_s7] sm:$0xff]  ;;  %p397_p0 = scmp.lt.s32.totalorder %s3502_s10, 1  ;;  %v444_v35 = vlaneseq  ;;  %vm763_vm0 = vcmask 1040384   ;;  %vm2066_vm1 = vcmask 1041408  }
  0x1e   : > { %v3122_v3 = vpack.c.bf16 %v2109_v1, %v2107_v0  ;;  %v2108_v4 = vld [vmem:[%s6326_s7 + $0x10] sm:$0xff]  ;;  %v2111_v5 = vld [vmem:[%s6326_s7 + $0x28] sm:$0xff]  ;;  %v2113_v6 = vld [vmem:[%s6326_s7 + $0x38] sm:$0xff]  ;;  %vm2069_vm2 = vcmask 1042432   ;;  %vm2072_vm3 = vcmask 1043456   ;;  %vm2075_vm4 = vcmask 1044480  }
  0x1f   : > { %v3124_v7 = vpack.c.bf16 %v2108_v4, %v2106_v2  ;;  %v3126_v8 = vpack.c.bf16 %v2113_v6, %v2111_v5  ;;  %v2110_v9 = vld [vmem:[%s6326_s7 + $0x20] sm:$0xff]  ;;  %v2112_v10 = vld [vmem:[%s6326_s7 + $0x30] sm:$0xff]  ;;  %v2115_v11 = vld [vmem:[%s6326_s7 + $0x48] sm:$0xff]  ;;  %s6661_s10 = smov (!%p397_p0, %s3502_s10), 1  ;;  %v445_v42 = vshrl.u32 %v444_v35, 7  ;;  %vm2078_vm5 = vcmask 1045504  }
  0x20   : > { %3123 = vmatprep.subr.bf16.mxu0 %v3122_v3  ;;  %v2117_v12 = vld [vmem:[%s6326_s7 + $0x58] sm:$0xff]  ;;  %v3128_v13 = vpack.c.bf16 %v2112_v10, %v2110_v9  ;;  %v2114_v15 = vld [vmem:[%s6326_s7 + $0x40] sm:$0xff]  ;;  %v2116_v16 = vld [vmem:[%s6326_s7 + $0x50] sm:$0xff]  ;;  %s3186_s20 = smul.u32 1008, %s6661_s10  ;;  %s3784_s14 = sshll.u32 %s6661_s10, 5  ;;  %vm2081_vm6 = vcmask 1046528  }
  0x21   : > { %3125 = vmatpush1.bf16.msra.mxu0 %v3124_v7  ;;  %v3130_v14 = vpack.c.bf16 %v2117_v12, %v2115_v11  ;;  %v2119_v17 = vld [vmem:[%s6326_s7 + $0x68] sm:$0xff]  ;;  %v2121_v18 = vld [vmem:[%s6326_s7 + $0x78] sm:$0xff]  ;;  %v3132_v19 = vpack.c.bf16 %v2116_v16, %v2114_v15  ;;  %v2118_v21 = vld [vmem:[%s6326_s7 + $0x60] sm:$0xff]  ;;  %v3689_v61 = vsub.s32 0, %v445_v42  ;;  %v3691_v62 = vsub.s32 1, %v445_v42  ;;  %s3812_s26 = scalar_lea.vmem %s6319_s0, %s3784_s14  ;;  %s4968_s22 = scalar_lea.vmem %s6325_s6, %s3784_s14 }
  0x22   : > { %3127 = vmatprep.subr.bf16.mxu0 %v3126_v8  ;;  %v3134_v20 = vpack.c.bf16 %v2121_v18, %v2119_v17  ;;  %v2120_v22 = vld [vmem:[%s6326_s7 + $0x70] sm:$0xff]  ;;  %v2123_v23 = vld [vmem:[%s6326_s7 + $0x88] sm:$0xff]  ;;  %v2125_v24 = vld [vmem:[%s6326_s7 + $0x98] sm:$0xff]  ;;  %s3738_s12 = scalar_lea.vmem %s6320_s1, %s3186_s20  ;;  %s5127_s18 = scalar_lea.vmem %s6321_s2, %s3186_s20 }
  0x23   : > { %v3136_v25 = vpack.c.bf16 %v2120_v22, %v2118_v21  ;;  %v3138_v26 = vpack.c.bf16 %v2125_v24, %v2123_v23  ;;  %v2122_v27 = vld [vmem:[%s6326_s7 + $0x80] sm:$0xff]  ;;  %v2124_v28 = vld [vmem:[%s6326_s7 + $0x90] sm:$0xff]  ;;  %v2127_v29 = vld [vmem:[%s6326_s7 + $0xa8] sm:$0xff]  ;;  %6430 = vst [vmem:[#allocation5_spill] sm:$0xff] %v3689_v61  ;;  %s3187_s20 = smul.u32 288, %s6661_s10  ;;  %s6157_s23 = sld [smem:[#allocation2]] }
  0x24   : > { %v2129_v30 = vld [vmem:[%s6326_s7 + $0xb8] sm:$0xff]  ;;  %v3140_v31 = vpack.c.bf16 %v2124_v28, %v2122_v27  ;;  %v2126_v33 = vld [vmem:[%s6326_s7 + $0xa0] sm:$0xff]  ;;  %v2128_v34 = vld [vmem:[%s6326_s7 + $0xb0] sm:$0xff]  ;;  %s6180_s24 = sld [smem:[#allocation2 + $0x1]]  ;;  %s6228_s27 = scalar_lea.vmem %s6328_s9, %s3784_s14 }
  0x25   : > { %3129 = vmatpush1.bf16.msra.mxu0 %v3128_v13  ;;  %v3142_v32 = vpack.c.bf16 %v2129_v30, %v2127_v29  ;;  %v2131_v36 = vld [vmem:[%s6326_s7 + $0xc8] sm:$0xff]  ;;  %v2133_v37 = vld [vmem:[%s6326_s7 + $0xd8] sm:$0xff]  ;;  %v3144_v38 = vpack.c.bf16 %v2128_v34, %v2126_v33  ;;  %v2130_v40 = vld [vmem:[%s6326_s7 + $0xc0] sm:$0xff] }
  0x26   : > { %3131 = vmatprep.subr.bf16.mxu0 %v3130_v14  ;;  %v3146_v39 = vpack.c.bf16 %v2133_v37, %v2131_v36  ;;  %v2132_v41 = vld [vmem:[%s6326_s7 + $0xd0] sm:$0xff]  ;;  %v2135_v43 = vld [vmem:[%s6326_s7 + $0xe8] sm:$0xff]  ;;  %v2137_v44 = vld [vmem:[%s6326_s7 + $0xf8] sm:$0xff] }
  0x27   : > { %v3622_v45 = vld [vmem:[%s6326_s7 + $0xe0] sm:$0xff]  ;;  %v3627_v46 = vld [vmem:[%s6326_s7 + $0xf0] sm:$0xff]  ;;  %v3148_v47 = vpack.c.bf16 %v2132_v41, %v2130_v40  ;;  %v3632_v48 = vld [vmem:[%s6326_s7 + $0x108] sm:$0xff]  ;;  %v3150_v52 = vpack.c.bf16 %v2137_v44, %v2135_v43 }
  0x28   : > { %v3637_v49 = vld [vmem:[%s6326_s7 + $0x118] sm:$0xff]  ;;  %v3642_v50 = vld [vmem:[%s6326_s7 + $0x100] sm:$0xff]  ;;  %v3647_v51 = vld [vmem:[%s6326_s7 + $0x110] sm:$0xff]  ;;  %v3152_v16 = vpack.c.bf16 %v3627_v46, %v3622_v45 }
  0x29   : > { %3133 = vmatpush1.bf16.msra.mxu0 %v3132_v19  ;;  %v3652_v53 = vld [vmem:[%s6326_s7 + $0x128] sm:$0xff]  ;;  %v3657_v54 = vld [vmem:[%s6326_s7 + $0x138] sm:$0xff]  ;;  %v3662_v55 = vld [vmem:[%s6326_s7 + $0x120] sm:$0xff]  ;;  %v3154_v21 = vpack.c.bf16 %v3637_v49, %v3632_v48  ;;  %v3156_v22 = vpack.c.bf16 %v3647_v51, %v3642_v50 }
  0x2a   : > { %3135 = vmatprep.subr.bf16.mxu0 %v3134_v20  ;;  %v3667_v56 = vld [vmem:[%s6326_s7 + $0x130] sm:$0xff]  ;;  %v3672_v57 = vld [vmem:[%s6326_s7 + $0x148] sm:$0xff]  ;;  %v3677_v58 = vld [vmem:[%s6326_s7 + $0x158] sm:$0xff]  ;;  %v3158_v28 = vpack.c.bf16 %v3657_v54, %v3652_v53 }
  0x2b   : > { %v3682_v59 = vld [vmem:[%s6326_s7 + $0x140] sm:$0xff]  ;;  %v3687_v60 = vld [vmem:[%s6326_s7 + $0x150] sm:$0xff]  ;;  %v3696_v63 = vld [vmem:[%s6326_s7 + $0x168] sm:$0xff] }
  0x2c   : > { %v3701_v0 = vld [vmem:[%s6326_s7 + $0x178] sm:$0xff]  ;;  %v3706_v1 = vld [vmem:[%s6326_s7 + $0x160] sm:$0xff]  ;;  %v3711_v2 = vld [vmem:[%s6326_s7 + $0x170] sm:$0xff] }
  0x2d   : > { %3137 = vmatpush1.bf16.msra.mxu0 %v3136_v25  ;;  %v3716_v3 = vld [vmem:[%s6326_s7 + $0x188] sm:$0xff]  ;;  %v3721_v4 = vld [vmem:[%s6326_s7 + $0x198] sm:$0xff]  ;;  %v3726_v5 = vld [vmem:[%s6326_s7 + $0x180] sm:$0xff] }
  0x2e   : > { %3139 = vmatprep.subr.bf16.mxu0 %v3138_v26  ;;  %v3731_v6 = vld [vmem:[%s6326_s7 + $0x190] sm:$0xff]  ;;  %v442_v7 = vld [vmem:[%s6322_s3] ss:$4 sm:$0x3]  ;;  %v3746_v8 = vld [vmem:[%s6326_s7 + $0x1a8] sm:$0xff] }
  0x2f   : > { %v3751_v9 = vld [vmem:[%s6326_s7 + $0x1b8] sm:$0xff]  ;;  %v3756_v10 = vld [vmem:[%s6326_s7 + $0x1a0] sm:$0xff]  ;;  %v3761_v11 = vld [vmem:[%s6326_s7 + $0x1b0] sm:$0xff]  ;;  %v3822_v26 = vrot.slane %v442_v7, %v3689_v61  ;;  %v3825_v27 = vrot.slane %v442_v7, %v3691_v62 }
  0x30   : > { %v3766_v12 = vld [vmem:[%s6326_s7 + $0x1c8] sm:$0xff]  ;;  %v3771_v13 = vld [vmem:[%s6326_s7 + $0x1d8] sm:$0xff]  ;;  %v3776_v14 = vld [vmem:[%s6326_s7 + $0x1c0] sm:$0xff] }
  0x31   : > { %3141 = vmatpush1.bf16.msra.mxu0 %v3140_v31  ;;  %v3781_v15 = vld [vmem:[%s6326_s7 + $0x1d0] sm:$0xff]  ;;  %v3791_v17 = vld [vmem:[%s6326_s7 + $0x1e8] sm:$0xff]  ;;  %v3796_v18 = vld [vmem:[%s6326_s7 + $0x1f8] sm:$0xff]  ;;  %6434 = vst [vmem:[#allocation9_spill] sm:$0xff] %v3822_v26 }
  0x32   : > { %3143 = vmatprep.subr.bf16.mxu0 %v3142_v32  ;;  %6431 = vst [vmem:[#allocation6_spill] sm:$0xff] %v3791_v17  ;;  %v3801_v19 = vld [vmem:[%s6326_s7 + $0x1e0] sm:$0xff]  ;;  %v3806_v20 = vld [vmem:[%s6326_s7 + $0x1f0] sm:$0xff]  ;;  %v429_v24 = vld [vmem:[%s3738_s12 + $0x8] sm:$0xff] }
  0x33   : > { %6432 = vst [vmem:[#allocation7_spill] sm:$0xff] %v3801_v19  ;;  %6433 = vst [vmem:[#allocation8_spill] sm:$0xff] %v3806_v20  ;;  %v428_v23 = vld [vmem:[%s3738_s12] sm:$0xff]  ;;  %v430_v25 = vld [vmem:[%s3738_s12 + $0x10] sm:$0xff]  ;;  %v455_v7 = vadd.f32 %v3825_v27, %v429_v24  ;;  %v6448_v20 = vpack.c.bf16 %v3667_v56, %v3662_v55  ;;  %v6451_v55 = vpack.c.bf16 %v3677_v58, %v3672_v57 }
  0x34   : > { %6435 = vst [vmem:[#allocation10_spill] sm:$0xff] %v3825_v27  ;;  %v431_v32 = vld [vmem:[%s3738_s12 + $0x18] sm:$0xff]  ;;  %v432_v33 = vld [vmem:[%s3738_s12 + $0x20] sm:$0xff]  ;;  %v433_v34 = vld [vmem:[%s3738_s12 + $0x28] sm:$0xff]  ;;  %v454_v54 = vadd.f32 %v3822_v26, %v428_v23  ;;  %v456_v46 = vadd.f32 %v3822_v26, %v430_v25 }
  0x35   : > { %3145 = vmatpush1.bf16.msra.mxu0 %v3144_v38  ;;  %v434_v40 = vld [vmem:[%s3738_s12 + $0x30] sm:$0xff]  ;;  %v435_v41 = vld [vmem:[%s3738_s12 + $0x38] sm:$0xff]  ;;  %v436_v42 = vld [vmem:[%s3738_s12 + $0x40] sm:$0xff]  ;;  %v458_v50 = vadd.f32 %v3822_v26, %v432_v33  ;;  %v459_v45 = vadd.f32 %v3825_v27, %v433_v34 }
  0x36   : > { %3147 = vmatprep.subr.bf16.mxu0 %v3146_v39  ;;  %v427_v39 = vld [vmem:[%s3812_s26] ss:$8 sm:$0x3]  ;;  %v438_v48 = vld [vmem:[%s3738_s12 + $0x50] sm:$0xff]  ;;  %v439_v49 = vld [vmem:[%s3738_s12 + $0x58] sm:$0xff]  ;;  %v460_v25 = vadd.f32 %v3822_v26, %v434_v40  ;;  %v462_v33 = vadd.f32 %v3822_v26, %v436_v42 }
  0x37   : > { %v441_v53 = vld [vmem:[%s3738_s12 + $0x68] sm:$0x1]  ;;  %v3886_v23 = vld [vmem:[%s6323_s4 + $0x10] sm:$0xff]  ;;  %v3891_v24 = vld [vmem:[%s6323_s4 + $0x18] sm:$0xff]  ;;  %v465_v42 = vadd.f32 %v3825_v27, %v439_v49 }
  0x38   : > { %v3881_v51 = vld [vmem:[%s6323_s4 + $0x8] sm:$0xff]  ;;  %6438 = vst [vmem:[#allocation13_spill] sm:$0xff] %v3886_v23  ;;  %6439 = vst [vmem:[#allocation14_spill] sm:$0xff] %v3891_v24  ;;  %v3900_v44 = vld [vmem:[%s6323_s4 + $0x20] sm:$0xff]  ;;  %v3939_v36 = vadd.f32 %v3825_v27, %v441_v53 }
  0x39   : > { %3149 = vmatpush1.bf16.msra.mxu0 %v3148_v47  ;;  %v437_v47 = vld [vmem:[%s3738_s12 + $0x48] sm:$0xff]  ;;  %6437 = vst [vmem:[#allocation12_spill] sm:$0xff] %v3881_v51  ;;  %6440 = vst [vmem:[#allocation15_spill] sm:$0xff] %v3900_v44  ;;  %v3910_v40 = vld [vmem:[%s6323_s4 + $0x30] sm:$0xff]  ;;  %v486_v29 = vsub.f32 %v458_v50, %v3900_v44 }
  0x3a   : > { %3151 = vmatprep.subr.bf16.mxu0 %v3150_v52  ;;  %v440_v52 = vld [vmem:[%s3738_s12 + $0x60] sm:$0x1]  ;;  %v463_v34 = vadd.f32 %v3825_v27, %v437_v47  ;;  %v3905_v43 = vld [vmem:[%s6323_s4 + $0x28] sm:$0xff]  ;;  %6442 = vst [vmem:[#allocation17_spill] sm:$0xff] %v3910_v40  ;;  %v3917_v47 = vld [vmem:[%s6323_s4 + $0x38] sm:$0xff] }
  0x3b   : > { %6441 = vst [vmem:[#allocation16_spill] sm:$0xff] %v3905_v43  ;;  %6443 = vst [vmem:[#allocation18_spill] sm:$0xff] %v3917_v47  ;;  %v3922_v38 = vld [vmem:[%s6323_s4 + $0x40] sm:$0xff]  ;;  %v3927_v37 = vld [vmem:[%s6323_s4 + $0x48] sm:$0xff]  ;;  %v3936_v49 = vadd.f32 %v3822_v26, %v440_v52 }
  0x3c   : > { %6444 = vst [vmem:[#allocation19_spill] sm:$0xff] %v3922_v38  ;;  %6445 = vst [vmem:[#allocation20_spill] sm:$0xff] %v3927_v37  ;;  %v3944_v35 = vld [vmem:[%s6323_s4 + $0x50] sm:$0xff]  ;;  %v3949_v31 = vld [vmem:[%s6323_s4 + $0x58] sm:$0xff]  ;;  %v491_v19 = vsub.f32 %v463_v34, %v3927_v37 }
  0x3d   : > { %3153 = vmatpush1.bf16.msra.mxu0 %v3152_v16  ;;  %v3872_v16 = vld [vmem:[%s6323_s4] sm:$0xff]  ;;  %6446 = vst [vmem:[#allocation21_spill] sm:$0xff] %v3944_v35  ;;  %6447 = vst [vmem:[#allocation22_spill] sm:$0xff] %v3949_v31  ;;  %v3964_v30 = vld [vmem:[%s6323_s4 + $0x68] sm:$0x1]  ;;  %v493_v50 = vsub.f32 %v465_v42, %v3949_v31 }
  0x3e   : > { %3155 = vmatprep.subr.bf16.mxu0 %v3154_v21  ;;  %6436 = vst [vmem:[#allocation11_spill] sm:$0xff] %v3872_v16  ;;  %v457_v21 = vadd.f32 %v3825_v27, %v431_v32  ;;  %v461_v32 = vadd.f32 %v3825_v27, %v435_v41  ;;  %v464_v41 = vadd.f32 %v3822_v26, %v438_v48  ;;  %v2837_v52 = vld [vmem:[%s6322_s3 + $0x1] ss:$4 sm:$0x3]  ;;  %v3959_v53 = vld [vmem:[%s6323_s4 + $0x60] sm:$0x1] }
  0x3f   : > { %v3933_v48 = vrot.slane %v427_v39, %v3691_v62  ;;  %v490_v26 = vsub.f32 %v462_v33, %v3922_v38  ;;  %v3986_v33 = vrot.slane %v2837_v52, %v3691_v62  ;;  %v2826_v42 = vld [vmem:[%s3738_s12 + $0x88] sm:$0xff]  ;;  %v2828_v57 = vld [vmem:[%s3738_s12 + $0x98] sm:$0xff]  ;;  %v2829_v56 = vld [vmem:[%s3738_s12 + $0xa0] sm:$0xff] }
  0x40   : > { %v489_v27 = vsub.f32 %v461_v32, %v3917_v47  ;;  %v3983_v32 = vrot.slane %v2837_v52, %v3689_v61  ;;  %v2827_v52 = vld [vmem:[%s3738_s12 + $0x90] sm:$0xff]  ;;  %v2830_v31 = vld [vmem:[%s3738_s12 + $0xa8] sm:$0xff]  ;;  %v2832_v38 = vld [vmem:[%s3738_s12 + $0xb8] sm:$0xff] }
  0x41   : > { %3157 = vmatpush1.bf16.msra.mxu0 %v3156_v22  ;;  %v3930_v22 = vrot.slane %v427_v39, %v3689_v61  ;;  %v482_v39 = vsub.f32 %v454_v54, %v3872_v16  ;;  %v484_v54 = vsub.f32 %v456_v46, %v3886_v23  ;;  %v488_v16 = vsub.f32 %v460_v25, %v3910_v40  ;;  %v2825_v25 = vld [vmem:[%s3738_s12 + $0x80] sm:$0xff]  ;;  %v2834_v47 = vld [vmem:[%s3738_s12 + $0xc8] sm:$0xff]  ;;  %v2836_v44 = vld [vmem:[%s3738_s12 + $0xd8] sm:$0x1] }
  0x42   : > { %3159 = vmatprep.subr.bf16.mxu0 %v3158_v28  ;;  %v483_v28 = vsub.f32 %v455_v7, %v3881_v51  ;;  %v485_v7 = vsub.f32 %v457_v21, %v3891_v24  ;;  %v487_v51 = vsub.f32 %v459_v45, %v3905_v43  ;;  %v492_v46 = vsub.f32 %v464_v41, %v3944_v35  ;;  %v2823_v45 = vld [vmem:[%s3738_s12 + $0x70] sm:$0xff]  ;;  %v2824_v21 = vld [vmem:[%s3738_s12 + $0x78] sm:$0xff] }
  0x43   : > { %6449 = vst [vmem:[#allocation23_spill] sm:$0xff] %v3983_v32  ;;  %6450 = vst [vmem:[#allocation24_spill] sm:$0xff] %v3986_v33  ;;  %v3996_v34 = vmul.f32 %v3930_v22, %v482_v39  ;;  %v4005_v58 = vmul.f32 %v3930_v22, %v484_v54  ;;  %v2831_v35 = vld [vmem:[%s3738_s12 + $0xb0] sm:$0xff]  ;;  %v4021_v37 = vmul.f32 %v3930_v22, %v488_v16 }
  0x44   : > { %v3999_v41 = vmul.f32 %v3933_v48, %v483_v28  ;;  %v4014_v39 = vmul.f32 %v3933_v48, %v487_v51  ;;  %v2822_v28 = vld [vmem:[%s3812_s26 + $0x1] ss:$8 sm:$0x3]  ;;  %v4024_v54 = vmul.f32 %v3933_v48, %v489_v27  ;;  %v6456_v40 = vpack.c.bf16 %v3687_v60, %v3682_v59  ;;  %v2835_v27 = vld [vmem:[%s3738_s12 + $0xd0] sm:$0x1] }
  0x45   : > { %3161 = vmatpush1.bf16.msra.mxu0 %v6448_v20  ;;  %v4011_v20 = vmul.f32 %v3930_v22, %v486_v29  ;;  %6452 = vst [vmem:[#allocation25_spill] sm:$0xff] %v4021_v37  ;;  %v4030_v29 = vmul.f32 %v3933_v48, %v491_v19  ;;  %v2833_v51 = vld [vmem:[%s3738_s12 + $0xc0] sm:$0xff]  ;;  %v4039_v43 = vmul.f32 %v3930_v22, %v492_v46  ;;  %v4051_v24 = vld [vmem:[%s6323_s4 + $0x70] sm:$0xff]  ;;  %v4126_v37 = vld [vmem:[%s6323_s4 + $0xc8] sm:$0xff] }
  0x46   : > { %3163 = vmatprep.subr.bf16.mxu0 %v6451_v55  ;;  %v4008_v55 = vmul.f32 %v3933_v48, %v485_v7  ;;  %6453 = vst [vmem:[#allocation26_spill] sm:$0xff] %v4024_v54  ;;  %v4027_v7 = vmul.f32 %v3930_v22, %v490_v26  ;;  %v4042_v16 = vmul.f32 %v3933_v48, %v493_v50  ;;  %6459 = vst [vmem:[#allocation31_spill] sm:$0xff] %v4051_v24  ;;  %v4104_v23 = vld [vmem:[%s6323_s4 + $0xb0] sm:$0xff]  ;;  %v4121_v54 = vld [vmem:[%s6323_s4 + $0xc0] sm:$0xff] }
  0x47   : > { %6455 = vst [vmem:[#allocation28_spill] sm:$0xff] %v4030_v29  ;;  %6457 = vst [vmem:[#allocation29_spill] sm:$0xff] %v4039_v43  ;;  %v565_v26 = vadd.f32 %v2823_v45, %v3983_v32  ;;  %v566_v19 = vadd.f32 %v2824_v21, %v3986_v33  ;;  %v6460_v59 = vpack.c.bf16 %v3701_v0, %v3696_v63  ;;  %v4063_v45 = vld [vmem:[%s6323_s4 + $0x78] sm:$0xff]  ;;  %v4068_v21 = vld [vmem:[%s6323_s4 + $0x80] sm:$0xff] }
  0x48   : > { %6454 = vst [vmem:[#allocation27_spill] sm:$0xff] %v4027_v7  ;;  %6458 = vst [vmem:[#allocation30_spill] sm:$0xff] %v4042_v16  ;;  %v567_v60 = vadd.f32 %v2825_v25, %v3983_v32  ;;  %v569_v46 = vadd.f32 %v2827_v52, %v3983_v32  ;;  %v570_v50 = vadd.f32 %v2828_v57, %v3986_v33  ;;  %v4073_v63 = vld [vmem:[%s6323_s4 + $0x88] sm:$0xff]  ;;  %v4082_v57 = vld [vmem:[%s6323_s4 + $0x90] sm:$0xff] }
  0x49   : > { %3165 = vmatpush1.bf16.msra.mxu0 %v6456_v40  ;;  %v568_v40 = vadd.f32 %v2826_v42, %v3986_v33  ;;  %6461 = vst [vmem:[#allocation32_spill] sm:$0xff] %v4063_v45  ;;  %v571_v0 = vadd.f32 %v2829_v56, %v3983_v32  ;;  %v572_v25 = vadd.f32 %v2830_v31, %v3986_v33  ;;  %v4092_v56 = vld [vmem:[%s6323_s4 + $0xa0] sm:$0xff]  ;;  %6465 = vst [vmem:[#allocation36_spill] sm:$0xff] %v4104_v23  ;;  %v4109_v16 = vld [vmem:[%s6323_s4 + $0xb8] sm:$0xff] }
  0x4a   : > { %3167 = vmatprep.subr.bf16.mxu0 %v6460_v59  ;;  %v573_v42 = vadd.f32 %v2831_v35, %v3983_v32  ;;  %v574_v52 = vadd.f32 %v2832_v38, %v3986_v33  ;;  %v4087_v59 = vld [vmem:[%s6323_s4 + $0x98] sm:$0xff]  ;;  %6463 = vst [vmem:[#allocation34_spill] sm:$0xff] %v4092_v56  ;;  %v575_v31 = vadd.f32 %v2833_v51, %v3983_v32  ;;  %v4099_v38 = vld [vmem:[%s6323_s4 + $0xa8] sm:$0xff]  ;;  %6466 = vst [vmem:[#allocation37_spill] sm:$0xff] %v4109_v16 }
  0x4b   : > { %6462 = vst [vmem:[#allocation33_spill] sm:$0xff] %v4087_v59  ;;  %v576_v35 = vadd.f32 %v2834_v47, %v3986_v33  ;;  %6464 = vst [vmem:[#allocation35_spill] sm:$0xff] %v4099_v38  ;;  %v612_v43 = vrot.slane %v2822_v28, %v3689_v61  ;;  %v616_v51 = vrot.slane %v2822_v28, %v3691_v62 }
  0x4c   : > { %v6467_v47 = vpack.c.bf16 %v3711_v2, %v3706_v1  ;;  %v577_v29 = vadd.f32 %v2835_v27, %v3983_v32  ;;  %v578_v7 = vadd.f32 %v2836_v44, %v3986_v33  ;;  %6468 = vst [vmem:[#allocation38_spill] sm:$0xff] %v4121_v54  ;;  %6469 = vst [vmem:[#allocation39_spill] sm:$0xff] %v4126_v37  ;;  %v4136_v2 = vld [vmem:[%s6323_s4 + $0xd0] sm:$0x1]  ;;  %v4141_v44 = vld [vmem:[%s6323_s4 + $0xd8] sm:$0x1] }
  0x4d   : > { %v594_v28 = vsub.f32 %v565_v26, %v4051_v24  ;;  %v595_v17 = vsub.f32 %v566_v19, %v4063_v45  ;;  %v6470_v1 = vpack.c.bf16 %v3721_v4, %v3716_v3  ;;  %6471 = vst [vmem:[#allocation40_spill] sm:$0xff] %v4136_v2  ;;  %6472 = vst [vmem:[#allocation41_spill] sm:$0xff] %v4141_v44 }
  0x4e   : > { %3169 = vmatpush1.bf16.msra.mxu0 %v6467_v47  ;;  %v596_v27 = vsub.f32 %v567_v60, %v4068_v21  ;;  %v597_v26 = vsub.f32 %v568_v40, %v4073_v63  ;;  %v598_v19 = vsub.f32 %v569_v46, %v4082_v57  ;;  %v599_v47 = vsub.f32 %v570_v50, %v4087_v59 }
  0x4f   : > { %3171 = vmatprep.subr.bf16.mxu0 %v6470_v1  ;;  %v600_v3 = vsub.f32 %v571_v0, %v4092_v56  ;;  %v601_v4 = vsub.f32 %v572_v25, %v4099_v38  ;;  %v602_v1 = vsub.f32 %v573_v42, %v4104_v23  ;;  %v603_v45 = vsub.f32 %v574_v52, %v4109_v16 }
  0x50   : > { %v6473_v24 = vsub.f32 %v3936_v49, %v3959_v53  ;;  %v6474_v60 = vsub.f32 %v3939_v36, %v3964_v30  ;;  %v604_v46 = vsub.f32 %v575_v31, %v4121_v54  ;;  %v605_v50 = vsub.f32 %v576_v35, %v4126_v37  ;;  %v2852_v35 = vld [vmem:[%s3812_s26 + $0x2] ss:$8 sm:$0x3] }
  0x51   : > { %v6475_v0 = vpack.c.bf16 %v3731_v6, %v3726_v5  ;;  %v606_v49 = vsub.f32 %v577_v29, %v4136_v2  ;;  %v620_v36 = vmul.f32 %v616_v51, %v595_v17  ;;  %v6476_v25 = vpack.c.bf16 %v3751_v9, %v3746_v8  ;;  %v6490_v54 = vld [vmem:[#allocation26_spill] sm:$0xff] }
  0x52   : > { %v4155_v33 = vmul.f32 %v3930_v22, %v6473_v24  ;;  %v4161_v40 = vmul.f32 %v3933_v48, %v6474_v60  ;;  %v607_v24 = vsub.f32 %v578_v7, %v4141_v44  ;;  %v619_v22 = vmul.f32 %v612_v43, %v594_v28  ;;  %v2867_v48 = vld [vmem:[%s6322_s3 + $0x2] ss:$4 sm:$0x3]  ;;  %v2854_v60 = vld [vmem:[%s3738_s12 + $0xe8] sm:$0xff]  ;;  %v2860_v44 = vld [vmem:[%s3738_s12 + $0x118] sm:$0xff] }
  0x53   : > { %3173 = vmatpush1.bf16.msra.mxu0 %v6475_v0  ;;  %v621_v5 = vmul.f32 %v612_v43, %v596_v27  ;;  %v622_v6 = vmul.f32 %v616_v51, %v597_v26  ;;  %v623_v42 = vmul.f32 %v612_v43, %v598_v19  ;;  %v624_v29 = vmul.f32 %v616_v51, %v599_v47  ;;  %v2853_v28 = vld [vmem:[%s3738_s12 + $0xe0] sm:$0xff]  ;;  %v2855_v27 = vld [vmem:[%s3738_s12 + $0xf0] sm:$0xff]  ;;  %v2858_v19 = vld [vmem:[%s3738_s12 + $0x108] sm:$0xff] }
  0x54   : > { %3175 = vmatprep.subr.bf16.mxu0 %v6476_v25  ;;  %v625_v52 = vmul.f32 %v612_v43, %v600_v3  ;;  %v626_v31 = vmul.f32 %v616_v51, %v601_v4  ;;  %v4176_v7 = vmul.f32 %v612_v43, %v602_v1  ;;  %v4178_v17 = vmul.f32 %v616_v51, %v603_v45  ;;  %v2857_v26 = vld [vmem:[%s3738_s12 + $0x100] sm:$0xff]  ;;  %v2856_v0 = vld [vmem:[%s3738_s12 + $0xf8] sm:$0xff]  ;;  %v2859_v25 = vld [vmem:[%s3738_s12 + $0x110] sm:$0xff] }
  0x55   : > { %v4183_v8 = vmul.f32 %v612_v43, %v604_v46  ;;  %v4185_v9 = vmul.f32 %v616_v51, %v605_v50  ;;  %v4191_v47 = vrot.slane %v2867_v48, %v3689_v61  ;;  %v4194_v45 = vrot.slane %v2867_v48, %v3691_v62 }
  0x56   : > { %v6477_v3 = vpack.c.bf16 %v3761_v11, %v3756_v10  ;;  %v4199_v4 = vmul.f32 %v612_v43, %v606_v49  ;;  %v4201_v1 = vmul.f32 %v616_v51, %v607_v24  ;;  %v4204_v46 = vadd.f32 %v619_v22, %v3996_v34  ;;  %v2861_v43 = vld [vmem:[%s3738_s12 + $0x120] sm:$0xff]  ;;  %v2862_v34 = vld [vmem:[%s3738_s12 + $0x128] sm:$0xff] }
  0x57   : > { %v4207_v50 = vadd.f32 %v620_v36, %v3999_v41  ;;  %v6478_v48 = vpack.c.bf16 %v3771_v13, %v3766_v12  ;;  %v4216_v10 = vadd.f32 %v621_v5, %v4005_v58  ;;  %v4219_v11 = vadd.f32 %v622_v6, %v4008_v55  ;;  %v4228_v12 = vld [vmem:[%s6323_s4 + $0xe0] sm:$0xff]  ;;  %v2863_v55 = vld [vmem:[%s3738_s12 + $0x130] sm:$0xff]  ;;  %v4242_v22 = vld [vmem:[%s6323_s4 + $0xe8] sm:$0xff] }
  0x58   : > { %3177 = vmatpush1.bf16.msra.mxu0 %v6477_v3  ;;  %v677_v41 = vadd.f32 %v2853_v28, %v4191_v47  ;;  %v678_v51 = vadd.f32 %v2854_v60, %v4194_v45  ;;  %v4231_v13 = vadd.f32 %v623_v42, %v4011_v20  ;;  %v4234_v58 = vadd.f32 %v624_v29, %v4014_v39  ;;  %v4247_v36 = vld [vmem:[%s6323_s4 + $0x100] sm:$0xff]  ;;  %v4252_v20 = vld [vmem:[%s6323_s4 + $0x108] sm:$0xff]  ;;  %v2864_v39 = vld [vmem:[%s3738_s12 + $0x138] sm:$0xff] }
  0x59   : > { %3179 = vmatprep.subr.bf16.mxu0 %v6478_v48  ;;  %v681_v49 = vadd.f32 %v2857_v26, %v4191_v47  ;;  %v682_v24 = vadd.f32 %v2858_v19, %v4194_v45  ;;  %6479 = vst [vmem:[#allocation42_spill] sm:$0xff] %v4242_v22  ;;  %6480 = vst [vmem:[#allocation43_spill] sm:$0xff] %v4247_v36  ;;  %v2865_v5 = vld [vmem:[%s3738_s12 + $0x140] sm:$0x1]  ;;  %v2866_v6 = vld [vmem:[%s3738_s12 + $0x148] sm:$0x1]  ;;  %v679_v42 = vadd.f32 %v2855_v27, %v4191_v47 }
  0x5a   : > { %6481 = vst [vmem:[#allocation44_spill] sm:$0xff] %v4252_v20  ;;  %v680_v29 = vadd.f32 %v2856_v0, %v4194_v45  ;;  %v724_v28 = vrot.slane %v2852_v35, %v3689_v61  ;;  %v728_v60 = vrot.slane %v2852_v35, %v3691_v62  ;;  %v6482_v26 = vpack.c.bf16 %v3781_v15, %v3776_v14  ;;  %v4271_v27 = vld [vmem:[%s6323_s4 + $0xf0] sm:$0xff]  ;;  %v4276_v35 = vld [vmem:[%s6323_s4 + $0xf8] sm:$0xff]  ;;  %v6485_v15 = vld [vmem:[#allocation6_spill] sm:$0xff] }
  0x5b   : > { %v683_v19 = vadd.f32 %v2859_v25, %v4191_v47  ;;  %v684_v3 = vadd.f32 %v2860_v44, %v4194_v45  ;;  %v685_v48 = vadd.f32 %v2861_v43, %v4191_v47  ;;  %v686_v2 = vadd.f32 %v2862_v34, %v4194_v45  ;;  %6483 = vst [vmem:[#allocation45_spill] sm:$0xff] %v4271_v27  ;;  %v4281_v14 = vld [vmem:[%s6323_s4 + $0x110] sm:$0xff]  ;;  %v4289_v0 = vld [vmem:[%s6323_s4 + $0x118] sm:$0xff]  ;;  %v4294_v25 = vld [vmem:[%s6323_s4 + $0x120] sm:$0xff] }
  0x5c   : > { %3181 = vmatpush1.bf16.msra.mxu0 %v6482_v26  ;;  %6484 = vst [vmem:[#allocation46_spill] sm:$0xff] %v4276_v35  ;;  %v6486_v44 = vpack.c.bf16 %v3796_v18, %v6485_v15  ;;  %6487 = vst [vmem:[#allocation6_spill] sm:$0xff] %v4294_v25  ;;  %v4299_v43 = vld [vmem:[%s6323_s4 + $0x128] sm:$0xff]  ;;  %v706_v34 = vsub.f32 %v677_v41, %v4228_v12  ;;  %v707_v18 = vsub.f32 %v678_v51, %v4242_v22  ;;  %v4314_v41 = vld [vmem:[%s6323_s4 + $0x140] sm:$0x1] }
  0x5d   : > { %6488 = vst [vmem:[#allocation47_spill] sm:$0xff] %v4299_v43  ;;  %v710_v26 = vsub.f32 %v681_v49, %v4247_v36  ;;  %v711_v15 = vsub.f32 %v682_v24, %v4252_v20  ;;  %v640_v16 = vadd.f32 %v626_v31, %v6490_v54  ;;  %v689_v23 = vadd.f32 %v2865_v5, %v4191_v47  ;;  %v4319_v51 = vld [vmem:[%s6323_s4 + $0x148] sm:$0x1]  ;;  %v6491_v31 = vld [vmem:[#allocation8_spill] sm:$0xff]  ;;  %v6492_v49 = vld [vmem:[#allocation7_spill] sm:$0xff] }
  0x5e   : > { %3183 = vmatprep.subr.bf16.mxu0 %v6486_v44  ;;  %v6489_v44 = vld [vmem:[#allocation25_spill] sm:$0xff]  ;;  %v690_v38 = vadd.f32 %v2866_v6, %v4194_v45  ;;  %v687_v56 = vadd.f32 %v2863_v55, %v4191_v47  ;;  %v688_v59 = vadd.f32 %v2864_v39, %v4194_v45  ;;  %v708_v54 = vsub.f32 %v679_v42, %v4271_v27  ;;  %v4329_v55 = vld [vmem:[%s6323_s4 + $0x130] sm:$0xff]  ;;  %v4334_v39 = vld [vmem:[%s6323_s4 + $0x138] sm:$0xff] }
  0x5f   : > { %v639_v37 = vadd.f32 %v625_v52, %v6489_v44  ;;  %v709_v52 = vsub.f32 %v680_v29, %v4276_v35  ;;  %v6493_v24 = vpack.c.bf16 %v6491_v31, %v6492_v49  ;;  %v712_v5 = vsub.f32 %v683_v19, %v4281_v14  ;;  %v6494_v35 = vld [vmem:[#allocation27_spill] sm:$0xff]  ;;  %v6495_v20 = vld [vmem:[#allocation28_spill] sm:$0xff] }
  0x60   : > { %v713_v6 = vsub.f32 %v684_v3, %v4289_v0  ;;  %v714_v42 = vsub.f32 %v685_v48, %v4294_v25  ;;  %v715_v29 = vsub.f32 %v686_v2, %v4299_v43  ;;  %v731_v44 = vmul.f32 %v724_v28, %v706_v34 }
  0x61   : > { %3185 = vmatpush1.bf16.msra.mxu0 %v6493_v24  ;;  %v732_v31 = vmul.f32 %v728_v60, %v707_v18  ;;  %v735_v49 = vmul.f32 %v724_v28, %v710_v26  ;;  %v736_v24 = vmul.f32 %v728_v60, %v711_v15  ;;  %v641_v27 = vadd.f32 %v4176_v7, %v6494_v35  ;;  %v6499_v35 = vld [vmem:[#allocation29_spill] sm:$0xff] }
  0x62   : > { %v642_v22 = vadd.f32 %v4178_v17, %v6495_v20  ;;  %v718_v36 = vsub.f32 %v689_v23, %v4314_v41  ;;  %v719_v19 = vsub.f32 %v690_v38, %v4319_v51  ;;  %v716_v3 = vsub.f32 %v687_v56, %v4329_v55 }
  0x63   : > { %v717_v48 = vsub.f32 %v688_v59, %v4334_v39  ;;  %v733_v25 = vmul.f32 %v724_v28, %v708_v54  ;;  %v734_v2 = vmul.f32 %v728_v60, %v709_v52  ;;  %v737_v34 = vmul.f32 %v724_v28, %v712_v5  ;;  %v6500_v54 = vld [vmem:[#allocation30_spill] sm:$0xff] }
  0x64   : > { %v738_v18 = vmul.f32 %v728_v60, %v713_v6  ;;  %v739_v26 = vmul.f32 %v724_v28, %v714_v42  ;;  %v740_v15 = vmul.f32 %v728_v60, %v715_v29  ;;  %v4349_v43 = vadd.f32 %v731_v44, %v4204_v46 }
  0x65   : > { %v4352_v7 = vadd.f32 %v732_v31, %v4207_v50  ;;  %v4355_v23 = vadd.f32 %v735_v49, %v4231_v13  ;;  %v4358_v38 = vadd.f32 %v736_v24, %v4234_v58  ;;  %v645_v59 = vadd.f32 %v4199_v4, %v4155_v33 }
  0x66   : > { %6496 = vst [vmem:[#allocation25_spill] sm:$0xff] %v4349_v43  ;;  %v646_v56 = vadd.f32 %v4201_v1, %v4161_v40  ;;  %v743_v17 = vmul.f32 %v724_v28, %v718_v36  ;;  %v744_v20 = vmul.f32 %v728_v60, %v719_v19  ;;  %v643_v46 = vadd.f32 %v4183_v8, %v6499_v35  ;;  %v2920_v35 = vld [vmem:[%s3738_s12 + $0x198] sm:$0xff] }
  0x67   : > { %6497 = vst [vmem:[#allocation26_spill] sm:$0xff] %v4352_v7  ;;  %6498 = vst [vmem:[#allocation8_spill] sm:$0xff] %v4358_v38  ;;  %v644_v50 = vadd.f32 %v4185_v9, %v6500_v54  ;;  %v741_v52 = vmul.f32 %v724_v28, %v716_v3  ;;  %v742_v13 = vmul.f32 %v728_v60, %v717_v48  ;;  %v2922_v54 = vld [vmem:[%s3738_s12 + $0x1a8] sm:$0xff] }
  0x68   : > { %v4369_v5 = vadd.f32 %v733_v25, %v4216_v10  ;;  %v4372_v58 = vadd.f32 %v734_v2, %v4219_v11  ;;  %v4374_v33 = vadd.f32 %v737_v34, %v639_v37  ;;  %v4376_v4 = vadd.f32 %v738_v18, %v640_v16  ;;  %v2911_v2 = vld [vmem:[%s3738_s12 + $0x150] sm:$0xff]  ;;  %v2912_v34 = vld [vmem:[%s3738_s12 + $0x158] sm:$0xff]  ;;  %v2913_v18 = vld [vmem:[%s3738_s12 + $0x160] sm:$0xff] }
  0x69   : > { %v4378_v40 = vadd.f32 %v739_v26, %v641_v27  ;;  %v4380_v1 = vadd.f32 %v740_v15, %v642_v22  ;;  %v759_v8 = vmax.f32 %v4349_v43, %v4355_v23  ;;  %v773_v9 = vmax.f32 %v4352_v7, %v4358_v38  ;;  %v2914_v26 = vld [vmem:[%s3738_s12 + $0x168] sm:$0xff]  ;;  %v2915_v15 = vld [vmem:[%s3738_s12 + $0x170] sm:$0xff]  ;;  %v6533_v7 = vld [vmem:[#allocation37_spill] sm:$0xff] }
  0x6a   : > { %6501 = vst [vmem:[#allocation7_spill] sm:$0xff] %v4369_v5  ;;  %6502 = vst [vmem:[#allocation27_spill] sm:$0xff] %v4372_v58  ;;  %v4386_v36 = vadd.f32 %v743_v17, %v645_v59  ;;  %v4388_v10 = vadd.f32 %v744_v20, %v646_v56  ;;  %v4390_v11 = vadd.f32 %v741_v52, %v643_v46  ;;  %v2916_v59 = vld [vmem:[%s3738_s12 + $0x178] sm:$0xff]  ;;  %v2917_v56 = vld [vmem:[%s3738_s12 + $0x180] sm:$0xff] }
  0x6b   : > { %6503 = vst [vmem:[#allocation28_spill] sm:$0xff] %v4374_v33  ;;  %6504 = vst [vmem:[#allocation29_spill] sm:$0xff] %v4376_v4  ;;  %v4392_v37 = vadd.f32 %v742_v13, %v644_v50  ;;  %v760_v16 = vmax.f32 %v4369_v5, %v4374_v33  ;;  %v761_v22 = vmax.f32 %v759_v8, %v4378_v40  ;;  %v2918_v17 = vld [vmem:[%s3738_s12 + $0x188] sm:$0xff]  ;;  %v2919_v20 = vld [vmem:[%s3738_s12 + $0x190] sm:$0xff] }
  0x6c   : > { %6505 = vst [vmem:[#allocation30_spill] sm:$0xff] %v4378_v40  ;;  %6506 = vst [vmem:[#allocation48_spill] sm:$0xff] %v4380_v1  ;;  %v774_v28 = vmax.f32 %v4372_v58, %v4376_v4  ;;  %v775_v60 = vmax.f32 %v773_v9, %v4380_v1  ;;  %v764_v27 = vsel %vm763_vm0, %v4386_v36, -inf  ;;  %v777_v25 = vsel %vm763_vm0, %v4388_v10, -inf  ;;  %v2921_v46 = vld [vmem:[%s3738_s12 + $0x1a0] sm:$0xff]  ;;  %v6520_v40 = vld [vmem:[#allocation18_spill] sm:$0xff] }
  0x6d   : > { %6507 = vst [vmem:[#allocation49_spill] sm:$0xff] %v4386_v36  ;;  %6508 = vst [vmem:[#allocation50_spill] sm:$0xff] %v4388_v10  ;;  %v762_v6 = vmax.f32 %v760_v16, %v4390_v11  ;;  %v765_v42 = vmax.f32 %v761_v22, %v764_v27  ;;  %v2923_v13 = vld [vmem:[%s3738_s12 + $0x1b0] sm:$0x1]  ;;  %v2924_v8 = vld [vmem:[%s3738_s12 + $0x1b8] sm:$0x1] }
  0x6e   : > { %6509 = vst [vmem:[#allocation51_spill] sm:$0xff] %v4390_v11  ;;  %6510 = vst [vmem:[#allocation52_spill] sm:$0xff] %v4392_v37  ;;  %v776_v29 = vmax.f32 %v774_v28, %v4392_v37  ;;  %v778_v44 = vmax.f32 %v775_v60, %v777_v25  ;;  %v6511_v9 = vld [vmem:[#allocation9_spill] sm:$0xff]  ;;  %v6512_v22 = vld [vmem:[#allocation10_spill] sm:$0xff] }
  0x6f   : > { %v766_v31 = vmax.f32 %v765_v42, %v762_v6  ;;  %v1043_v16 = vadd.f32 %v2911_v2, %v6511_v9  ;;  %v1044_v28 = vadd.f32 %v2912_v34, %v6512_v22  ;;  %v1045_v60 = vadd.f32 %v2913_v18, %v6511_v9  ;;  %v6516_v10 = vld [vmem:[#allocation14_spill] sm:$0xff]  ;;  %v2926_v1 = vld [vmem:[%s3738_s12 + $0x1c0] sm:$0xff]  ;;  %v6536_v38 = vld [vmem:[#allocation40_spill] sm:$0xff] }
  0x70   : > { %v779_v49 = vmax.f32 %v778_v44, %v776_v29  ;;  %v1046_v27 = vadd.f32 %v2914_v26, %v6512_v22  ;;  %v1047_v25 = vadd.f32 %v2915_v15, %v6511_v9  ;;  %v1048_v6 = vadd.f32 %v2916_v59, %v6512_v22  ;;  %v6513_v15 = vld [vmem:[#allocation11_spill] sm:$0xff]  ;;  %v2925_v4 = vld [vmem:[%s3812_s26 + $0x4] ss:$8 sm:$0x3] }
  0x71   : > { %v767_v24 = vrot.slane %v766_v31, 4  ;;  %v1049_v42 = vadd.f32 %v2917_v56, %v6511_v9  ;;  %v1050_v29 = vadd.f32 %v2918_v17, %v6512_v22  ;;  %v1051_v44 = vadd.f32 %v2919_v20, %v6511_v9  ;;  %v6514_v56 = vld [vmem:[#allocation12_spill] sm:$0xff]  ;;  %v6515_v20 = vld [vmem:[#allocation13_spill] sm:$0xff] }
  0x72   : > { %v780_v19 = vrot.slane %v779_v49, 4  ;;  %v1055_v2 = vadd.f32 %v2923_v13, %v6511_v9  ;;  %v1056_v34 = vadd.f32 %v2924_v8, %v6512_v22  ;;  %v1057_v59 = vsub.f32 %v1043_v16, %v6513_v15  ;;  %v6519_v13 = vld [vmem:[#allocation17_spill] sm:$0xff]  ;;  %v2929_v16 = vld [vmem:[%s3738_s12 + $0x1d8] sm:$0xff] }
  0x73   : > { %v768_v3 = vmax.f32 %v766_v31, %v767_v24  ;;  %v1052_v31 = vadd.f32 %v2920_v35, %v6512_v22  ;;  %v1053_v24 = vadd.f32 %v2921_v46, %v6511_v9  ;;  %v1058_v17 = vsub.f32 %v1044_v28, %v6514_v56  ;;  %v6517_v46 = vld [vmem:[#allocation15_spill] sm:$0xff]  ;;  %v6522_v15 = vld [vmem:[#allocation20_spill] sm:$0xff]  ;;  %v2943_v5 = vld [vmem:[%s3738_s12 + $0x240] sm:$0xff] }
  0x74   : > { %v781_v48 = vmax.f32 %v779_v49, %v780_v19  ;;  %v2910_v49 = vld [vmem:[%s3812_s26 + $0x3] ss:$8 sm:$0x3]  ;;  %v1054_v19 = vadd.f32 %v2922_v54, %v6512_v22  ;;  %v1059_v35 = vsub.f32 %v1045_v60, %v6515_v20  ;;  %v1060_v36 = vsub.f32 %v1046_v27, %v6516_v10  ;;  %v6518_v54 = vld [vmem:[#allocation16_spill] sm:$0xff]  ;;  %v6521_v28 = vld [vmem:[#allocation19_spill] sm:$0xff] }
  0x75   : > { %v769_v50 = vrot.slane %v768_v3, 2  ;;  %v1061_v37 = vsub.f32 %v1047_v25, %v6517_v46  ;;  %v1062_v11 = vsub.f32 %v1048_v6, %v6518_v54  ;;  %v1063_v9 = vsub.f32 %v1049_v42, %v6519_v13  ;;  %v6523_v27 = vld [vmem:[#allocation21_spill] sm:$0xff]  ;;  %v6524_v6 = vld [vmem:[#allocation22_spill] sm:$0xff] }
  0x76   : > { %v782_v52 = vrot.slane %v781_v48, 2  ;;  %v1064_v8 = vsub.f32 %v1050_v29, %v6520_v40  ;;  %v1065_v60 = vsub.f32 %v1051_v44, %v6521_v28  ;;  %v1066_v10 = vsub.f32 %v1052_v31, %v6522_v15  ;;  %v6525_v44 = vld [vmem:[#allocation24_spill] sm:$0xff]  ;;  %v2936_v15 = vld [vmem:[%s3738_s12 + $0x210] sm:$0xff] }
  0x77   : > { %v770_v18 = vmax.f32 %v768_v3, %v769_v50  ;;  %v1075_v3 = vrot.slane %v2910_v49, %v3689_v61  ;;  %v2927_v50 = vld [vmem:[%s3738_s12 + $0x1c8] sm:$0xff]  ;;  %v1067_v25 = vsub.f32 %v1053_v24, %v6523_v27  ;;  %v1068_v56 = vsub.f32 %v1054_v19, %v6524_v6 }
  0x78   : > { %v783_v26 = vmax.f32 %v781_v48, %v782_v52  ;;  %v1079_v48 = vrot.slane %v2910_v49, %v3691_v62  ;;  %v2928_v52 = vld [vmem:[%s3738_s12 + $0x1d0] sm:$0xff]  ;;  %v1069_v40 = vsub.f32 %v1055_v2, %v3959_v53  ;;  %v1070_v29 = vsub.f32 %v1056_v34, %v3964_v30  ;;  %v2930_v2 = vld [vmem:[%s3738_s12 + $0x1e0] sm:$0xff]  ;;  %v2931_v34 = vld [vmem:[%s3738_s12 + $0x1e8] sm:$0xff] }
  0x79   : > { %v771_v42 = vrot.slane %v770_v18, 1  ;;  %v4456_v49 = vadd.f32 %v2926_v1, %v3983_v32  ;;  %v4459_v46 = vadd.f32 %v2927_v50, %v6525_v44  ;;  %v4462_v31 = vadd.f32 %v2928_v52, %v3983_v32  ;;  %v2933_v52 = vld [vmem:[%s3738_s12 + $0x1f8] sm:$0xff] }
  0x7a   : > { %v784_v20 = vrot.slane %v783_v26, 1  ;;  %v4465_v24 = vadd.f32 %v2929_v16, %v6525_v44  ;;  %v4467_v19 = vmul.f32 %v1075_v3, %v1057_v59  ;;  %v4469_v53 = vmul.f32 %v1079_v48, %v1058_v17  ;;  %v2932_v17 = vld [vmem:[%s3738_s12 + $0x1f0] sm:$0xff] }
  0x7b   : > { %v4471_v30 = vmul.f32 %v1075_v3, %v1059_v35  ;;  %v4473_v1 = vmul.f32 %v1079_v48, %v1060_v36  ;;  %v4477_v54 = vmul.f32 %v1075_v3, %v1061_v37  ;;  %v4479_v13 = vmul.f32 %v1079_v48, %v1062_v11  ;;  %v2934_v35 = vld [vmem:[%s3738_s12 + $0x200] sm:$0xff]  ;;  %v2935_v11 = vld [vmem:[%s3738_s12 + $0x208] sm:$0xff] }
  0x7c   : > { %v4481_v50 = vmul.f32 %v1075_v3, %v1063_v9  ;;  %v4483_v59 = vmul.f32 %v1079_v48, %v1064_v8  ;;  %v4488_v16 = vmax.f32 %v770_v18, %v771_v42  ;;  %v4490_v36 = vmax.f32 %v783_v26, %v784_v20  ;;  %v2937_v9 = vld [vmem:[%s3738_s12 + $0x218] sm:$0xff]  ;;  %v2938_v18 = vld [vmem:[%s3738_s12 + $0x220] sm:$0x1]  ;;  %v2939_v42 = vld [vmem:[%s3738_s12 + $0x228] sm:$0x1] }
  0x7d   : > { %v4492_v28 = vmul.f32 %v1075_v3, %v1065_v60  ;;  %v4494_v37 = vmul.f32 %v1079_v48, %v1066_v10  ;;  %v4499_v27 = vmul.f32 %v1075_v3, %v1067_v25  ;;  %v4501_v8 = vmul.f32 %v1079_v48, %v1068_v56 }
  0x7e   : > { %6526 = vst [vmem:[#allocation11_spill] sm:$0xff] %v4490_v36  ;;  %v4503_v6 = vmul.f32 %v1075_v3, %v1069_v40  ;;  %v4505_v22 = vmul.f32 %v1079_v48, %v1070_v29  ;;  %v1131_v26 = vadd.f32 %v2930_v2, %v3983_v32  ;;  %v1132_v60 = vadd.f32 %v2931_v34, %v6525_v44 }
  0x7f   : > { %v1133_v10 = vadd.f32 %v2932_v17, %v3983_v32  ;;  %v1134_v20 = vadd.f32 %v2933_v52, %v6525_v44  ;;  %v1135_v25 = vadd.f32 %v2934_v35, %v3983_v32  ;;  %v1136_v56 = vadd.f32 %v2935_v11, %v6525_v44  ;;  %v6527_v35 = vld [vmem:[#allocation31_spill] sm:$0xff] }
  0x80   : > { %v1137_v3 = vadd.f32 %v2936_v15, %v3983_v32  ;;  %v1138_v48 = vadd.f32 %v2937_v9, %v6525_v44  ;;  %v1139_v2 = vadd.f32 %v2938_v18, %v3983_v32  ;;  %v1140_v34 = vadd.f32 %v2939_v42, %v6525_v44  ;;  %v6528_v15 = vld [vmem:[#allocation32_spill] sm:$0xff]  ;;  %v2941_v17 = vld [vmem:[%s3738_s12 + $0x230] sm:$0xff]  ;;  %v6529_v32 = vld [vmem:[#allocation33_spill] sm:$0xff] }
  0x81   : > { %v1141_v11 = vsub.f32 %v4456_v49, %v6527_v35  ;;  %v1142_v9 = vsub.f32 %v4459_v46, %v6528_v15  ;;  %v1143_v29 = vsub.f32 %v4462_v31, %v4068_v21  ;;  %v1144_v18 = vsub.f32 %v4465_v24, %v4073_v63  ;;  %v2942_v44 = vld [vmem:[%s3738_s12 + $0x238] sm:$0xff]  ;;  %v6530_v35 = vld [vmem:[#allocation34_spill] sm:$0xff]  ;;  %v6531_v46 = vld [vmem:[#allocation35_spill] sm:$0xff] }
  0x82   : > { %v1159_v42 = vrot.slane %v2925_v4, %v3689_v61  ;;  %v1163_v40 = vrot.slane %v2925_v4, %v3691_v62  ;;  %v1145_v52 = vsub.f32 %v1131_v26, %v4082_v57  ;;  %v1146_v49 = vsub.f32 %v1132_v60, %v6529_v32  ;;  %v6532_v21 = vld [vmem:[#allocation36_spill] sm:$0xff]  ;;  %v6534_v24 = vld [vmem:[#allocation38_spill] sm:$0xff]  ;;  %v6535_v4 = vld [vmem:[#allocation39_spill] sm:$0xff] }
  0x83   : > { %v1147_v58 = vsub.f32 %v1133_v10, %v6530_v35  ;;  %v1148_v15 = vsub.f32 %v1134_v20, %v6531_v46  ;;  %v1149_v31 = vsub.f32 %v1135_v25, %v6532_v21  ;;  %v1150_v63 = vsub.f32 %v1136_v56, %v6533_v7  ;;  %v6537_v57 = vld [vmem:[#allocation41_spill] sm:$0xff]  ;;  %v2945_v7 = vld [vmem:[%s3738_s12 + $0x250] sm:$0xff] }
  0x84   : > { %v1151_v43 = vsub.f32 %v1137_v3, %v6534_v24  ;;  %v1152_v33 = vsub.f32 %v1138_v48, %v6535_v4  ;;  %v1153_v36 = vsub.f32 %v1139_v2, %v6536_v38  ;;  %v1154_v26 = vsub.f32 %v1140_v34, %v6537_v57  ;;  %v2946_v34 = vld [vmem:[%s3738_s12 + $0x258] sm:$0xff]  ;;  %v2953_v4 = vld [vmem:[%s3738_s12 + $0x290] sm:$0x1] }
  0x85   : > { %v1211_v32 = vadd.f32 %v2941_v17, %v4191_v47  ;;  %v4553_v60 = vadd.f32 %v2942_v44, %v4194_v45  ;;  %v1166_v10 = vmul.f32 %v1159_v42, %v1141_v11  ;;  %v1167_v20 = vmul.f32 %v1163_v40, %v1142_v9  ;;  %v2954_v57 = vld [vmem:[%s3738_s12 + $0x298] sm:$0x1] }
  0x86   : > { %v1168_v25 = vmul.f32 %v1159_v42, %v1143_v29  ;;  %v4557_v56 = vadd.f32 %v2943_v5, %v4191_v47  ;;  %v1169_v3 = vmul.f32 %v1163_v40, %v1144_v18  ;;  %v1170_v38 = vmul.f32 %v1159_v42, %v1145_v52  ;;  %v2944_v29 = vld [vmem:[%s3738_s12 + $0x248] sm:$0xff]  ;;  %v2947_v18 = vld [vmem:[%s3738_s12 + $0x260] sm:$0xff] }
  0x87   : > { %v1171_v48 = vmul.f32 %v1163_v40, %v1146_v49  ;;  %v1172_v2 = vmul.f32 %v1159_v42, %v1147_v58  ;;  %v1173_v17 = vmul.f32 %v1163_v40, %v1148_v15  ;;  %v1174_v44 = vmul.f32 %v1159_v42, %v1149_v31  ;;  %v2948_v52 = vld [vmem:[%s3738_s12 + $0x268] sm:$0xff]  ;;  %v2949_v58 = vld [vmem:[%s3738_s12 + $0x270] sm:$0xff] }
  0x88   : > { %v1175_v35 = vmul.f32 %v1163_v40, %v1150_v63  ;;  %v4560_v11 = vmul.f32 %v1159_v42, %v1151_v43  ;;  %v4563_v9 = vmul.f32 %v1163_v40, %v1152_v33  ;;  %v1178_v46 = vmul.f32 %v1159_v42, %v1153_v36  ;;  %v2940_v33 = vld [vmem:[%s3812_s26 + $0x5] ss:$8 sm:$0x3]  ;;  %v2950_v36 = vld [vmem:[%s3738_s12 + $0x278] sm:$0xff] }
  0x89   : > { %v4565_v5 = vmul.f32 %v1163_v40, %v1154_v26  ;;  %v1215_v49 = vadd.f32 %v2945_v7, %v4191_v47  ;;  %v1180_v15 = vadd.f32 %v1166_v10, %v4467_v19  ;;  %v1181_v21 = vadd.f32 %v1167_v20, %v4469_v53  ;;  %v2951_v19 = vld [vmem:[%s3738_s12 + $0x280] sm:$0xff]  ;;  %v2952_v20 = vld [vmem:[%s3738_s12 + $0x288] sm:$0xff] }
  0x8a   : > { %v4574_v43 = vadd.f32 %v1168_v25, %v4471_v30  ;;  %v1216_v40 = vadd.f32 %v2946_v34, %v4194_v45  ;;  %v1183_v42 = vadd.f32 %v1169_v3, %v4473_v1  ;;  %v1184_v31 = vadd.f32 %v1170_v38, %v4477_v54  ;;  %v6538_v25 = vld [vmem:[#allocation43_spill] sm:$0xff]  ;;  %v6539_v3 = vld [vmem:[#allocation42_spill] sm:$0xff] }
  0x8b   : > { %v1185_v63 = vadd.f32 %v1171_v48, %v4479_v13  ;;  %v1186_v24 = vadd.f32 %v1172_v2, %v4481_v50  ;;  %v1214_v53 = vadd.f32 %v2944_v29, %v4194_v45  ;;  %v1217_v30 = vadd.f32 %v2947_v18, %v4191_v47  ;;  %v6540_v48 = vld [vmem:[#allocation44_spill] sm:$0xff] }
  0x8c   : > { %v1218_v26 = vadd.f32 %v2948_v52, %v4194_v45  ;;  %v1219_v10 = vadd.f32 %v2949_v58, %v4191_v47  ;;  %v1220_v1 = vadd.f32 %v2950_v36, %v4194_v45  ;;  %v1225_v54 = vsub.f32 %v1211_v32, %v4228_v12 }
  0x8d   : > { %v1229_v13 = vsub.f32 %v1215_v49, %v6538_v25  ;;  %v1243_v50 = vrot.slane %v2940_v33, %v3689_v61  ;;  %v1223_v7 = vadd.f32 %v2953_v4, %v4191_v47  ;;  %v1226_v38 = vsub.f32 %v4553_v60, %v6539_v3  ;;  %v6541_v49 = vld [vmem:[#allocation45_spill] sm:$0xff]  ;;  %v6542_v4 = vld [vmem:[#allocation46_spill] sm:$0xff] }
  0x8e   : > { %v1230_v2 = vsub.f32 %v1216_v40, %v6540_v48  ;;  %v1247_v34 = vrot.slane %v2940_v33, %v3691_v62  ;;  %v1187_v29 = vadd.f32 %v1173_v17, %v4483_v59  ;;  %v1188_v18 = vadd.f32 %v1174_v44, %v4492_v28  ;;  %v6543_v33 = vld [vmem:[#allocation6_spill] sm:$0xff]  ;;  %v6544_v28 = vld [vmem:[#allocation47_spill] sm:$0xff] }
  0x8f   : > { %v1221_v52 = vadd.f32 %v2951_v19, %v4191_v47  ;;  %v1224_v32 = vadd.f32 %v2954_v57, %v4194_v45  ;;  %v1222_v58 = vadd.f32 %v2952_v20, %v4194_v45  ;;  %v1227_v36 = vsub.f32 %v4557_v56, %v6541_v49 }
  0x90   : > { %v1228_v25 = vsub.f32 %v1214_v53, %v6542_v4  ;;  %v1231_v60 = vsub.f32 %v1217_v30, %v4281_v14  ;;  %v1232_v40 = vsub.f32 %v1218_v26, %v4289_v0  ;;  %v1233_v3 = vsub.f32 %v1219_v10, %v6543_v33 }
  0x91   : > { %v1250_v59 = vmul.f32 %v1243_v50, %v1225_v54  ;;  %v1254_v17 = vmul.f32 %v1243_v50, %v1229_v13  ;;  %v1234_v44 = vsub.f32 %v1220_v1, %v6544_v28  ;;  %v1237_v19 = vsub.f32 %v1223_v7, %v4314_v41  ;;  %v6563_v28 = vld [vmem:[#allocation7_spill] sm:$0xff] }
  0x92   : > { %v1251_v57 = vmul.f32 %v1247_v34, %v1226_v38  ;;  %v1255_v48 = vmul.f32 %v1247_v34, %v1230_v2  ;;  %v1189_v20 = vadd.f32 %v1175_v35, %v4494_v37  ;;  %v1192_v56 = vadd.f32 %v1178_v46, %v4503_v6 }
  0x93   : > { %v1235_v53 = vsub.f32 %v1221_v52, %v4329_v55  ;;  %v1238_v30 = vsub.f32 %v1224_v32, %v4319_v51  ;;  %v1236_v0 = vsub.f32 %v1222_v58, %v4334_v39  ;;  %v1252_v26 = vmul.f32 %v1243_v50, %v1227_v36 }
  0x94   : > { %v1253_v10 = vmul.f32 %v1247_v34, %v1228_v25  ;;  %v1256_v54 = vmul.f32 %v1243_v50, %v1231_v60  ;;  %v1257_v13 = vmul.f32 %v1247_v34, %v1232_v40  ;;  %v1258_v4 = vmul.f32 %v1243_v50, %v1233_v3  ;;  %v6560_v60 = vld [vmem:[#allocation30_spill] sm:$0xff] }
  0x95   : > { %v4618_v1 = vadd.f32 %v1250_v59, %v1180_v15  ;;  %v4620_v7 = vadd.f32 %v1254_v17, %v1184_v31  ;;  %v1259_v38 = vmul.f32 %v1247_v34, %v1234_v44  ;;  %v1262_v2 = vmul.f32 %v1243_v50, %v1237_v19  ;;  %v6561_v3 = vld [vmem:[#allocation26_spill] sm:$0xff] }
  0x96   : > { %v4622_v37 = vadd.f32 %v1251_v57, %v1181_v21  ;;  %v4624_v6 = vadd.f32 %v1255_v48, %v1185_v63  ;;  %v790_v51 = vsub.f32 %v4355_v23, %v4488_v16  ;;  %v1190_v39 = vadd.f32 %v4560_v11, %v4499_v27  ;;  %v6565_v57 = vld [vmem:[#allocation27_spill] sm:$0xff] }
  0x97   : > { %v1193_v35 = vadd.f32 %v4565_v5, %v4505_v22  ;;  %v1263_v46 = vmul.f32 %v1247_v34, %v1238_v30  ;;  %v1191_v15 = vadd.f32 %v4563_v9, %v4501_v8  ;;  %v1260_v31 = vmul.f32 %v1243_v50, %v1235_v53  ;;  %v6553_v9 = vld [vmem:[#allocation11_spill] sm:$0xff] }
  0x98   : > { %6545 = vst [vmem:[#allocation12_spill] sm:$0xff] %v4622_v37  ;;  %6546 = vst [vmem:[#allocation13_spill] sm:$0xff] %v4624_v6  ;;  %v1261_v25 = vmul.f32 %v1247_v34, %v1236_v0  ;;  %v4635_v21 = vadd.f32 %v1252_v26, %v4574_v43  ;;  %v4637_v63 = vadd.f32 %v1253_v10, %v1183_v42  ;;  %v6554_v43 = vld [vmem:[#allocation8_spill] sm:$0xff]  ;;  %v6556_v34 = vld [vmem:[#allocation25_spill] sm:$0xff] }
  0x99   : > { %v4639_v52 = vadd.f32 %v1256_v54, %v1186_v24  ;;  %v4641_v23 = vadd.f32 %v1258_v4, %v1188_v18  ;;  %v1278_v27 = vmax.f32 %v4618_v1, %v4620_v7  ;;  %v4645_v11 = vadd.f32 %v1257_v13, %v1187_v29  ;;  %v6555_v24 = vld [vmem:[#allocation28_spill] sm:$0xff]  ;;  %v6559_v29 = vld [vmem:[#allocation29_spill] sm:$0xff] }
  0x9a   : > { %6547 = vst [vmem:[#allocation14_spill] sm:$0xff] %v4637_v63  ;;  %v4647_v22 = vadd.f32 %v1259_v38, %v1189_v20  ;;  %v4649_v5 = vadd.f32 %v1262_v2, %v1192_v56  ;;  %v1291_v8 = vmax.f32 %v4622_v37, %v4624_v6  ;;  %v791_v42 = vsub.f32 %v6554_v43, %v6553_v9  ;;  %v6569_v13 = vld [vmem:[#allocation48_spill] sm:$0xff] }
  0x9b   : > { %6548 = vst [vmem:[#allocation15_spill] sm:$0xff] %v4639_v52  ;;  %6549 = vst [vmem:[#allocation16_spill] sm:$0xff] %v4641_v23  ;;  %v792_v50 = vsub.f32 %v6555_v24, %v4488_v16  ;;  %v6557_v18 = vsub.f32 %v6556_v34, %v4488_v16  ;;  %v4660_v58 = vadd.f32 %v1263_v46, %v1193_v35  ;;  %v808_v38 = vmul.f32 1.442695, %v790_v51  ;;  %v6571_v46 = vld [vmem:[#allocation52_spill] sm:$0xff] }
  0x9c   : > { %6550 = vst [vmem:[#allocation17_spill] sm:$0xff] %v4645_v11  ;;  %6551 = vst [vmem:[#allocation18_spill] sm:$0xff] %v4647_v22  ;;  %v793_v36 = vsub.f32 %v6559_v29, %v6553_v9  ;;  %v794_v40 = vsub.f32 %v6560_v60, %v4488_v16  ;;  %v6562_v59 = vsub.f32 %v6561_v3, %v6553_v9  ;;  %v1282_v26 = vsel %vm763_vm0, %v4649_v5, -inf  ;;  %v2998_v3 = vld [vmem:[%s3738_s12 + $0x2a0] sm:$0xff] }
  0x9d   : > { %6552 = vst [vmem:[#allocation19_spill] sm:$0xff] %v4649_v5  ;;  %v800_v32 = vmul.f32 1.442695, %v6557_v18  ;;  %6558 = vst [vmem:[#allocation20_spill] sm:$0xff] %v4660_v58  ;;  %v6564_v44 = vsub.f32 %v6563_v28, %v4488_v16  ;;  %v6566_v48 = vsub.f32 %v6565_v57, %v6553_v9  ;;  %v4675_v56 = vadd.f32 %v1260_v31, %v1190_v39  ;;  %v6570_v39 = vld [vmem:[#allocation51_spill] sm:$0xff]  ;;  %v3002_v28 = vld [vmem:[%s3738_s12 + $0x2c0] sm:$0xff] }
  0x9e   : > { %v802_v17 = vmul.f32 1.442695, %v6562_v59  ;;  %v1279_v53 = vmax.f32 %v4635_v21, %v4639_v52  ;;  %v1280_v30 = vmax.f32 %v1278_v27, %v4641_v23  ;;  %v4680_v0 = vadd.f32 %v1261_v25, %v1191_v15  ;;  %v3000_v59 = vld [vmem:[%s3738_s12 + $0x2b0] sm:$0xff]  ;;  %v3036_v23 = vld [vmem:[%s3738_s12 + $0x3c0] sm:$0xff] }
  0x9f   : > { %v804_v19 = vmul.f32 1.442695, %v6564_v44  ;;  %v806_v20 = vmul.f32 1.442695, %v6566_v48  ;;  %6567 = vst [vmem:[#allocation21_spill] sm:$0xff] %v4675_v56  ;;  %v1292_v10 = vmax.f32 %v4637_v63, %v4645_v11  ;;  %v1293_v54 = vmax.f32 %v1291_v8, %v4647_v22  ;;  %v3004_v44 = vld [vmem:[%s3738_s12 + $0x2d0] sm:$0xff] }
  0xa0   : > { %6568 = vst [vmem:[#allocation22_spill] sm:$0xff] %v4680_v0  ;;  %v795_v4 = vsub.f32 %v6569_v13, %v6553_v9  ;;  %3207 = vpow2.f32 %v800_v32  ;;  %v1295_v2 = vsel %vm763_vm0, %v4660_v58, -inf  ;;  %v796_v35 = vsub.f32 %v6570_v39, %v4488_v16  ;;  %v6577_v39 = vld [vmem:[#allocation9_spill] sm:$0xff]  ;;  %v6588_v58 = vld [vmem:[#allocation23_spill] sm:$0xff]  ;;  %v6589_v22 = vld [vmem:[#allocation24_spill] sm:$0xff] }
  0xa1   : > { %v797_v15 = vsub.f32 %v6571_v46, %v6553_v9  ;;  %3209 = vpow2.f32 %v802_v17  ;;  %v810_v31 = vmul.f32 1.442695, %v791_v42  ;;  %v812_v25 = vmul.f32 1.442695, %v792_v50  ;;  %v6572_v50 = vld [vmem:[#allocation49_spill] sm:$0xff]  ;;  %v3001_v17 = vld [vmem:[%s3738_s12 + $0x2b8] sm:$0xff] }
  0xa2   : > { %3211 = vpow2.f32 %v804_v19  ;;  %v1281_v27 = vmax.f32 %v1279_v53, %v4675_v56  ;;  %v1283_v8 = vmax.f32 %v1280_v30, %v1282_v26  ;;  %v814_v43 = vmul.f32 1.442695, %v793_v36  ;;  %v3005_v30 = vld [vmem:[%s3738_s12 + $0x2d8] sm:$0xff]  ;;  %v3006_v26 = vld [vmem:[%s3738_s12 + $0x2e0] sm:$0xff]  ;;  %v6578_v46 = vld [vmem:[#allocation10_spill] sm:$0xff] }
  0xa3   : > { %3213 = vpow2.f32 %v806_v20  ;;  %v1294_v51 = vmax.f32 %v1292_v10, %v4680_v0  ;;  %v1296_v24 = vmax.f32 %v1293_v54, %v1295_v2  ;;  %v816_v34 = vmul.f32 1.442695, %v794_v40  ;;  %v2999_v40 = vld [vmem:[%s3738_s12 + $0x2a8] sm:$0xff]  ;;  %v3010_v2 = vld [vmem:[%s3738_s12 + $0x300] sm:$0x1] }
  0xa4   : > { %3215 = vpow2.f32 %v808_v38  ;;  %v818_v42 = vmul.f32 1.442695, %v795_v4  ;;  %v798_v18 = vsub.f32 %v6572_v50, %v4488_v16  ;;  %v820_v32 = vmul.f32 1.442695, %v796_v35  ;;  %v3003_v16 = vld [vmem:[%s3738_s12 + $0x2c8] sm:$0xff]  ;;  %v3008_v4 = vld [vmem:[%s3738_s12 + $0x2f0] sm:$0xff] }
  0xa5   : > { %3217 = vpow2.f32 %v810_v31  ;;  %v1284_v29 = vmax.f32 %v1283_v8, %v1281_v27  ;;  %v822_v36 = vmul.f32 1.442695, %v797_v15  ;;  %v1297_v60 = vmax.f32 %v1296_v24, %v1294_v51  ;;  %v3007_v10 = vld [vmem:[%s3738_s12 + $0x2e8] sm:$0xff]  ;;  %v3009_v38 = vld [vmem:[%s3738_s12 + $0x2f8] sm:$0xff] }
  0xa6   : > { %3219 = vpow2.f32 %v812_v25  ;;  %v4710_v20 = vmul.f32 1.442695, %v798_v18  ;;  %v4721_v35 = vadd.f32 %v2998_v3, %v6577_v39  ;;  %v4724_v15 = vadd.f32 %v2999_v40, %v6578_v46  ;;  %v3011_v25 = vld [vmem:[%s3738_s12 + $0x308] sm:$0x1] }
  0xa7   : > { %3221 = vpow2.f32 %v814_v43  ;;  %v1285_v53 = vrot.slane %v1284_v29, 4  ;;  %v1298_v13 = vrot.slane %v1297_v60, 4  ;;  %v4730_v27 = vadd.f32 %v3000_v59, %v6577_v39  ;;  %v2997_v3 = vld [vmem:[%s3812_s26 + $0x6] ss:$8 sm:$0x3] }
  0xa8   : > { %3223 = vpow2.f32 %v816_v34  ;;  %6575 = vst [vmem:[#allocation32_spill] sm:$0xff] %v4710_v20  ;;  %v4733_v8 = vadd.f32 %v3001_v17, %v6578_v46  ;;  %v4736_v43 = vadd.f32 %v3002_v28, %v6577_v39  ;;  %v4739_v51 = vadd.f32 %v3003_v16, %v6578_v46 }
  0xa9   : > { %3225 = vpow2.f32 %v818_v42  ;;  %v4744_v34 = vadd.f32 %v3004_v44, %v6577_v39  ;;  %v4747_v42 = vadd.f32 %v3005_v30, %v6578_v46  ;;  %v4750_v50 = vadd.f32 %v3006_v26, %v6577_v39  ;;  %v3384_v30 = vld [vmem:[%s6323_s4 + $0x8] sm:$0xff] }
  0xaa   : > { %v4706_v19 = vpop.eup %3207  ;;  %3227 = vpow2.f32 %v820_v32  ;;  %v4753_v18 = vadd.f32 %v3007_v10, %v6578_v46  ;;  %v4759_v40 = vadd.f32 %v3008_v4, %v6577_v39  ;;  %v4762_v59 = vadd.f32 %v3009_v38, %v6578_v46  ;;  %v3386_v4 = vld [vmem:[%s6323_s4 + $0x18] sm:$0xff] }
  0xab   : > { %6573 = vst [vmem:[#allocation31_spill] sm:$0xff] %v4706_v19  ;;  %v4715_v54 = vpop.eup %3209  ;;  %3229 = vpow2.f32 %v822_v36  ;;  %v1286_v36 = vmax.f32 %v1284_v29, %v1285_v53  ;;  %v4765_v17 = vadd.f32 %v3010_v2, %v6577_v39  ;;  %v1299_v16 = vmax.f32 %v1297_v60, %v1298_v13  ;;  %v3383_v29 = vld [vmem:[%s6323_s4] sm:$0xff]  ;;  %v3385_v60 = vld [vmem:[%s6323_s4 + $0x10] sm:$0xff] }
  0xac   : > { %6576 = vst [vmem:[#allocation33_spill] sm:$0xff] %v4715_v54  ;;  %v4726_v31 = vpop.eup %3211  ;;  %v4770_v44 = vadd.f32 %v3011_v25, %v6578_v46  ;;  %v1576_v53 = vsub.f32 %v4721_v35, %v3383_v29  ;;  %v1577_v26 = vsub.f32 %v4724_v15, %v3384_v30  ;;  %v1578_v13 = vsub.f32 %v4730_v27, %v3385_v60  ;;  %v3387_v2 = vld [vmem:[%s6323_s4 + $0x20] sm:$0xff]  ;;  %v3388_v35 = vld [vmem:[%s6323_s4 + $0x28] sm:$0xff]  ;;  %v3013_v15 = vld [vmem:[%s3738_s12 + $0x310] sm:$0xff] }
  0xad   : > { %6579 = vst [vmem:[#allocation34_spill] sm:$0xff] %v4726_v31  ;;  %v4741_v24 = vpop.eup %3213  ;;  %v1579_v38 = vsub.f32 %v4733_v8, %v3386_v4  ;;  %v1580_v39 = vsub.f32 %v4736_v43, %v3387_v2  ;;  %v1581_v46 = vsub.f32 %v4739_v51, %v3388_v35  ;;  %v3389_v27 = vld [vmem:[%s6323_s4 + $0x30] sm:$0xff]  ;;  %v3390_v29 = vld [vmem:[%s6323_s4 + $0x38] sm:$0xff]  ;;  %v4810_v30 = vrot.slane %v2997_v3, %v3689_v61  ;;  %v3015_v4 = vld [vmem:[%s3738_s12 + $0x320] sm:$0xff] }
  0xae   : > { %6580 = vst [vmem:[#allocation35_spill] sm:$0xff] %v4741_v24  ;;  %v4755_v32 = vpop.eup %3215  ;;  %v1582_v8 = vsub.f32 %v4744_v34, %v3389_v27  ;;  %v1583_v43 = vsub.f32 %v4747_v42, %v3390_v29  ;;  %v4813_v51 = vrot.slane %v2997_v3, %v3691_v62  ;;  %v3014_v60 = vld [vmem:[%s3738_s12 + $0x318] sm:$0xff]  ;;  %v3016_v2 = vld [vmem:[%s3738_s12 + $0x328] sm:$0xff]  ;;  %v1287_v48 = vrot.slane %v1286_v36, 2  ;;  %v3391_v34 = vld [vmem:[%s6323_s4 + $0x40] sm:$0xff] }
  0xaf   : > { %6581 = vst [vmem:[#allocation36_spill] sm:$0xff] %v4755_v32  ;;  %v4767_v28 = vpop.eup %3217  ;;  %v1584_v42 = vsub.f32 %v4750_v50, %v3391_v34  ;;  %v3392_v3 = vld [vmem:[%s6323_s4 + $0x48] sm:$0xff]  ;;  %v3393_v29 = vld [vmem:[%s6323_s4 + $0x50] sm:$0xff]  ;;  %v1300_v24 = vrot.slane %v1299_v16, 2  ;;  %v3394_v50 = vld [vmem:[%s6323_s4 + $0x58] sm:$0xff]  ;;  %v1646_v0 = vadd.f32 %v3013_v15, %v6588_v58  ;;  %v4871_v15 = vmul.f32 %v4810_v30, %v1578_v13 }
  0xb0   : > { %6582 = vst [vmem:[#allocation37_spill] sm:$0xff] %v4767_v28  ;;  %v4780_v10 = vpop.eup %3219  ;;  %v1585_v27 = vsub.f32 %v4753_v18, %v3392_v3  ;;  %v1587_v34 = vsub.f32 %v4762_v59, %v3394_v50  ;;  %v3395_v54 = vld [vmem:[%s6323_s4 + $0x60] sm:$0x1]  ;;  %v4845_v3 = vld [vmem:[%s6323_s4 + $0x68] sm:$0x1]  ;;  %v3021_v50 = vld [vmem:[%s3738_s12 + $0x350] sm:$0xff]  ;;  %v4876_v56 = vmax.f32 %v1286_v36, %v1287_v48  ;;  %v4892_v13 = vmul.f32 %v4810_v30, %v1582_v8 }
  0xb1   : > { %6583 = vst [vmem:[#allocation38_spill] sm:$0xff] %v4780_v10  ;;  %v4799_v25 = vpop.eup %3221  ;;  %v1588_v18 = vsub.f32 %v4765_v17, %v3395_v54  ;;  %v3019_v59 = vld [vmem:[%s3738_s12 + $0x340] sm:$0xff]  ;;  %v1648_v54 = vadd.f32 %v3015_v4, %v6588_v58  ;;  %v4860_v17 = vadd.f32 %v3016_v2, %v6589_v22  ;;  %v4879_v4 = vmul.f32 %v4810_v30, %v1580_v39  ;;  %v3034_v10 = vld [vmem:[%s3738_s12 + $0x3b0] sm:$0xff] }
  0xb2   : > { %6584 = vst [vmem:[#allocation39_spill] sm:$0xff] %v4799_v25  ;;  %v4818_v35 = vpop.eup %3223  ;;  %v1586_v25 = vsub.f32 %v4759_v40, %v3393_v29  ;;  %v3017_v29 = vld [vmem:[%s3738_s12 + $0x330] sm:$0xff]  ;;  %v4865_v40 = vmul.f32 %v4810_v30, %v1576_v53  ;;  %v4882_v2 = vmul.f32 %v4813_v51, %v1581_v46  ;;  %v4885_v53 = vld [vmem:[%s3812_s26 + $0x7] ss:$8 sm:$0x3]  ;;  %v4889_v11 = vmax.f32 %v1299_v16, %v1300_v24 }
  0xb3   : > { %6585 = vst [vmem:[#allocation40_spill] sm:$0xff] %v4818_v35  ;;  %v4832_v28 = vpop.eup %3225  ;;  %v4856_v35 = vadd.f32 %v3014_v60, %v6589_v22  ;;  %v4874_v60 = vmul.f32 %v4813_v51, %v1579_v38  ;;  %v3023_v48 = vld [vmem:[%s3738_s12 + $0x360] sm:$0xff]  ;;  %v1652_v36 = vadd.f32 %v3019_v59, %v6588_v58  ;;  %v1654_v38 = vadd.f32 %v3021_v50, %v6588_v58 }
  0xb4   : > { %6586 = vst [vmem:[#allocation41_spill] sm:$0xff] %v4832_v28  ;;  %v4850_v28 = vpop.eup %3227  ;;  %v3028_v39 = vld [vmem:[%s3738_s12 + $0x380] sm:$0xff]  ;;  %v4899_v46 = vmul.f32 %v4813_v51, %v1583_v43  ;;  %v4902_v6 = vmul.f32 %v4810_v30, %v1584_v42  ;;  %v4905_v24 = vmul.f32 %v4813_v51, %v1585_v27  ;;  %v4908_v16 = vmul.f32 %v4810_v30, %v1586_v25  ;;  %v3397_v43 = vld [vmem:[%s6323_s4 + $0x70] sm:$0xff] }
  0xb5   : > { %6587 = vst [vmem:[#allocation42_spill] sm:$0xff] %v4850_v28  ;;  %v4862_v5 = vpop.eup %3229  ;;  %v4868_v28 = vmul.f32 %v4813_v51, %v1577_v26  ;;  %v1650_v26 = vadd.f32 %v3017_v29, %v6588_v58  ;;  %v3032_v8 = vld [vmem:[%s3738_s12 + $0x3a0] sm:$0xff]  ;;  %v4912_v29 = vmul.f32 %v4813_v51, %v1587_v34  ;;  %v1660_v50 = vsub.f32 %v1646_v0, %v3397_v43  ;;  %v3030_v27 = vld [vmem:[%s3738_s12 + $0x390] sm:$0xff] }
  0xb6   : > { %6590 = vst [vmem:[#allocation44_spill] sm:$0xff] %v4862_v5  ;;  %v3025_v5 = vld [vmem:[%s3738_s12 + $0x370] sm:$0x1]  ;;  %6591 = vst [vmem:[#allocation45_spill] sm:$0xff] %v4905_v24  ;;  %v1678_v42 = vrot.slane %v4885_v53, %v3689_v61  ;;  %v1656_v25 = vadd.f32 %v3023_v48, %v6588_v58  ;;  %v3398_v34 = vld [vmem:[%s6323_s4 + $0x80] sm:$0xff]  ;;  %v1730_v43 = vadd.f32 %v3028_v39, %v4191_v47 }
  0xb7   : > { %6592 = vst [vmem:[#allocation46_spill] sm:$0xff] %v4912_v29  ;;  %v1658_v59 = vadd.f32 %v3025_v5, %v6588_v58  ;;  %v1662_v63 = vsub.f32 %v1648_v54, %v3398_v34  ;;  %v3399_v5 = vld [vmem:[%s6323_s4 + $0x90] sm:$0xff]  ;;  %v3040_v0 = vld [vmem:[%s3738_s12 + $0x3e0] sm:$0x1]  ;;  %v1289_v29 = vrot.slane %v4876_v56, 1  ;;  %v1734_v52 = vadd.f32 %v3032_v8, %v4191_v47 }
  0xb8   : > { %v1664_v32 = vsub.f32 %v1650_v26, %v3399_v5  ;;  %v3400_v58 = vld [vmem:[%s6323_s4 + $0xa0] sm:$0xff]  ;;  %v3401_v54 = vld [vmem:[%s6323_s4 + $0xb0] sm:$0xff]  ;;  %v1302_v26 = vrot.slane %v4889_v11, 1  ;;  %v1732_v39 = vadd.f32 %v3030_v27, %v4191_v47  ;;  %v1736_v37 = vadd.f32 %v3034_v10, %v4191_v47 }
  0xb9   : > { %v1666_v48 = vsub.f32 %v1652_v36, %v3400_v58  ;;  %v1668_v34 = vsub.f32 %v1654_v38, %v3401_v54  ;;  %v3038_v5 = vld [vmem:[%s3738_s12 + $0x3d0] sm:$0xff]  ;;  %v1738_v9 = vadd.f32 %v3036_v23, %v4191_v47  ;;  %v1613_v57 = vmul.f32 %v4810_v30, %v1588_v18  ;;  %v3403_v27 = vld [vmem:[%s6323_s4 + $0xc0] sm:$0xff] }
  0xba   : > { %v3402_v36 = vld [vmem:[%s6323_s4 + $0xd0] sm:$0x1]  ;;  %v1685_v20 = vmul.f32 %v1678_v42, %v1660_v50  ;;  %v1742_v8 = vadd.f32 %v3040_v0, %v4191_v47  ;;  %v1670_v10 = vsub.f32 %v1656_v25, %v3403_v27  ;;  %v1687_v54 = vmul.f32 %v1678_v42, %v1662_v63  ;;  %v2085_v27 = vld [vmem:[%s4968_s22 + $0x8] sm:$0xff] }
  0xbb   : > { %v1672_v58 = vsub.f32 %v1658_v59, %v3402_v36  ;;  %v4950_v38 = vld [vmem:[%s3812_s26 + $0x10] ss:$8 sm:$0x3]  ;;  %v1689_v23 = vmul.f32 %v1678_v42, %v1664_v32  ;;  %v1744_v30 = vsub.f32 %v1730_v43, %v4228_v12  ;;  %v1691_v18 = vmul.f32 %v1678_v42, %v1666_v48 }
  0xbc   : > { %v1693_v31 = vmul.f32 %v1678_v42, %v1668_v34  ;;  %v1740_v59 = vadd.f32 %v3038_v5, %v4191_v47  ;;  %v6593_v50 = vld [vmem:[#allocation43_spill] sm:$0xff]  ;;  %v1746_v19 = vsub.f32 %v1732_v39, %v6541_v49  ;;  %v1750_v0 = vsub.f32 %v1736_v37, %v4281_v14  ;;  %v3018_v37 = vld [vmem:[%s3738_s12 + $0x338] sm:$0xff] }
  0xbd   : > { %v1748_v36 = vsub.f32 %v1734_v52, %v6593_v50  ;;  %v1752_v24 = vsub.f32 %v1738_v9, %v6543_v33  ;;  %v1762_v63 = vrot.slane %v4950_v38, %v3689_v61  ;;  %v6594_v47 = vsub.f32 %v4770_v44, %v4845_v3  ;;  %v3020_v44 = vld [vmem:[%s3738_s12 + $0x348] sm:$0xff]  ;;  %v2086_v48 = vld [vmem:[%s4968_s22 + $0x10] sm:$0x1] }
  0xbe   : > { %v1697_v52 = vmul.f32 %v1678_v42, %v1672_v58  ;;  %v1699_v49 = vadd.f32 %v1685_v20, %v4865_v40  ;;  %v1756_v14 = vsub.f32 %v1742_v8, %v4314_v41  ;;  %v4979_v33 = vmax.f32 %v4876_v56, %v1289_v29 }
  0xbf   : > { %v4974_v12 = vmul.f32 %v4813_v51, %v6594_v47  ;;  %v1695_v9 = vmul.f32 %v1678_v42, %v1670_v10  ;;  %v1703_v32 = vadd.f32 %v1689_v23, %v4879_v4  ;;  %v1769_v25 = vmul.f32 %v1762_v63, %v1744_v30  ;;  %v2087_v42 = vld [vmem:[%s4968_s22 + $0x18] sm:$0x1]  ;;  %v2084_v10 = vld [vmem:[%s4968_s22] sm:$0xff]  ;;  %s5373_s22 = scalar_lea.vmem %s6324_s5, %s3187_s20 }
  0xc0   : > { %v1701_v51 = vadd.f32 %v1687_v54, %v4871_v15  ;;  %v1705_v3 = vadd.f32 %v1691_v18, %v4892_v13  ;;  %v1754_v20 = vsub.f32 %v1740_v59, %v4329_v55  ;;  %v1773_v41 = vmul.f32 %v1762_v63, %v1748_v36  ;;  %v3022_v4 = vld [vmem:[%s3738_s12 + $0x358] sm:$0xff] }
  0xc1   : > { %v1707_v40 = vadd.f32 %v1693_v31, %v4902_v6  ;;  %v1771_v56 = vmul.f32 %v1762_v63, %v1746_v19  ;;  %v1775_v29 = vmul.f32 %v1762_v63, %v1750_v0  ;;  %v1777_v43 = vmul.f32 %v1762_v63, %v1752_v24  ;;  %v3024_v19 = vld [vmem:[%s3738_s12 + $0x368] sm:$0xff]  ;;  %v3026_v31 = vld [vmem:[%s3738_s12 + $0x378] sm:$0x1] }
  0xc2   : > { %v4992_v34 = vadd.f32 %v3018_v37, %v6589_v22  ;;  %v1711_v15 = vadd.f32 %v1697_v52, %v1613_v57  ;;  %v1781_v13 = vmul.f32 %v1762_v63, %v1756_v14  ;;  %v4994_v5 = vadd.f32 %v1769_v25, %v1699_v49  ;;  %v3029_v37 = vld [vmem:[%s3738_s12 + $0x388] sm:$0xff] }
  0xc3   : > { %v4997_v55 = vmax.f32 %v4889_v11, %v1302_v26  ;;  %v1304_v6 = vsub.f32 %v4618_v1, %v4979_v33  ;;  %v1653_v24 = vadd.f32 %v3020_v44, %v6589_v22  ;;  %v5004_v39 = vadd.f32 %v1773_v41, %v1703_v32  ;;  %v3407_v41 = vld [vmem:[%s6323_s4 + $0xa8] sm:$0xff] }
  0xc4   : > { %v1709_v58 = vadd.f32 %v1695_v9, %v4908_v16  ;;  %v1779_v8 = vmul.f32 %v1762_v63, %v1754_v20  ;;  %v2096_v57 = vsel %vm763_vm0, %v2087_v42, 0.0  ;;  %v2088_v54 = vsel %vm763_vm0, %v2086_v48, 0.0  ;;  %v3033_v9 = vld [vmem:[%s3738_s12 + $0x3a8] sm:$0xff]  ;;  %v3031_v48 = vld [vmem:[%s3738_s12 + $0x398] sm:$0xff] }
  0xc5   : > { %v5012_v11 = vadd.f32 %v3022_v4, %v6589_v22  ;;  %v5014_v26 = vadd.f32 %v1771_v56, %v1701_v51  ;;  %v5016_v1 = vadd.f32 %v1775_v29, %v1705_v3  ;;  %v5018_v23 = vadd.f32 %v1777_v43, %v1707_v40  ;;  %v3409_v43 = vld [vmem:[%s6323_s4 + $0xc8] sm:$0xff] }
  0xc6   : > { %v5021_v16 = vadd.f32 %v3024_v19, %v6589_v22  ;;  %v5024_v30 = vadd.f32 %v3026_v31, %v6589_v22  ;;  %v5026_v18 = vadd.f32 %v1781_v13, %v1711_v15  ;;  %v1797_v59 = vmax.f32 %v4994_v5, %v5004_v39  ;;  %v3404_v22 = vld [vmem:[%s6323_s4 + $0x78] sm:$0xff]  ;;  %v3037_v31 = vld [vmem:[%s3738_s12 + $0x3c8] sm:$0xff] }
  0xc7   : > { %v1306_v50 = vsub.f32 %v4635_v21, %v4979_v33  ;;  %v1308_v36 = vsub.f32 %v4620_v7, %v4979_v33  ;;  %v2097_v0 = vadd.f32 %v2096_v57, %v2085_v27  ;;  %v2089_v63 = vadd.f32 %v2088_v54, %v2084_v10  ;;  %v3410_v15 = vld [vmem:[%s6323_s4 + $0xd8] sm:$0x1] }
  0xc8   : > { %v5034_v47 = vmul.f32 1.442695, %v1304_v6  ;;  %v1661_v52 = vsub.f32 %v4856_v35, %v3404_v22  ;;  %v5042_v49 = vrot.slane %v4885_v53, %v3691_v62  ;;  %v5044_v14 = vadd.f32 %v1779_v8, %v1709_v58  ;;  %v3405_v35 = vld [vmem:[%s6323_s4 + $0x88] sm:$0xff]  ;;  %v3406_v53 = vld [vmem:[%s6323_s4 + $0x98] sm:$0xff] }
  0xc9   : > { %v1798_v32 = vmax.f32 %v5014_v26, %v5016_v1  ;;  %v1799_v25 = vmax.f32 %v1797_v59, %v5018_v23  ;;  %v2098_v44 = vrot.slane %v2097_v0, 4  ;;  %v2090_v51 = vrot.slane %v2089_v63, 4  ;;  %v3035_v19 = vld [vmem:[%s3738_s12 + $0x3b8] sm:$0xff]  ;;  %v3041_v8 = vld [vmem:[%s3738_s12 + $0x3e8] sm:$0x1] }
  0xca   : > { %v1663_v3 = vsub.f32 %v4860_v17, %v3405_v35  ;;  %v1665_v20 = vsub.f32 %v4992_v34, %v3406_v53  ;;  %v1667_v40 = vsub.f32 %v1653_v24, %v3407_v41  ;;  %v1801_v56 = vsel %vm763_vm0, %v5026_v18, -inf  ;;  %v3408_v17 = vld [vmem:[%s6323_s4 + $0xb8] sm:$0xff] }
  0xcb   : > { %v1669_v29 = vsub.f32 %v5012_v11, %v3408_v17  ;;  %v1671_v42 = vsub.f32 %v5021_v16, %v3409_v43  ;;  %v2099_v4 = vadd.f32 %v2098_v44, %v2097_v0  ;;  %v2091_v34 = vadd.f32 %v2090_v51, %v2089_v63  ;;  %v3039_v0 = vld [vmem:[%s3738_s12 + $0x3d8] sm:$0xff]  ;;  %v3412_v44 = vld [vmem:[%s6323_s4 + $0x108] sm:$0xff] }
  0xcc   : > { %v1673_v13 = vsub.f32 %v5024_v30, %v3410_v15  ;;  %v1686_v6 = vmul.f32 %v5042_v49, %v1661_v52  ;;  %v1731_v24 = vadd.f32 %v3029_v37, %v4194_v45  ;;  %v1735_v58 = vadd.f32 %v3033_v9, %v4194_v45  ;;  %v6608_v7 = vld [vmem:[#allocation36_spill] sm:$0xff] }
  0xcd   : > { %v1800_v27 = vmax.f32 %v1798_v32, %v5044_v14  ;;  %v1802_v57 = vmax.f32 %v1799_v25, %v1801_v56  ;;  %v2100_v10 = vrot.slane %v2099_v4, 2  ;;  %v2092_v54 = vrot.slane %v2091_v34, 2  ;;  %v3411_v32 = vld [vmem:[%s6323_s4 + $0xe8] sm:$0xff] }
  0xce   : > { %v1688_v11 = vmul.f32 %v5042_v49, %v1663_v3  ;;  %v1690_v16 = vmul.f32 %v5042_v49, %v1665_v20  ;;  %v1692_v30 = vmul.f32 %v5042_v49, %v1667_v40  ;;  %v1733_v59 = vadd.f32 %v3031_v48, %v4194_v45  ;;  %v3413_v48 = vld [vmem:[%s6323_s4 + $0xf8] sm:$0xff] }
  0xcf   : > { %v1737_v63 = vadd.f32 %v3035_v19, %v4194_v45  ;;  %v1739_v22 = vadd.f32 %v3037_v31, %v4194_v45  ;;  %v2101_v52 = vadd.f32 %v2100_v10, %v2099_v4  ;;  %v2093_v37 = vadd.f32 %v2092_v54, %v2091_v34 }
  0xd0   : > { %v1743_v9 = vadd.f32 %v3041_v8, %v4194_v45  ;;  %v1745_v25 = vsub.f32 %v1731_v24, %v3411_v32  ;;  %v1749_v51 = vsub.f32 %v1735_v58, %v3412_v44  ;;  %v1766_v35 = vrot.slane %v4950_v38, %v3691_v62  ;;  %v3414_v62 = vld [vmem:[%s6323_s4 + $0x118] sm:$0xff] }
  0xd1   : > { %v1694_v3 = vmul.f32 %v5042_v49, %v1669_v29  ;;  %v1803_v53 = vmax.f32 %v1802_v57, %v1800_v27  ;;  %v2102_v20 = vrot.slane %v2101_v52, 1  ;;  %v2094_v41 = vrot.slane %v2093_v37, 1  ;;  %v6595_v57 = vld [vmem:[#allocation45_spill] sm:$0xff] }
  0xd2   : > { %v1698_v40 = vmul.f32 %v5042_v49, %v1673_v13  ;;  %v1700_v56 = vadd.f32 %v1686_v6, %v4868_v28  ;;  %v1704_v17 = vadd.f32 %v1690_v16, %v4882_v2  ;;  %v1741_v43 = vadd.f32 %v3039_v0, %v4194_v45  ;;  %v3415_v28 = vld [vmem:[%s6323_s4 + $0x128] sm:$0xff] }
  0xd3   : > { %v1747_v4 = vsub.f32 %v1733_v59, %v3413_v48  ;;  %v1751_v38 = vsub.f32 %v1737_v63, %v3414_v62  ;;  %v2103_v29 = vadd.f32 %v2102_v20, %v2101_v52  ;;  %v2095_v34 = vadd.f32 %v2094_v41, %v2093_v37  ;;  %v3416_v45 = vld [vmem:[%s6323_s4 + $0x148] sm:$0x1]  ;;  %v6600_v37 = vld [vmem:[#allocation11_spill] sm:$0xff] }
  0xd4   : > { %v1753_v2 = vsub.f32 %v1739_v22, %v3415_v28  ;;  %v1757_v15 = vsub.f32 %v1743_v9, %v3416_v45  ;;  %v1770_v13 = vmul.f32 %v1766_v35, %v1745_v25  ;;  %v1774_v6 = vmul.f32 %v1766_v35, %v1749_v51  ;;  %v6598_v22 = vld [vmem:[#allocation32_spill] sm:$0xff]  ;;  %v6599_v52 = vld [vmem:[#allocation50_spill] sm:$0xff]  ;;  %v6603_v20 = vld [vmem:[#allocation15_spill] sm:$0xff] }
  0xd5   : > { %v1696_v19 = vmul.f32 %v5042_v49, %v1671_v42  ;;  %v1804_v31 = vrot.slane %v1803_v53, 4  ;;  %v2105_v24 = vmax.f32 %v2103_v29, 0.0  ;;  %v2104_v58 = vmax.f32 %v2095_v34, 0.0  ;;  %v3417_v49 = vld [vmem:[%s6323_s4 + $0x138] sm:$0xff]  ;;  %v860_v29 = vld [vmem:[%s5127_s18 + $0x20] sm:$0xff]  ;;  %v6609_v28 = vld [vmem:[#allocation14_spill] sm:$0xff] }
  0xd6   : > { %v1702_v8 = vadd.f32 %v1688_v11, %v4874_v60  ;;  %v1706_v27 = vadd.f32 %v1692_v30, %v4899_v46  ;;  %v1708_v10 = vadd.f32 %v1694_v3, %v6595_v57  ;;  %v1712_v54 = vadd.f32 %v1698_v40, %v4974_v12  ;;  %v6596_v60 = vld [vmem:[#allocation31_spill] sm:$0xff]  ;;  %v6597_v46 = vld [vmem:[#allocation34_spill] sm:$0xff]  ;;  %v6602_v51 = vld [vmem:[#allocation12_spill] sm:$0xff] }
  0xd7   : > { %v1755_v42 = vsub.f32 %v1741_v43, %v3417_v49  ;;  %v1772_v16 = vmul.f32 %v1766_v35, %v1747_v4  ;;  %v1776_v59 = vmul.f32 %v1766_v35, %v1751_v38  ;;  %2234 = vmatprep.mubr.f32.mxu0 %v2105_v24  ;;  %v828_v11 = vadd.f32 %v6597_v46, %v6596_v60  ;;  %v6604_v43 = vld [vmem:[#allocation46_spill] sm:$0xff]  ;;  %v6610_v45 = vld [vmem:[#allocation16_spill] sm:$0xff] }
  0xd8   : > { %v1778_v12 = vmul.f32 %v1766_v35, %v1753_v2  ;;  %v1782_v30 = vmul.f32 %v1766_v35, %v1757_v15  ;;  %v5134_v0 = vadd.f32 %v1770_v13, %v1700_v56  ;;  %v5136_v63 = vadd.f32 %v1774_v6, %v1704_v17  ;;  %2235 = vmatmul.mubr.f32.vlgmr.msra.gmra.mrb[0].mxu0 %v2104_v58  ;;  %v856_v56 = vld [vmem:[%s5127_s18] sm:$0xff]  ;;  %v858_v17 = vld [vmem:[%s5127_s18 + $0x10] sm:$0xff]  ;;  %v6612_v57 = vld [vmem:[#allocation38_spill] sm:$0xff] }
  0xd9   : > { %3231 = vpow2.f32 %v6598_v22  ;;  %v6601_v9 = vsub.f32 %v6599_v52, %v6600_v37  ;;  %v1322_v25 = vmul.f32 1.442695, %v1306_v50  ;;  %v1805_v44 = vmax.f32 %v1803_v53, %v1804_v31  ;;  %v2882_v6 = vld [vmem:[%s5127_s18 + $0x70] sm:$0xff]  ;;  %v6614_v22 = vld [vmem:[#allocation17_spill] sm:$0xff] }
  0xda   : > { %v1305_v3 = vsub.f32 %v6602_v51, %v4997_v55  ;;  %v1310_v41 = vsub.f32 %v6603_v20, %v4979_v33  ;;  %3233 = vpow2.f32 %v5034_v47  ;;  %v1326_v40 = vmul.f32 1.442695, %v1308_v36  ;;  %v6616_v51 = vld [vmem:[#allocation19_spill] sm:$0xff] }
  0xdb   : > { %v826_v32 = vmul.f32 1.442695, %v6601_v9  ;;  %v1710_v48 = vadd.f32 %v1696_v19, %v6604_v43  ;;  %v1780_v21 = vmul.f32 %v1766_v35, %v1755_v42  ;;  %v5156_v50 = vadd.f32 %v1772_v16, %v1702_v8  ;;  %v2884_v19 = vld [vmem:[%s5127_s18 + $0x80] sm:$0xff]  ;;  %v862_v42 = vld [vmem:[%s5127_s18 + $0x30] sm:$0xff] }
  0xdc   : > { %v5158_v53 = vadd.f32 %v1776_v59, %v1706_v27  ;;  %v5160_v4 = vadd.f32 %v1778_v12, %v1708_v10  ;;  %v5162_v62 = vadd.f32 %v1782_v30, %v1712_v54  ;;  %v1810_v47 = vmax.f32 %v5134_v0, %v5136_v63  ;;  %v6613_v12 = vld [vmem:[#allocation13_spill] sm:$0xff]  ;;  %v2886_v9 = vld [vmem:[%s5127_s18 + $0x90] sm:$0xff] }
  0xdd   : > { %v829_v36 = vadd.f32 %v6608_v7, %v828_v11  ;;  %3235 = vpow2.f32 %v1322_v25  ;;  %v1806_v38 = vrot.slane %v1805_v44, 2  ;;  %v870_v35 = vmul.f32 %v6596_v60, %v856_v56  ;;  %v6615_v25 = vld [vmem:[#allocation21_spill] sm:$0xff] }
  0xde   : > { %6605 = vst [vmem:[#allocation6_spill] sm:$0xff] %v5158_v53  ;;  %6606 = vst [vmem:[#allocation47_spill] sm:$0xff] %v5160_v4  ;;  %v872_v34 = vmul.f32 %v6597_v46, %v858_v17  ;;  %3237 = vpow2.f32 %v826_v32  ;;  %v1307_v2 = vsub.f32 %v6609_v28, %v4997_v55  ;;  %v1312_v15 = vsub.f32 %v6610_v45, %v4979_v33  ;;  %v6617_v17 = vld [vmem:[#allocation40_spill] sm:$0xff]  ;;  %v2888_v45 = vld [vmem:[%s5127_s18 + $0xa0] sm:$0xff] }
  0xdf   : > { %6607 = vst [vmem:[#allocation8_spill] sm:$0xff] %v5162_v62  ;;  %v1320_v13 = vmul.f32 1.442695, %v1305_v3  ;;  %3239 = vpow2.f32 %v1326_v40  ;;  %v1330_v31 = vmul.f32 1.442695, %v1310_v41  ;;  %v5176_v24 = vadd.f32 %v1780_v21, %v1710_v48 }
  0xe0   : > { %v1811_v58 = vmax.f32 %v5156_v50, %v5158_v53  ;;  %v1812_v8 = vmax.f32 %v1810_v47, %v5160_v4  ;;  %v1814_v27 = vsel %vm763_vm0, %v5162_v62, -inf  ;;  %v830_v10 = vadd.f32 %v6612_v57, %v829_v36  ;;  %v864_v47 = vld [vmem:[%s5127_s18 + $0x40] sm:$0xff] }
  0xe1   : > { %6611 = vst [vmem:[#allocation28_spill] sm:$0xff] %v5176_v24  ;;  %v874_v54 = vmul.f32 %v6608_v7, %v860_v29  ;;  %v1807_v49 = vmax.f32 %v1805_v44, %v1806_v38  ;;  %v884_v16 = vadd.f32 %v872_v34, %v870_v35  ;;  %v927_v59 = vmul.f32 %v6596_v60, %v2882_v6  ;;  %v6618_v29 = vld [vmem:[#allocation18_spill] sm:$0xff]  ;;  %v3074_v62 = vld [vmem:[%s5127_s18 + $0x3a0] sm:$0xff] }
  0xe2   : > { %v929_v11 = vmul.f32 %v6597_v46, %v2884_v19  ;;  %v1309_v30 = vsub.f32 %v6613_v12, %v4997_v55  ;;  %v1311_v52 = vsub.f32 %v6614_v22, %v4997_v55  ;;  %3241 = vpow2.f32 %v1320_v13  ;;  %v6619_v34 = vld [vmem:[#allocation22_spill] sm:$0xff]  ;;  %v2898_v13 = vld [vmem:[%s5127_s18 + $0xf0] sm:$0xff]  ;;  %v3078_v4 = vld [vmem:[%s5127_s18 + $0x3c0] sm:$0xff] }
  0xe3   : > { %v1324_v37 = vmul.f32 1.442695, %v1307_v2  ;;  %v5193_v32 = vpop.eup %3231  ;;  %v1314_v44 = vsub.f32 %v6615_v25, %v4979_v33  ;;  %v1316_v3 = vsub.f32 %v6616_v51, %v4979_v33  ;;  %3243 = vpow2.f32 %v1330_v31 }
  0xe4   : > { %v1334_v20 = vmul.f32 1.442695, %v1312_v15  ;;  %v5199_v41 = vpop.eup %3233  ;;  %v1813_v40 = vmax.f32 %v1811_v58, %v5176_v24  ;;  %v1815_v56 = vmax.f32 %v1812_v8, %v1814_v27  ;;  %v831_v43 = vadd.f32 %v6617_v17, %v830_v10  ;;  %v2896_v15 = vld [vmem:[%s5127_s18 + $0xe0] sm:$0xff]  ;;  %v6620_v10 = vld [vmem:[#allocation42_spill] sm:$0xff] }
  0xe5   : > { %v876_v48 = vmul.f32 %v6612_v57, %v862_v42  ;;  %v1808_v21 = vrot.slane %v1807_v49, 1  ;;  %v885_v36 = vadd.f32 %v884_v16, %v874_v54  ;;  %v931_v38 = vmul.f32 %v6608_v7, %v2886_v9  ;;  %v868_v16 = vld [vmem:[%s5127_s18 + $0x60] sm:$0x1]  ;;  %v2890_v9 = vld [vmem:[%s5127_s18 + $0xb0] sm:$0xff] }
  0xe6   : > { %v941_v33 = vadd.f32 %v929_v11, %v927_v59  ;;  %v1313_v35 = vsub.f32 %v6618_v29, %v4997_v55  ;;  %v1315_v28 = vsub.f32 %v6619_v34, %v4997_v55  ;;  %3245 = vpow2.f32 %v1324_v37  ;;  %v5506_v24 = vld [vmem:[%s5373_s22 + $0x100] sm:$0xff] }
  0xe7   : > { %v1328_v2 = vmul.f32 1.442695, %v1309_v30  ;;  %v5213_v6 = vpop.eup %3235  ;;  %v1332_v19 = vmul.f32 1.442695, %v1311_v52  ;;  %3247 = vpow2.f32 %v1334_v20  ;;  %v1338_v31 = vmul.f32 1.442695, %v1314_v44 }
  0xe8   : > { %v1342_v58 = vmul.f32 1.442695, %v1316_v3  ;;  %v5215_v8 = vpop.eup %3237  ;;  %v1816_v27 = vmax.f32 %v1815_v56, %v1813_v40  ;;  %v832_v54 = vadd.f32 %v6620_v10, %v831_v43  ;;  %v833_v42 = vsel %vm763_vm0, %v5193_v32, 0.0  ;;  %v866_v30 = vld [vmem:[%s5127_s18 + $0x50] sm:$0xff]  ;;  %v6621_v3 = vld [vmem:[#allocation20_spill] sm:$0xff]  ;;  %v2900_v56 = vld [vmem:[%s5127_s18 + $0x100] sm:$0xff] }
  0xe9   : > { %v878_v59 = vmul.f32 %v6617_v17, %v864_v47  ;;  %v5222_v11 = vpop.eup %3239  ;;  %v5224_v12 = vmax.f32 %v1807_v49, %v1808_v21  ;;  %v886_v22 = vadd.f32 %v885_v36, %v876_v48  ;;  %v933_v52 = vmul.f32 %v6612_v57, %v2888_v45  ;;  %v2892_v36 = vld [vmem:[%s5127_s18 + $0xc0] sm:$0xff] }
  0xea   : > { %v942_v37 = vadd.f32 %v941_v33, %v931_v38  ;;  %3249 = vpow2.f32 %v1328_v2  ;;  %v984_v25 = vmul.f32 %v6596_v60, %v2896_v15  ;;  %v986_v44 = vmul.f32 %v6597_v46, %v2898_v13  ;;  %v2894_v38 = vld [vmem:[%s5127_s18 + $0xd0] sm:$0x1] }
  0xeb   : > { %v1346_v51 = vadd.f32 %v5213_v6, %v5199_v41  ;;  %v1317_v49 = vsub.f32 %v6621_v3, %v4997_v55  ;;  %3251 = vpow2.f32 %v1332_v19  ;;  %v1336_v20 = vmul.f32 1.442695, %v1313_v35  ;;  %v2902_v35 = vld [vmem:[%s5127_s18 + $0x110] sm:$0xff] }
  0xec   : > { %v882_v40 = vmul.f32 %v5193_v32, %v868_v16  ;;  %v5237_v43 = vpop.eup %3241  ;;  %3253 = vpow2.f32 %v1338_v31  ;;  %v1817_v60 = vrot.slane %v1816_v27, 4  ;;  %v834_v48 = vadd.f32 %v833_v42, %v832_v54  ;;  %v2955_v19 = vld [vmem:[%s5127_s18 + $0x150] sm:$0xff]  ;;  %v2957_v31 = vld [vmem:[%s5127_s18 + $0x160] sm:$0xff] }
  0xed   : > { %v880_v46 = vmul.f32 %v6620_v10, %v866_v30  ;;  %v5240_v21 = vpop.eup %3243  ;;  %v1823_v47 = vsub.f32 %v4994_v5, %v5224_v12  ;;  %v887_v55 = vadd.f32 %v886_v22, %v878_v59  ;;  %v935_v33 = vmul.f32 %v6617_v17, %v2890_v9 }
  0xee   : > { %v943_v29 = vadd.f32 %v942_v37, %v933_v52  ;;  %3255 = vpow2.f32 %v1342_v58  ;;  %v988_v34 = vmul.f32 %v6608_v7, %v2900_v56  ;;  %v998_v2 = vadd.f32 %v986_v44, %v984_v25  ;;  %v2904_v52 = vld [vmem:[%s5127_s18 + $0x120] sm:$0xff] }
  0xef   : > { %v1347_v45 = vadd.f32 %v5222_v11, %v1346_v51  ;;  %3257 = vpow2.f32 %v1336_v20  ;;  %v1340_v15 = vmul.f32 1.442695, %v1315_v28  ;;  %v1825_v5 = vsub.f32 %v5014_v26, %v5224_v12 }
  0xf0   : > { %v889_v13 = vsel %vm763_vm0, %v882_v40, 0.0  ;;  %v5255_v54 = vpop.eup %3245  ;;  %v1818_v42 = vmax.f32 %v1816_v27, %v1817_v60  ;;  %v835_v58 = vrot.slane %v834_v48, 4  ;;  %v937_v16 = vmul.f32 %v6620_v10, %v2892_v36 }
  0xf1   : > { %v939_v7 = vmul.f32 %v5193_v32, %v2894_v38  ;;  %v5259_v59 = vpop.eup %3247  ;;  %v1837_v30 = vmul.f32 1.442695, %v1823_v47  ;;  %v888_v28 = vadd.f32 %v887_v55, %v880_v46  ;;  %v944_v22 = vadd.f32 %v943_v29, %v935_v33  ;;  %v2969_v47 = vld [vmem:[%s5127_s18 + $0x1c0] sm:$0xff]  ;;  %v2906_v29 = vld [vmem:[%s5127_s18 + $0x130] sm:$0xff] }
  0xf2   : > { %v990_v26 = vmul.f32 %v6612_v57, %v2902_v35  ;;  %v999_v37 = vadd.f32 %v998_v2, %v988_v34  ;;  %v1348_v9 = vadd.f32 %v5240_v21, %v1347_v45  ;;  %v1389_v27 = vmul.f32 %v5199_v41, %v2955_v19  ;;  %v2959_v57 = vld [vmem:[%s5127_s18 + $0x170] sm:$0xff]  ;;  %v2908_v35 = vld [vmem:[%s5127_s18 + $0x140] sm:$0x1] }
  0xf3   : > { %v1391_v25 = vmul.f32 %v5213_v6, %v2957_v31  ;;  %3259 = vpow2.f32 %v1340_v15  ;;  %v5266_v44 = vmul.f32 1.442695, %v1317_v49  ;;  %v1827_v51 = vsub.f32 %v5004_v39, %v5224_v12  ;;  %v2971_v49 = vld [vmem:[%s5127_s18 + $0x1d0] sm:$0xff]  ;;  %v2961_v15 = vld [vmem:[%s5127_s18 + $0x180] sm:$0xff] }
  0xf4   : > { %v1841_v3 = vmul.f32 1.442695, %v1825_v5  ;;  %v5271_v20 = vpop.eup %3249  ;;  %v1819_v40 = vrot.slane %v1818_v42, 2  ;;  %v1829_v56 = vsub.f32 %v5016_v1, %v5224_v12  ;;  %v836_v60 = vadd.f32 %v835_v58, %v834_v48 }
  0xf5   : > { %6622 = vst [vmem:[#allocation25_spill] sm:$0xff] %v5271_v20  ;;  %v946_v46 = vsel %vm763_vm0, %v939_v7, 0.0  ;;  %v5278_v55 = vpop.eup %3251  ;;  %3261 = vpow2.f32 %v1837_v30  ;;  %v890_v39 = vadd.f32 %v889_v13, %v888_v28  ;;  %v945_v36 = vadd.f32 %v944_v22, %v937_v16  ;;  %v2973_v7 = vld [vmem:[%s5127_s18 + $0x1e0] sm:$0xff]  ;;  %v3080_v20 = vld [vmem:[%s5127_s18 + $0x3d0] sm:$0xff] }
  0xf6   : > { %6623 = vst [vmem:[#allocation29_spill] sm:$0xff] %v5278_v55  ;;  %v992_v38 = vmul.f32 %v6617_v17, %v2904_v52  ;;  %v5281_v33 = vpop.eup %3253  ;;  %v1000_v34 = vadd.f32 %v999_v37, %v990_v26  ;;  %v1349_v1 = vadd.f32 %v5259_v59, %v1348_v9  ;;  %v1393_v48 = vmul.f32 %v5222_v11, %v2959_v57 }
  0xf7   : > { %v1403_v2 = vadd.f32 %v1391_v25, %v1389_v27  ;;  %3263 = vpow2.f32 %v1841_v3  ;;  %v1845_v45 = vmul.f32 1.442695, %v1827_v51  ;;  %v1446_v5 = vmul.f32 %v5199_v41, %v2969_v47  ;;  %v2963_v25 = vld [vmem:[%s5127_s18 + $0x190] sm:$0xff]  ;;  %v2985_v47 = vld [vmem:[%s5127_s18 + $0x240] sm:$0xff] }
  0xf8   : > { %v1448_v13 = vmul.f32 %v5213_v6, %v2971_v49  ;;  %v5290_v19 = vpop.eup %3255  ;;  %v1820_v17 = vmax.f32 %v1818_v42, %v1819_v40  ;;  %v1831_v31 = vsub.f32 %v5018_v23, %v5224_v12  ;;  %v1849_v58 = vmul.f32 1.442695, %v1829_v56  ;;  %v2975_v56 = vld [vmem:[%s5127_s18 + $0x1f0] sm:$0xff] }
  0xf9   : > { %v837_v16 = vrot.slane %v836_v60, 2  ;;  %v5295_v30 = vpop.eup %3257  ;;  %v891_v28 = vrot.slane %v890_v39, 4  ;;  %v947_v22 = vadd.f32 %v946_v46, %v945_v36  ;;  %v994_v26 = vmul.f32 %v6620_v10, %v2906_v29  ;;  %v2983_v46 = vld [vmem:[%s5127_s18 + $0x230] sm:$0xff] }
  0xfa   : > { %6624 = vst [vmem:[#allocation30_spill] sm:$0xff] %v5295_v30  ;;  %v996_v52 = vmul.f32 %v5193_v32, %v2908_v35  ;;  %v1001_v37 = vadd.f32 %v1000_v34, %v992_v38  ;;  %v1350_v42 = vadd.f32 %v5281_v33, %v1349_v1  ;;  %v1395_v9 = vmul.f32 %v5240_v21, %v2961_v15  ;;  %v5473_v30 = vld [vmem:[%s5373_s22 + $0xd0] sm:$0x1] }
  0xfb   : > { %v1404_v23 = vadd.f32 %v1403_v2, %v1393_v48  ;;  %3265 = vpow2.f32 %v1845_v45  ;;  %v1351_v27 = vsel %vm763_vm0, %v5290_v19, 0.0  ;;  %v1450_v51 = vmul.f32 %v5222_v11, %v2973_v7 }
  0xfc   : > { %v1460_v3 = vadd.f32 %v1448_v13, %v1446_v5  ;;  %v1821_v57 = vrot.slane %v1820_v17, 1  ;;  %v1833_v10 = vsub.f32 %v5044_v14, %v5224_v12  ;;  %v1853_v32 = vmul.f32 1.442695, %v1831_v31 }
  0xfd   : > { %v838_v40 = vadd.f32 %v837_v16, %v836_v60  ;;  %v5310_v49 = vpop.eup %3259  ;;  %3267 = vpow2.f32 %v1849_v58  ;;  %v892_v36 = vadd.f32 %v891_v28, %v890_v39  ;;  %v948_v38 = vrot.slane %v947_v22, 4  ;;  %v2965_v60 = vld [vmem:[%s5127_s18 + $0x1a0] sm:$0xff]  ;;  %v2987_v16 = vld [vmem:[%s5127_s18 + $0x250] sm:$0xff] }
  0xfe   : > { %6625 = vst [vmem:[#allocation26_spill] sm:$0xff] %v5310_v49  ;;  %v1003_v29 = vsel %vm763_vm0, %v996_v52, 0.0  ;;  %v1002_v35 = vadd.f32 %v1001_v37, %v994_v26  ;;  %v1352_v34 = vadd.f32 %v1351_v27, %v1350_v42  ;;  %v1397_v1 = vmul.f32 %v5259_v59, %v2963_v25  ;;  %v2977_v58 = vld [vmem:[%s5127_s18 + $0x200] sm:$0xff]  ;;  %v2967_v26 = vld [vmem:[%s5127_s18 + $0x1b0] sm:$0x1] }
  0xff   : > { %v1405_v14 = vadd.f32 %v1404_v23, %v1395_v9  ;;  %v5314_v48 = vpop.eup %3261  ;;  %v1452_v2 = vmul.f32 %v5240_v21, %v2975_v56  ;;  %v1461_v45 = vadd.f32 %v1460_v3, %v1450_v51  ;;  %v1503_v15 = vmul.f32 %v5199_v41, %v2983_v46  ;;  %v3042_v42 = vld [vmem:[%s5127_s18 + $0x2a0] sm:$0xff] }
 0x100   : > { %v1505_v39 = vmul.f32 %v5213_v6, %v2985_v47  ;;  %3269 = vpow2.f32 %v5266_v44  ;;  %v5321_v5 = vmax.f32 %v1820_v17, %v1821_v57  ;;  %v1835_v13 = vsub.f32 %v5026_v18, %v5224_v12  ;;  %v3044_v18 = vld [vmem:[%s5127_s18 + $0x2b0] sm:$0xff]  ;;  %v2989_v3 = vld [vmem:[%s5127_s18 + $0x260] sm:$0xff] }
 0x101   : > { %v839_v31 = vrot.slane %v838_v40, 1  ;;  %v5327_v7 = vpop.eup %3263  ;;  %3271 = vpow2.f32 %v1853_v32  ;;  %v1857_v28 = vmul.f32 1.442695, %v1833_v10  ;;  %v893_v41 = vrot.slane %v892_v36, 2  ;;  %v2979_v12 = vld [vmem:[%s5127_s18 + $0x210] sm:$0xff] }
 0x102   : > { %v949_v6 = vadd.f32 %v948_v38, %v947_v22  ;;  %v1004_v44 = vadd.f32 %v1003_v29, %v1002_v35  ;;  %v1353_v52 = vrot.slane %v1352_v34, 4  ;;  %v1399_v17 = vmul.f32 %v5281_v33, %v2965_v60  ;;  %v2981_v47 = vld [vmem:[%s5127_s18 + $0x220] sm:$0x1] }
 0x103   : > { %v1406_v37 = vadd.f32 %v1405_v14, %v1397_v1  ;;  %v1454_v9 = vmul.f32 %v5259_v59, %v2977_v58  ;;  %v1462_v23 = vadd.f32 %v1461_v45, %v1452_v2  ;;  %v1507_v27 = vmul.f32 %v5222_v11, %v2987_v16  ;;  %v3046_v14 = vld [vmem:[%s5127_s18 + $0x2c0] sm:$0xff]  ;;  %v2991_v45 = vld [vmem:[%s5127_s18 + $0x270] sm:$0xff] }
 0x104   : > { %v1517_v25 = vadd.f32 %v1505_v39, %v1503_v15  ;;  %v840_v51 = vadd.f32 %v839_v31, %v838_v40  ;;  %v1401_v22 = vmul.f32 %v5290_v19, %v2967_v26  ;;  %v1861_v57 = vmul.f32 1.442695, %v1835_v13 }
 0x105   : > { %v1865_v10 = vadd.f32 %v5327_v7, %v5314_v48  ;;  %v5340_v32 = vpop.eup %3265  ;;  %v5342_v56 = vadd.f32 %v893_v41, %v892_v36  ;;  %v950_v46 = vrot.slane %v949_v6, 2  ;;  %v1908_v11 = vmul.f32 %v5314_v48, %v3042_v42 }
 0x106   : > { %v1910_v38 = vmul.f32 %v5327_v7, %v3044_v18  ;;  %v1005_v40 = vrot.slane %v1004_v44, 4  ;;  %v1354_v29 = vadd.f32 %v1353_v52, %v1352_v34  ;;  %v1407_v35 = vadd.f32 %v1406_v37, %v1399_v17  ;;  %v3048_v17 = vld [vmem:[%s5127_s18 + $0x2d0] sm:$0xff]  ;;  %v2993_v18 = vld [vmem:[%s5127_s18 + $0x280] sm:$0xff] }
 0x107   : > { %v1456_v1 = vmul.f32 %v5281_v33, %v2979_v12  ;;  %v5349_v60 = vpop.eup %3267  ;;  %v1463_v2 = vadd.f32 %v1462_v23, %v1454_v9  ;;  %v1509_v36 = vmul.f32 %v5240_v21, %v2989_v3  ;;  %v1518_v15 = vadd.f32 %v1517_v25, %v1507_v27  ;;  %v2995_v12 = vld [vmem:[%s5127_s18 + $0x290] sm:$0x1]  ;;  %v5445_v25 = vld [vmem:[%s5373_s22 + $0x80] sm:$0xff] }
 0x108   : > { %3273 = vpow2.f32 %v1857_v28  ;;  %v1408_v39 = vsel %vm763_vm0, %v1401_v22, 0.0  ;;  %v1458_v13 = vmul.f32 %v5290_v19, %v2981_v47  ;;  %v1866_v34 = vadd.f32 %v5340_v32, %v1865_v10  ;;  %v3050_v22 = vld [vmem:[%s5127_s18 + $0x2e0] sm:$0xff]  ;;  %v3056_v10 = vld [vmem:[%s5127_s18 + $0x310] sm:$0xff] }
 0x109   : > { %3275 = vpow2.f32 %v1861_v57  ;;  %v1824_v31 = vsub.f32 %v5134_v0, %v5321_v5  ;;  %v1826_v58 = vsub.f32 %v5156_v50, %v5321_v5  ;;  %v1912_v21 = vmul.f32 %v5340_v32, %v3046_v14  ;;  %v5448_v28 = vld [vmem:[%s5373_s22 + $0x90] sm:$0x1] }
 0x10a   : > { %v1922_v16 = vadd.f32 %v1910_v38, %v1908_v11  ;;  %v5362_v41 = vpop.eup %3269  ;;  %3277 = vrcp.f32 %v840_v51  ;;  %v1006_v26 = vadd.f32 %v1005_v40, %v1004_v44  ;;  %v1511_v52 = vmul.f32 %v5259_v59, %v2991_v45  ;;  %v3058_v38 = vld [vmem:[%s5127_s18 + $0x320] sm:$0xff]  ;;  %v5393_v40 = vld [vmem:[%s5373_s22 + $0x10] sm:$0x1] }
 0x10b   : > { %6626 = vst [vmem:[#allocation7_spill] sm:$0xff] %v5362_v41  ;;  %v5368_v37 = vpop.eup %3271  ;;  %v1355_v0 = vrot.slane %v1354_v29, 2  ;;  %v1409_v50 = vadd.f32 %v1408_v39, %v1407_v35  ;;  %v1464_v42 = vadd.f32 %v1463_v2, %v1456_v1  ;;  %v1519_v9 = vadd.f32 %v1518_v15, %v1509_v36  ;;  %v5396_v45 = vld [vmem:[%s5373_s22] sm:$0xff]  ;;  %v5402_v15 = vld [vmem:[%s5373_s22 + $0x30] sm:$0x1] }
 0x10c   : > { %v895_v59 = vrot.slane %v5342_v56, 1  ;;  %v951_v44 = vadd.f32 %v950_v46, %v949_v6  ;;  %v1465_v23 = vsel %vm763_vm0, %v1458_v13, 0.0  ;;  %v1867_v27 = vadd.f32 %v5349_v60, %v1866_v34  ;;  %v5399_v36 = vld [vmem:[%s5373_s22 + $0x20] sm:$0xff] }
 0x10d   : > { %v1914_v3 = vmul.f32 %v5349_v60, %v3048_v17  ;;  %v1923_v57 = vadd.f32 %v1922_v16, %v1912_v21  ;;  %v5387_v47 = vmul.f32 1.442695, %v1824_v31  ;;  %v1007_v6 = vrot.slane %v1006_v26, 2  ;;  %v3060_v21 = vld [vmem:[%s5127_s18 + $0x330] sm:$0xff] }
 0x10e   : > { %v1513_v46 = vmul.f32 %v5281_v33, %v2993_v18  ;;  %v1515_v11 = vmul.f32 %v5290_v19, %v2995_v12  ;;  %v1356_v35 = vadd.f32 %v1355_v0, %v1354_v29  ;;  %v1410_v1 = vrot.slane %v1409_v50, 4  ;;  %v5418_v17 = vld [vmem:[%s5373_s22 + $0x50] sm:$0x1]  ;;  %v3054_v12 = vld [vmem:[%s5127_s18 + $0x300] sm:$0x1] }
 0x10f   : > { %v1466_v14 = vadd.f32 %v1465_v23, %v1464_v42  ;;  %v1520_v2 = vadd.f32 %v1519_v9, %v1511_v52  ;;  %v5404_v33 = vmul.f32 1.442695, %v1826_v58  ;;  %v896_v19 = vadd.f32 %v895_v59, %v5342_v56  ;;  %v5415_v58 = vld [vmem:[%s5373_s22 + $0x40] sm:$0xff]  ;;  %v3052_v18 = vld [vmem:[%s5127_s18 + $0x2f0] sm:$0xff] }
 0x110   : > { %v952_v39 = vrot.slane %v951_v44, 1  ;;  %v1868_v29 = vadd.f32 %v5368_v37, %v1867_v27  ;;  %v1916_v34 = vmul.f32 %v5368_v37, %v3050_v22  ;;  %v1924_v31 = vadd.f32 %v1923_v57, %v1914_v3  ;;  %v5430_v57 = vld [vmem:[%s5373_s22 + $0x60] sm:$0xff] }
 0x111   : > { %6627 = vst [vmem:[#allocation27_spill] sm:$0xff] %v5404_v33  ;;  %v1965_v16 = vmul.f32 %v5314_v48, %v3056_v10  ;;  %v1967_v52 = vmul.f32 %v5327_v7, %v3058_v38  ;;  %v1008_v0 = vadd.f32 %v1007_v6, %v1006_v26  ;;  %v1522_v42 = vsel %vm763_vm0, %v1515_v11, 0.0  ;;  %v5433_v26 = vld [vmem:[%s5373_s22 + $0x70] sm:$0x1] }
 0x112   : > { %v5408_v13 = vpop.eup %3273  ;;  %v2250_v9 = vmax.f32 %v5396_v45, %v5399_v36  ;;  %v2252_v59 = vmax.f32 %v5393_v40, %v5402_v15  ;;  %v1357_v23 = vrot.slane %v1356_v35, 1  ;;  %v1411_v27 = vadd.f32 %v1410_v1, %v1409_v50  ;;  %v5514_v33 = vld [vmem:[%s5373_s22 + $0x110] sm:$0x1] }
 0x113   : > { %v5420_v56 = vpop.eup %3275  ;;  %v1467_v22 = vrot.slane %v1466_v14, 4  ;;  %v1521_v3 = vadd.f32 %v1520_v2, %v1513_v46  ;;  %v1869_v6 = vadd.f32 %v5408_v13, %v1868_v29  ;;  %v1969_v11 = vmul.f32 %v5340_v32, %v3060_v21 }
 0x114   : > { %v5435_v10 = vpop.eup %3277  ;;  %v2259_v38 = vmax.f32 %v2250_v9, %v5415_v58  ;;  %v2261_v51 = vmax.f32 %v2252_v59, %v5418_v17  ;;  %v1870_v50 = vsel %vm763_vm0, %v5420_v56, 0.0  ;;  %v1918_v46 = vmul.f32 %v5408_v13, %v3052_v18  ;;  %v3062_v9 = vld [vmem:[%s5127_s18 + $0x340] sm:$0xff] }
 0x115   : > { %v1925_v1 = vadd.f32 %v1924_v31, %v1916_v34  ;;  %v1979_v2 = vadd.f32 %v1967_v52, %v1965_v16  ;;  %v953_v29 = vadd.f32 %v952_v39, %v951_v44  ;;  %v1920_v21 = vmul.f32 %v5420_v56, %v3054_v12  ;;  %v5455_v31 = vld [vmem:[%s5373_s22 + $0xa0] sm:$0xff]  ;;  %v5458_v16 = vld [vmem:[%s5373_s22 + $0xb0] sm:$0x1] }
 0x116   : > { %v2268_v59 = vmax.f32 %v2259_v38, %v5430_v57  ;;  %v2270_v61 = vmax.f32 %v2261_v51, %v5433_v26  ;;  %v1009_v49 = vrot.slane %v1008_v0, 1  ;;  %v1358_v41 = vadd.f32 %v1357_v23, %v1356_v35  ;;  %v3068_v35 = vld [vmem:[%s5127_s18 + $0x370] sm:$0x1] }
 0x117   : > { %v1412_v18 = vrot.slane %v1411_v27, 2  ;;  %v1523_v34 = vadd.f32 %v1522_v42, %v1521_v3  ;;  %v5461_v44 = vmul.f32 %v5435_v10, %v896_v19  ;;  %v1871_v39 = vadd.f32 %v1870_v50, %v1869_v6  ;;  %v5470_v3 = vld [vmem:[%s5373_s22 + $0xc0] sm:$0xff] }
 0x118   : > { %v2277_v52 = vmax.f32 %v2268_v59, %v5445_v25  ;;  %v2279_v51 = vmax.f32 %v2270_v61, %v5448_v28  ;;  %v5465_v12 = vadd.f32 %v1467_v22, %v1466_v14  ;;  %v1926_v38 = vadd.f32 %v1925_v1, %v1918_v46  ;;  %v3064_v14 = vld [vmem:[%s5127_s18 + $0x350] sm:$0xff]  ;;  %v3066_v22 = vld [vmem:[%s5127_s18 + $0x360] sm:$0xff] }
 0x119   : > { %v1971_v42 = vmul.f32 %v5349_v60, %v3062_v9  ;;  %v1980_v23 = vadd.f32 %v1979_v2, %v1969_v11  ;;  %v5476_v19 = vmul.f32 %v5435_v10, %v953_v29  ;;  %v1927_v61 = vsel %vm763_vm0, %v1920_v21, 0.0  ;;  %v3070_v2 = vld [vmem:[%s5127_s18 + $0x380] sm:$0xff]  ;;  %v3072_v29 = vld [vmem:[%s5127_s18 + $0x390] sm:$0xff] }
 0x11a   : > { %v2286_v6 = vmax.f32 %v2277_v52, %v5455_v31  ;;  %v2288_v50 = vmax.f32 %v2279_v51, %v5458_v16  ;;  %v5483_v46 = vadd.f32 %v1009_v49, %v1008_v0  ;;  %3279 = vrcp.f32 %v1358_v41  ;;  %v5490_v9 = vld [vmem:[%s5373_s22 + $0xe0] sm:$0xff]  ;;  %v3076_v52 = vld [vmem:[%s5127_s18 + $0x3b0] sm:$0xff] }
 0x11b   : > { %v5485_v11 = vadd.f32 %v1412_v18, %v1411_v27  ;;  %v1524_v1 = vrot.slane %v1523_v34, 4  ;;  %v1872_v21 = vrot.slane %v1871_v39, 4  ;;  %v1977_v59 = vmul.f32 %v5420_v56, %v3068_v35  ;;  %v5498_v0 = vld [vmem:[%s5373_s22 + $0xf0] sm:$0x1] }
 0x11c   : > { %v2295_v49 = vmax.f32 %v2286_v6, %v5470_v3  ;;  %v2297_v41 = vmax.f32 %v2288_v50, %v5473_v30  ;;  %v5501_v18 = vadd.f32 %v1927_v61, %v1926_v38  ;;  %v1973_v51 = vmul.f32 %v5368_v37, %v3064_v14  ;;  %v3082_v38 = vld [vmem:[%s5127_s18 + $0x3e0] sm:$0x1] }
 0x11d   : > { %v1981_v55 = vadd.f32 %v1980_v23, %v1971_v42  ;;  %v1975_v35 = vmul.f32 %v5408_v13, %v3066_v22  ;;  %v2022_v6 = vmul.f32 %v5314_v48, %v3070_v2  ;;  %v2024_v53 = vmul.f32 %v5327_v7, %v3072_v29 }
 0x11e   : > { %v2304_v50 = vmax.f32 %v2295_v49, %v5490_v9  ;;  %v5516_v27 = vadd.f32 %v1524_v1, %v1523_v34  ;;  %v2026_v61 = vmul.f32 %v5340_v32, %v3074_v62  ;;  %v2028_v42 = vmul.f32 %v5349_v60, %v3076_v52 }
 0x11f   : > { %v2306_v23 = vmax.f32 %v2297_v41, %v5498_v0  ;;  %v5522_v14 = vadd.f32 %v1872_v21, %v1871_v39  ;;  %v5525_v48 = vsel %vm763_vm0, %v1977_v59, 0.0  ;;  %v5528_v7 = vmul.f32 %v5368_v37, %v3078_v4  ;;  %v6629_v59 = vld [vmem:[#allocation35_spill] sm:$0xff] }
 0x120   : > { %v5531_v22 = vmax.f32 %v2304_v50, %v5506_v24  ;;  %v1929_v34 = vrot.slane %v5501_v18, 4  ;;  %v1982_v1 = vadd.f32 %v1981_v55, %v1973_v51  ;;  %v5535_v62 = vmul.f32 %v5408_v13, %v3080_v20 }
 0x121   : > { %v5538_v32 = vmax.f32 %v2306_v23, %v5514_v33  ;;  %v2034_v60 = vmul.f32 %v5420_v56, %v3082_v38  ;;  %v2036_v2 = vadd.f32 %v2024_v53, %v2022_v6  ;;  %v857_v56 = vld [vmem:[%s5127_s18 + $0x8] sm:$0xff]  ;;  %v859_v53 = vld [vmem:[%s5127_s18 + $0x18] sm:$0xff] }
 0x122   : > { %v2317_v39 = vsub.f32 %v5396_v45, %v5531_v22  ;;  %v2333_v4 = vsub.f32 %v5399_v36, %v5531_v22  ;;  %v2349_v37 = vsub.f32 %v5415_v58, %v5531_v22  ;;  %v2365_v45 = vsub.f32 %v5430_v57, %v5531_v22  ;;  %v6628_v36 = vld [vmem:[#allocation33_spill] sm:$0xff]  ;;  %v861_v38 = vld [vmem:[%s5127_s18 + $0x28] sm:$0xff] }
 0x123   : > { %v2319_v55 = vsub.f32 %v5393_v40, %v5538_v32  ;;  %v2335_v20 = vsub.f32 %v5402_v15, %v5538_v32  ;;  %v2351_v13 = vsub.f32 %v5418_v17, %v5538_v32  ;;  %v841_v58 = vadd.f32 %v6629_v59, %v6628_v36 }
 0x124   : > { %v2321_v29 = vmul.f32 1.442695, %v2317_v39  ;;  %v2337_v21 = vmul.f32 1.442695, %v2333_v4  ;;  %v5559_v52 = vpop.eup %3279  ;;  %v1874_v40 = vrot.slane %v5522_v14, 2  ;;  %v2367_v17 = vsub.f32 %v5433_v26, %v5538_v32  ;;  %v6630_v4 = vld [vmem:[#allocation37_spill] sm:$0xff] }
 0x125   : > { %v2325_v49 = vmul.f32 1.442695, %v2319_v55  ;;  %v2341_v15 = vmul.f32 1.442695, %v2335_v20  ;;  %v2353_v41 = vmul.f32 1.442695, %v2349_v37  ;;  %v2381_v51 = vsub.f32 %v5445_v25, %v5531_v22 }
 0x126   : > { %3281 = vpow2.f32 %v2321_v29  ;;  %v871_v57 = vmul.f32 %v6628_v36, %v857_v56  ;;  %v2357_v6 = vmul.f32 1.442695, %v2351_v13  ;;  %v2383_v50 = vsub.f32 %v5448_v28, %v5538_v32 }
 0x127   : > { %3283 = vpow2.f32 %v2325_v49  ;;  %v873_v23 = vmul.f32 %v6629_v59, %v859_v53  ;;  %v2369_v39 = vmul.f32 1.442695, %v2365_v45  ;;  %v2397_v26 = vsub.f32 %v5455_v31, %v5531_v22  ;;  %v2883_v45 = vld [vmem:[%s5127_s18 + $0x78] sm:$0xff] }
 0x128   : > { %3285 = vpow2.f32 %v2337_v21  ;;  %v842_v37 = vadd.f32 %v6630_v4, %v841_v58  ;;  %v2037_v25 = vadd.f32 %v2036_v2, %v2026_v61  ;;  %v2373_v55 = vmul.f32 1.442695, %v2367_v17  ;;  %v2885_v58 = vld [vmem:[%s5127_s18 + $0x88] sm:$0xff] }
 0x129   : > { %3287 = vpow2.f32 %v2341_v15  ;;  %v2399_v20 = vsub.f32 %v5458_v16, %v5538_v32  ;;  %v1983_v28 = vadd.f32 %v1982_v1, %v1975_v35  ;;  %v2385_v13 = vmul.f32 1.442695, %v2381_v51  ;;  %v6631_v16 = vld [vmem:[#allocation39_spill] sm:$0xff]  ;;  %v863_v1 = vld [vmem:[%s5127_s18 + $0x38] sm:$0xff] }
 0x12a   : > { %3289 = vpow2.f32 %v2353_v41  ;;  %v875_v56 = vmul.f32 %v6630_v4, %v861_v38  ;;  %v2389_v29 = vmul.f32 1.442695, %v2383_v50  ;;  %v2415_v21 = vsub.f32 %v5473_v30, %v5538_v32 }
 0x12b   : > { %3291 = vpow2.f32 %v2357_v6  ;;  %v897_v31 = vadd.f32 %v873_v23, %v871_v57  ;;  %v5582_v61 = vsel %vm763_vm0, %v2034_v60, 0.0  ;;  %v2401_v2 = vmul.f32 1.442695, %v2397_v26  ;;  %v2887_v57 = vld [vmem:[%s5127_s18 + $0x98] sm:$0xff]  ;;  %v865_v23 = vld [vmem:[%s5127_s18 + $0x48] sm:$0xff] }
 0x12c   : > { %3293 = vpow2.f32 %v2369_v39  ;;  %v843_v35 = vadd.f32 %v6631_v16, %v842_v37  ;;  %v2038_v53 = vadd.f32 %v2037_v25, %v2028_v42  ;;  %v2405_v49 = vmul.f32 1.442695, %v2399_v20 }
 0x12d   : > { %3295 = vpow2.f32 %v2373_v55  ;;  %v2413_v15 = vsub.f32 %v5470_v3, %v5531_v22  ;;  %v2431_v30 = vsub.f32 %v5498_v0, %v5538_v32  ;;  %v928_v60 = vmul.f32 %v6628_v36, %v2883_v45  ;;  %v6632_v0 = vld [vmem:[#allocation41_spill] sm:$0xff]  ;;  %v2889_v55 = vld [vmem:[%s5127_s18 + $0xa8] sm:$0xff]  ;;  %v867_v45 = vld [vmem:[%s5127_s18 + $0x58] sm:$0xff] }
 0x12e   : > { %3297 = vpow2.f32 %v2385_v13  ;;  %v930_v17 = vmul.f32 %v6629_v59, %v2885_v58  ;;  %v2421_v41 = vmul.f32 1.442695, %v2415_v21  ;;  %v877_v51 = vmul.f32 %v6631_v16, %v863_v1 }
 0x12f   : > { %3299 = vpow2.f32 %v2389_v29  ;;  %v898_v42 = vadd.f32 %v897_v31, %v875_v56  ;;  %v5597_v50 = vadd.f32 %v1874_v40, %v5522_v14  ;;  %v5600_v3 = vadd.f32 %v5525_v48, %v1983_v28 }
 0x130   : > { %v5594_v6 = vpop.eup %3281  ;;  %3301 = vpow2.f32 %v2401_v2  ;;  %v844_v38 = vadd.f32 %v6632_v0, %v843_v35  ;;  %v2039_v26 = vadd.f32 %v2038_v53, %v5528_v7  ;;  %v2417_v37 = vmul.f32 1.442695, %v2413_v15 }
 0x131   : > { %v5604_v39 = vpop.eup %3283  ;;  %3303 = vpow2.f32 %v2405_v49  ;;  %v2429_v25 = vsub.f32 %v5490_v9, %v5531_v22  ;;  %v2437_v40 = vmul.f32 1.442695, %v2431_v30  ;;  %v2447_v48 = vsub.f32 %v5514_v33, %v5538_v32  ;;  %v6633_v33 = vld [vmem:[#allocation44_spill] sm:$0xff]  ;;  %v869_v49 = vld [vmem:[%s5127_s18 + $0x68] sm:$0x1] }
 0x132   : > { %v5610_v14 = vpop.eup %3285  ;;  %v932_v20 = vmul.f32 %v6630_v4, %v2887_v57  ;;  %v954_v28 = vadd.f32 %v930_v17, %v928_v60  ;;  %3305 = vpow2.f32 %v2421_v41  ;;  %v879_v9 = vmul.f32 %v6632_v0, %v865_v23  ;;  %v2891_v17 = vld [vmem:[%s5127_s18 + $0xb8] sm:$0xff] }
 0x133   : > { %v5615_v13 = vpop.eup %3287  ;;  %v2345_v7 = vadd.f32 %v5610_v14, %v5594_v6  ;;  %v899_v56 = vadd.f32 %v898_v42, %v877_v51  ;;  %v845_v32 = vadd.f32 %v6633_v33, %v844_v38  ;;  %v846_v31 = vsel %vm763_vm0, %v5215_v8, 0.0 }
 0x134   : > { %v5620_v29 = vpop.eup %3289  ;;  %v2347_v21 = vadd.f32 %v5615_v13, %v5604_v39  ;;  %v934_v58 = vmul.f32 %v6631_v16, %v2889_v55  ;;  %3307 = vpow2.f32 %v2417_v37  ;;  %v2433_v1 = vmul.f32 1.442695, %v2429_v25 }
 0x135   : > { %v5629_v2 = vpop.eup %3291  ;;  %v2361_v35 = vadd.f32 %v5620_v29, %v2345_v7  ;;  %v2445_v53 = vsub.f32 %v5506_v24, %v5531_v22  ;;  %3309 = vpow2.f32 %v2437_v40  ;;  %v2453_v60 = vmul.f32 1.442695, %v2447_v48 }
 0x136   : > { %v5635_v15 = vpop.eup %3293  ;;  %v2363_v30 = vadd.f32 %v5629_v2, %v2347_v21  ;;  %v955_v41 = vadd.f32 %v954_v28, %v932_v20  ;;  %v1876_v42 = vrot.slane %v5597_v50, 1  ;;  %v881_v38 = vmul.f32 %v6633_v33, %v867_v45 }
 0x137   : > { %v5639_v51 = vpop.eup %3295  ;;  %v2377_v57 = vadd.f32 %v5635_v15, %v2361_v35  ;;  %v900_v23 = vadd.f32 %v899_v56, %v879_v9  ;;  %v1986_v24 = vrot.slane %v5600_v3, 4  ;;  %v2040_v22 = vadd.f32 %v2039_v26, %v5535_v62 }
 0x138   : > { %v5644_v37 = vpop.eup %3297  ;;  %v2379_v25 = vadd.f32 %v5639_v51, %v2363_v30  ;;  %v883_v55 = vmul.f32 %v5215_v8, %v869_v49  ;;  %3311 = vpow2.f32 %v2433_v1  ;;  %v2449_v48 = vmul.f32 1.442695, %v2445_v53  ;;  %v2893_v1 = vld [vmem:[%s5127_s18 + $0xc8] sm:$0xff] }
 0x139   : > { %v5650_v40 = vpop.eup %3299  ;;  %v847_v20 = vadd.f32 %v846_v31, %v845_v32  ;;  %v936_v28 = vmul.f32 %v6632_v0, %v2891_v17  ;;  %v2393_v9 = vadd.f32 %v5644_v37, %v2377_v57  ;;  %3313 = vpow2.f32 %v2453_v60  ;;  %v2895_v60 = vld [vmem:[%s5127_s18 + $0xd8] sm:$0x1] }
 0x13a   : > { %v5653_v7 = vpop.eup %3301  ;;  %v2395_v56 = vadd.f32 %v5650_v40, %v2379_v25  ;;  %v956_v62 = vadd.f32 %v955_v41, %v934_v58  ;;  %v1414_v21 = vrot.slane %v5485_v11, 1  ;;  %v6634_v45 = vrot.slane %v5465_v12, 2 }
 0x13b   : > { %v5657_v26 = vpop.eup %3303  ;;  %v1930_v32 = vadd.f32 %v1929_v34, %v5501_v18  ;;  %v901_v31 = vadd.f32 %v900_v23, %v881_v38  ;;  %v1526_v53 = vrot.slane %v5516_v27, 2  ;;  %v1877_v49 = vadd.f32 %v1876_v42, %v5597_v50 }
 0x13c   : > { %v1470_v35 = vadd.f32 %v6634_v45, %v5465_v12  ;;  %v2411_v58 = vadd.f32 %v5657_v26, %v2395_v56  ;;  %v902_v30 = vsel %vm763_vm0, %v883_v55, 0.0  ;;  %v5672_v17 = vpop.eup %3305  ;;  %v1987_v12 = vadd.f32 %v1986_v24, %v5600_v3  ;;  %v2897_v24 = vld [vmem:[%s5127_s18 + $0xe8] sm:$0xff] }
 0x13d   : > { %v2042_v41 = vadd.f32 %v5582_v61, %v2040_v22  ;;  %3315 = vpow2.f32 %v2449_v48  ;;  %v848_v18 = vrot.slane %v847_v20, 4  ;;  %v1024_v34 = vmul.f32 %v5435_v10, %v5483_v46  ;;  %v2899_v61 = vld [vmem:[%s5127_s18 + $0xf8] sm:$0xff] }
 0x13e   : > { %v2409_v50 = vadd.f32 %v5653_v7, %v2393_v9  ;;  %v938_v42 = vmul.f32 %v6633_v33, %v2893_v1  ;;  %v957_v57 = vadd.f32 %v956_v62, %v936_v28  ;;  %v5680_v38 = vpop.eup %3307  ;;  %v1931_v23 = vrot.slane %v1930_v32, 2 }
 0x13f   : > { %v2427_v25 = vadd.f32 %v5672_v17, %v2411_v58  ;;  %v903_v55 = vadd.f32 %v902_v30, %v901_v31  ;;  %v940_v3 = vmul.f32 %v5215_v8, %v2895_v60  ;;  %v5686_v22 = vpop.eup %3309  ;;  %v1415_v48 = vadd.f32 %v1414_v21, %v5485_v11 }
 0x140   : > { %v1471_v10 = vrot.slane %v1470_v35, 1  ;;  %v1527_v46 = vadd.f32 %v1526_v53, %v5516_v27  ;;  %v2064_v28 = vsel %vm763_vm0, %v5461_v44, %v5476_v19  ;;  %3317 = vrcp.f32 %v1877_v49  ;;  %v2901_v44 = vld [vmem:[%s5127_s18 + $0x108] sm:$0xff] }
 0x141   : > { %v1988_v9 = vrot.slane %v1987_v12, 2  ;;  %v2043_v56 = vrot.slane %v2042_v41, 4  ;;  %v849_v62 = vadd.f32 %v848_v18, %v847_v20  ;;  %v2425_v45 = vadd.f32 %v5680_v38, %v2409_v50 }
 0x142   : > { %v958_v31 = vadd.f32 %v957_v57, %v938_v42  ;;  %v985_v1 = vmul.f32 %v6628_v36, %v2897_v24  ;;  %v987_v58 = vmul.f32 %v6629_v59, %v2899_v61  ;;  %v5696_v11 = vpop.eup %3311  ;;  %v1932_v21 = vadd.f32 %v1931_v23, %v1930_v32 }
 0x143   : > { %v2443_v27 = vadd.f32 %v5686_v22, %v2427_v25  ;;  %v904_v53 = vrot.slane %v903_v55, 4  ;;  %v959_v30 = vsel %vm763_vm0, %v940_v3, 0.0  ;;  %v5701_v19 = vpop.eup %3313  ;;  %v1429_v20 = vmul.f32 %v5559_v52, %v1415_v48 }
 0x144   : > { %v1472_v49 = vadd.f32 %v1471_v10, %v1470_v35  ;;  %v1528_v60 = vrot.slane %v1527_v46, 1  ;;  %v1989_v36 = vadd.f32 %v1988_v9, %v1987_v12  ;;  %v2044_v18 = vadd.f32 %v2043_v56, %v2042_v41  ;;  %v2903_v41 = vld [vmem:[%s5127_s18 + $0x118] sm:$0xff] }
 0x145   : > { %v2067_v59 = vsel %vm2066_vm1, %v2064_v28, %v1024_v34  ;;  %v850_v50 = vrot.slane %v849_v62, 2  ;;  %v2441_v32 = vadd.f32 %v5696_v11, %v2425_v45  ;;  %v960_v42 = vadd.f32 %v959_v30, %v958_v31 }
 0x146   : > { %v989_v57 = vmul.f32 %v6630_v4, %v2901_v44  ;;  %v1011_v23 = vadd.f32 %v987_v58, %v985_v1  ;;  %v6635_v3 = vsub.f32 %v5136_v63, %v5321_v5  ;;  %v1933_v24 = vrot.slane %v1932_v21, 1  ;;  %v2905_v58 = vld [vmem:[%s5127_s18 + $0x128] sm:$0xff] }
 0x147   : > { %v5707_v25 = vpop.eup %3315  ;;  %v2459_v61 = vadd.f32 %v5701_v19, %v2443_v27  ;;  %v905_v12 = vadd.f32 %v904_v53, %v903_v55  ;;  %3319 = vpow2.f32 %v5387_v47  ;;  %v1486_v34 = vmul.f32 %v5559_v52, %v1472_v49  ;;  %v6637_v27 = vld [vmem:[#allocation27_spill] sm:$0xff]  ;;  %v6638_v53 = vld [vmem:[#allocation6_spill] sm:$0xff] }
 0x148   : > { %v1847_v35 = vmul.f32 1.442695, %v6635_v3  ;;  %v1529_v48 = vadd.f32 %v1528_v60, %v1527_v46  ;;  %v1990_v4 = vrot.slane %v1989_v36, 1  ;;  %v2045_v10 = vrot.slane %v2044_v18, 2 }
 0x149   : > { %v2070_v28 = vsel %vm2069_vm2, %v2067_v59, %v1429_v20  ;;  %v851_v9 = vadd.f32 %v850_v50, %v849_v62  ;;  %v2457_v63 = vadd.f32 %v5707_v25, %v2441_v32  ;;  %v961_v56 = vrot.slane %v960_v42, 4 }
 0x14a   : > { %v991_v45 = vmul.f32 %v6631_v16, %v2903_v41  ;;  %v1012_v31 = vadd.f32 %v1011_v23, %v989_v57  ;;  %v5719_v55 = vpop.eup %3317  ;;  %v1934_v1 = vadd.f32 %v1933_v24, %v1932_v21  ;;  %3321 = vrcp.f32 %v2459_v61  ;;  %v2907_v23 = vld [vmem:[%s5127_s18 + $0x138] sm:$0xff]  ;;  %v6642_v24 = vld [vmem:[#allocation47_spill] sm:$0xff]  ;;  %v2909_v41 = vld [vmem:[%s5127_s18 + $0x148] sm:$0x1] }
 0x14b   : > { %6636 = vst [vmem:[#allocation48_spill] sm:$0xff] %v5719_v55  ;;  %v906_v47 = vrot.slane %v905_v12, 2  ;;  %v1359_v46 = vadd.f32 %v5255_v54, %v5237_v43  ;;  %3323 = vpow2.f32 %v6637_v27  ;;  %v6639_v62 = vsub.f32 %v6638_v53, %v5321_v5 }
 0x14c   : > { %v1543_v44 = vmul.f32 %v5559_v52, %v1529_v48  ;;  %v1991_v16 = vadd.f32 %v1990_v4, %v1989_v36  ;;  %v2046_v20 = vadd.f32 %v2045_v10, %v2044_v18  ;;  %v2073_v21 = vsel %vm2072_vm3, %v2070_v28, %v1486_v34  ;;  %v6640_v52 = vld [vmem:[#allocation25_spill] sm:$0xff]  ;;  %v6641_v36 = vld [vmem:[#allocation28_spill] sm:$0xff]  ;;  %v2958_v4 = vld [vmem:[%s5127_s18 + $0x168] sm:$0xff] }
 0x14d   : > { %v1851_v30 = vmul.f32 1.442695, %v6639_v62  ;;  %v852_v49 = vrot.slane %v851_v9, 1  ;;  %3325 = vrcp.f32 %v2457_v63  ;;  %v962_v60 = vadd.f32 %v961_v56, %v960_v42  ;;  %v2956_v48 = vld [vmem:[%s5127_s18 + $0x158] sm:$0xff] }
 0x14e   : > { %v993_v59 = vmul.f32 %v6632_v0, %v2905_v58  ;;  %v1013_v50 = vadd.f32 %v1012_v31, %v991_v45  ;;  %v1948_v32 = vmul.f32 %v5719_v55, %v1934_v1  ;;  %v907_v57 = vadd.f32 %v906_v47, %v905_v12  ;;  %v6644_v47 = vld [vmem:[#allocation29_spill] sm:$0xff] }
 0x14f   : > { %v1360_v3 = vadd.f32 %v6640_v52, %v1359_v46  ;;  %v1834_v18 = vsub.f32 %v6641_v36, %v5321_v5  ;;  %3327 = vpow2.f32 %v1847_v35  ;;  %v6643_v61 = vsub.f32 %v6642_v24, %v5321_v5  ;;  %v6648_v36 = vld [vmem:[#allocation30_spill] sm:$0xff] }
 0x150   : > { %v2076_v0 = vsel %vm2075_vm4, %v2073_v21, %v1543_v44  ;;  %3329 = vpow2.f32 %v1851_v30  ;;  %v2005_v34 = vmul.f32 %v5719_v55, %v1991_v16  ;;  %v853_v12 = vadd.f32 %v852_v49, %v851_v9  ;;  %v2960_v9 = vld [vmem:[%s5127_s18 + $0x178] sm:$0xff]  ;;  %v2966_v24 = vld [vmem:[%s5127_s18 + $0x1a8] sm:$0xff] }
 0x151   : > { %v1855_v42 = vmul.f32 1.442695, %v6643_v61  ;;  %v5744_v10 = vpop.eup %3319  ;;  %v2047_v28 = vrot.slane %v2046_v20, 1  ;;  %v963_v63 = vrot.slane %v962_v60, 2  ;;  %v995_v35 = vmul.f32 %v6633_v33, %v2907_v23  ;;  %v6645_v33 = vld [vmem:[#allocation8_spill] sm:$0xff] }
 0x152   : > { %v1014_v56 = vadd.f32 %v1013_v50, %v993_v59  ;;  %v2079_v45 = vsel %vm2078_vm5, %v2076_v0, %v1948_v32  ;;  %v908_v31 = vrot.slane %v907_v57, 1  ;;  %v997_v1 = vmul.f32 %v5215_v8, %v2909_v41  ;;  %v2962_v59 = vld [vmem:[%s5127_s18 + $0x188] sm:$0xff]  ;;  %v2964_v50 = vld [vmem:[%s5127_s18 + $0x198] sm:$0xff]  ;;  %v6649_v41 = vld [vmem:[#allocation7_spill] sm:$0xff] }
 0x153   : > { %v1361_v58 = vadd.f32 %v6644_v47, %v1360_v3  ;;  %3331 = vpow2.f32 %v1855_v42  ;;  %v1390_v46 = vmul.f32 %v5237_v43, %v2956_v48  ;;  %v1392_v27 = vmul.f32 %v5255_v54, %v2958_v4  ;;  %v2968_v32 = vld [vmem:[%s5127_s18 + $0x1b8] sm:$0x1] }
 0x154   : > { %v5753_v53 = vpop.eup %3321  ;;  %v5757_v30 = vmul.f32 1.442695, %v1834_v18  ;;  %3333 = vrcp.f32 %v853_v12  ;;  %v5761_v44 = vadd.f32 %v2047_v28, %v2046_v20  ;;  %v5764_v16 = vsel %vm2081_vm6, %v2079_v45, %v2005_v34 }
 0x155   : > { %v5759_v8 = vpop.eup %3323  ;;  %6647 = vst [vmem:[#allocation52_spill] sm:$0xff] %v5764_v16  ;;  %v964_v21 = vadd.f32 %v963_v63, %v962_v60  ;;  %v1015_v49 = vadd.f32 %v1014_v56, %v995_v35  ;;  %v909_v23 = vadd.f32 %v908_v31, %v907_v57  ;;  %v1016_v3 = vsel %vm763_vm0, %v997_v1, 0.0 }
 0x156   : > { %6646 = vst [vmem:[#allocation51_spill] sm:$0xff] %v5761_v44  ;;  %v1362_v18 = vadd.f32 %v6648_v36, %v1361_v58  ;;  %v1394_v61 = vmul.f32 %v6640_v52, %v2960_v9  ;;  %v2467_v20 = vmul.f32 %v5753_v53, %v5604_v39  ;;  %v2487_v60 = vmul.f32 %v5753_v53, %v5615_v13  ;;  %v2970_v9 = vld [vmem:[%s5127_s18 + $0x1c8] sm:$0xff] }
 0x157   : > { %v5773_v42 = vpop.eup %3325  ;;  %v2507_v0 = vmul.f32 %v5753_v53, %v5629_v2  ;;  %v1416_v57 = vadd.f32 %v1392_v27, %v1390_v46  ;;  %v1364_v34 = vsel %vm763_vm0, %v6649_v41, 0.0  ;;  %v1396_v12 = vmul.f32 %v6644_v47, %v2962_v59  ;;  %v6650_v2 = vld [vmem:[#allocation26_spill] sm:$0xff] }
 0x158   : > { %v1398_v48 = vmul.f32 %v6648_v36, %v2964_v50  ;;  %v1402_v4 = vmul.f32 %v6649_v41, %v2968_v32  ;;  %v2527_v39 = vmul.f32 %v5753_v53, %v5639_v51  ;;  %v965_v13 = vrot.slane %v964_v21, 1  ;;  %v2972_v51 = vld [vmem:[%s5127_s18 + $0x1d8] sm:$0xff] }
 0x159   : > { %v5786_v28 = vpop.eup %3327  ;;  %v1017_v63 = vadd.f32 %v1016_v3, %v1015_v49  ;;  %v5791_v35 = vmul.f32 %v6650_v2, %v2966_v24  ;;  %v2465_v45 = vmul.f32 %v5773_v42, %v5594_v6  ;;  %v2485_v31 = vmul.f32 %v5773_v42, %v5610_v14 }
 0x15a   : > { %v5793_v56 = vpop.eup %3329  ;;  %v2505_v1 = vmul.f32 %v5773_v42, %v5620_v29  ;;  %v1363_v58 = vadd.f32 %v6650_v2, %v1362_v18  ;;  %v2469_v46 = vsel %vm763_vm0, %v2467_v20, 0.0  ;;  %v2489_v27 = vsel %vm763_vm0, %v2487_v60, 0.0 }
 0x15b   : > { %v2509_v49 = vsel %vm763_vm0, %v2507_v0, 0.0  ;;  %v1417_v59 = vadd.f32 %v1416_v57, %v1394_v61  ;;  %v2525_v6 = vmul.f32 %v5773_v42, %v5635_v15  ;;  %v2547_v14 = vmul.f32 %v5753_v53, %v5650_v40  ;;  %v2976_v57 = vld [vmem:[%s5127_s18 + $0x1f8] sm:$0xff] }
 0x15c   : > { %v2567_v29 = vmul.f32 %v5753_v53, %v5657_v26  ;;  %v5814_v50 = vsel %vm763_vm0, %v1402_v4, 0.0  ;;  %v2529_v3 = vsel %vm763_vm0, %v2527_v39, 0.0  ;;  %v966_v18 = vadd.f32 %v965_v13, %v964_v21  ;;  %v2974_v26 = vld [vmem:[%s5127_s18 + $0x1e8] sm:$0xff] }
 0x15d   : > { %v5816_v32 = vpop.eup %3331  ;;  %v1447_v24 = vmul.f32 %v5237_v43, %v2970_v9  ;;  %v1449_v61 = vmul.f32 %v5255_v54, %v2972_v51  ;;  %v2470_v15 = vadd.f32 %v2469_v46, %v2465_v45  ;;  %v2490_v40 = vadd.f32 %v2489_v27, %v2485_v31  ;;  %v2978_v46 = vld [vmem:[%s5127_s18 + $0x208] sm:$0xff] }
 0x15e   : > { %v5821_v20 = vpop.eup %3333  ;;  %v2510_v60 = vadd.f32 %v2509_v49, %v2505_v1  ;;  %v1018_v0 = vrot.slane %v1017_v63, 4  ;;  %v2545_v4 = vmul.f32 %v5773_v42, %v5644_v37  ;;  %v2565_v21 = vmul.f32 %v5773_v42, %v5653_v7 }
 0x15f   : > { %v1365_v39 = vadd.f32 %v1364_v34, %v1363_v58  ;;  %v1418_v13 = vadd.f32 %v1417_v59, %v1396_v12  ;;  %v2530_v9 = vadd.f32 %v2529_v3, %v2525_v6  ;;  %v2549_v45 = vsel %vm763_vm0, %v2547_v14, 0.0  ;;  %v2984_v12 = vld [vmem:[%s5127_s18 + $0x238] sm:$0xff]  ;;  %v2982_v6 = vld [vmem:[%s5127_s18 + $0x228] sm:$0x1] }
 0x160   : > { %v2569_v31 = vsel %vm763_vm0, %v2567_v29, 0.0  ;;  %v2587_v1 = vmul.f32 %v5753_v53, %v5672_v17  ;;  %v5834_v51 = vmul.f32 %v5821_v20, %v909_v23  ;;  %v5837_v37 = vmul.f32 %v5821_v20, %v966_v18  ;;  %v2980_v17 = vld [vmem:[%s5127_s18 + $0x218] sm:$0xff] }
 0x161   : > { %v1451_v7 = vmul.f32 %v6640_v52, %v2974_v26  ;;  %v5842_v34 = vmul.f32 %v6644_v47, %v2976_v57  ;;  %v2471_v58 = vrot.slane %v2470_v15, 4  ;;  %v2491_v27 = vrot.slane %v2490_v40, 4 }
 0x162   : > { %6651 = vst [vmem:[#allocation49_spill] sm:$0xff] %v5834_v51  ;;  %6652 = vst [vmem:[#allocation9_spill] sm:$0xff] %v5837_v37  ;;  %v2511_v49 = vrot.slane %v2510_v60, 4  ;;  %v1019_v59 = vadd.f32 %v1018_v0, %v1017_v63  ;;  %v2550_v23 = vadd.f32 %v2549_v45, %v2545_v4  ;;  %v2570_v14 = vadd.f32 %v2569_v31, %v2565_v21  ;;  %v2986_v4 = vld [vmem:[%s5127_s18 + $0x248] sm:$0xff]  ;;  %v2988_v21 = vld [vmem:[%s5127_s18 + $0x258] sm:$0xff] }
 0x163   : > { %v2585_v29 = vmul.f32 %v5773_v42, %v5680_v38  ;;  %v1366_v3 = vrot.slane %v1365_v39, 4  ;;  %v2531_v18 = vrot.slane %v2530_v9, 4  ;;  %v2589_v26 = vsel %vm763_vm0, %v2587_v1, 0.0 }
 0x164   : > { %v1419_v57 = vadd.f32 %v1418_v13, %v1398_v48  ;;  %v5851_v62 = vmul.f32 %v6648_v36, %v2978_v46  ;;  %v5854_v16 = vmul.f32 %v6650_v2, %v2980_v17  ;;  %v1459_v63 = vmul.f32 %v6649_v41, %v2982_v6  ;;  %v2990_v48 = vld [vmem:[%s5127_s18 + $0x268] sm:$0xff] }
 0x165   : > { %v1473_v0 = vadd.f32 %v1449_v61, %v1447_v24  ;;  %v1504_v45 = vmul.f32 %v5237_v43, %v2984_v12  ;;  %v2472_v38 = vadd.f32 %v2471_v58, %v2470_v15  ;;  %v2492_v31 = vadd.f32 %v2491_v27, %v2490_v40  ;;  %v2994_v12 = vld [vmem:[%s5127_s18 + $0x288] sm:$0xff] }
 0x166   : > { %v2512_v55 = vadd.f32 %v2511_v49, %v2510_v60  ;;  %v1020_v1 = vrot.slane %v1019_v59, 2  ;;  %v2551_v13 = vrot.slane %v2550_v23, 4  ;;  %v2571_v46 = vrot.slane %v2570_v14, 4  ;;  %v2992_v60 = vld [vmem:[%s5127_s18 + $0x278] sm:$0xff] }
 0x167   : > { %v2590_v44 = vadd.f32 %v2589_v26, %v2585_v29  ;;  %v1367_v51 = vadd.f32 %v1366_v3, %v1365_v39  ;;  %v2532_v17 = vadd.f32 %v2531_v18, %v2530_v9  ;;  %v1420_v37 = vadd.f32 %v1419_v57, %v5791_v35 }
 0x168   : > { %v1506_v24 = vmul.f32 %v5255_v54, %v2986_v4  ;;  %v1508_v61 = vmul.f32 %v6640_v52, %v2988_v21  ;;  %v2607_v43 = vmul.f32 %v5753_v53, %v5686_v22  ;;  %v1474_v15 = vadd.f32 %v1473_v0, %v1451_v7 }
 0x169   : > { %v5867_v40 = vsel %vm763_vm0, %v1459_v63, 0.0  ;;  %v1510_v58 = vmul.f32 %v6644_v47, %v2990_v48  ;;  %v2473_v39 = vrot.slane %v2472_v38, 2  ;;  %v2493_v9 = vrot.slane %v2492_v31, 2  ;;  %v2996_v47 = vld [vmem:[%s5127_s18 + $0x298] sm:$0x1] }
 0x16a   : > { %v2513_v27 = vrot.slane %v2512_v55, 2  ;;  %v1021_v35 = vadd.f32 %v1020_v1, %v1019_v59  ;;  %v2552_v49 = vadd.f32 %v2551_v13, %v2550_v23  ;;  %v2572_v54 = vadd.f32 %v2571_v46, %v2570_v14 }
 0x16b   : > { %v2591_v6 = vrot.slane %v2590_v44, 4  ;;  %v1368_v52 = vrot.slane %v1367_v51, 2  ;;  %v2533_v29 = vrot.slane %v2532_v17, 2  ;;  %v2605_v22 = vmul.f32 %v5773_v42, %v5696_v11 }
 0x16c   : > { %v1512_v7 = vmul.f32 %v6648_v36, %v2992_v60  ;;  %v5876_v3 = vmul.f32 %v6650_v2, %v2994_v12  ;;  %v2609_v18 = vsel %vm763_vm0, %v2607_v43, 0.0  ;;  %v1530_v26 = vadd.f32 %v1506_v24, %v1504_v45 }
 0x16d   : > { %v6653_v59 = vsub.f32 %v6645_v33, %v5321_v5  ;;  %v1878_v14 = vadd.f32 %v5759_v8, %v5744_v10  ;;  %v2474_v57 = vadd.f32 %v2473_v39, %v2472_v38  ;;  %v2494_v63 = vadd.f32 %v2493_v9, %v2492_v31 }
 0x16e   : > { %v2514_v0 = vadd.f32 %v2513_v27, %v2512_v55  ;;  %v5886_v11 = vadd.f32 %v5814_v50, %v1420_v37  ;;  %v2553_v36 = vrot.slane %v2552_v49, 2  ;;  %v2573_v2 = vrot.slane %v2572_v54, 2 }
 0x16f   : > { %v1863_v23 = vmul.f32 1.442695, %v6653_v59  ;;  %v2592_v4 = vadd.f32 %v2591_v6, %v2590_v44  ;;  %v1475_v21 = vadd.f32 %v1474_v15, %v5842_v34  ;;  %v2534_v1 = vadd.f32 %v2533_v29, %v2532_v17  ;;  %v5922_v29 = vld [vmem:[%s5373_s22 + $0x48] sm:$0xff]  ;;  %v5928_v59 = vld [vmem:[%s5373_s22 + $0x58] sm:$0x1] }
 0x170   : > { %v2610_v45 = vadd.f32 %v2609_v18, %v2605_v22  ;;  %v1516_v48 = vmul.f32 %v6649_v41, %v2996_v47  ;;  %3335 = vpow2.f32 %v5757_v30  ;;  %v1022_v5 = vrot.slane %v1021_v35, 1 }
 0x171   : > { %v1531_v33 = vadd.f32 %v1530_v26, %v1508_v61  ;;  %3337 = vpow2.f32 %v1863_v23  ;;  %v1879_v55 = vadd.f32 %v5786_v28, %v1878_v14  ;;  %v2475_v50 = vrot.slane %v2474_v57, 1  ;;  %v5900_v61 = vld [vmem:[%s5373_s22 + $0x8] sm:$0xff] }
 0x172   : > { %v2495_v37 = vrot.slane %v2494_v63, 1  ;;  %v2515_v38 = vrot.slane %v2514_v0, 1  ;;  %v5892_v31 = vadd.f32 %v1368_v52, %v1367_v51  ;;  %v2554_v44 = vadd.f32 %v2553_v36, %v2552_v49  ;;  %v5903_v51 = vld [vmem:[%s5373_s22 + $0x28] sm:$0xff]  ;;  %v5912_v49 = vld [vmem:[%s5373_s22 + $0x18] sm:$0x1] }
 0x173   : > { %v2574_v34 = vadd.f32 %v2573_v2, %v2572_v54  ;;  %v2593_v13 = vrot.slane %v2592_v4, 2  ;;  %v1423_v41 = vrot.slane %v5886_v11, 4  ;;  %v2535_v30 = vrot.slane %v2534_v1, 1  ;;  %v5915_v54 = vld [vmem:[%s5373_s22 + $0x38] sm:$0x1] }
 0x174   : > { %v2611_v46 = vrot.slane %v2610_v45, 4  ;;  %v1476_v17 = vadd.f32 %v1475_v21, %v5851_v62  ;;  %v5897_v24 = vsel %vm763_vm0, %v1516_v48, 0.0  ;;  %v2627_v43 = vmul.f32 %v5753_v53, %v5701_v19  ;;  %v3043_v53 = vld [vmem:[%s5127_s18 + $0x2a8] sm:$0xff] }
 0x175   : > { %v5907_v15 = vadd.f32 %v1022_v5, %v1021_v35  ;;  %v1532_v60 = vadd.f32 %v1531_v33, %v1510_v58  ;;  %v1880_v12 = vadd.f32 %v5793_v56, %v1879_v55  ;;  %v2476_v39 = vadd.f32 %v2475_v50, %v2474_v57  ;;  %v3045_v35 = vld [vmem:[%s5127_s18 + $0x2b8] sm:$0xff]  ;;  %v3047_v48 = vld [vmem:[%s5127_s18 + $0x2c8] sm:$0xff] }
 0x176   : > { %v2496_v62 = vadd.f32 %v2495_v37, %v2494_v63  ;;  %v2516_v9 = vadd.f32 %v2515_v38, %v2514_v0  ;;  %v1370_v27 = vrot.slane %v5892_v31, 1  ;;  %v2555_v6 = vrot.slane %v2554_v44, 1  ;;  %v5935_v0 = vld [vmem:[%s5373_s22 + $0x68] sm:$0xff] }
 0x177   : > { %v2575_v52 = vrot.slane %v2574_v34, 1  ;;  %v2594_v19 = vadd.f32 %v2593_v13, %v2592_v4  ;;  %v2251_v58 = vmax.f32 %v5900_v61, %v5903_v51  ;;  %v2536_v22 = vadd.f32 %v2535_v30, %v2534_v1  ;;  %v5955_v33 = vld [vmem:[%s5373_s22 + $0x88] sm:$0xff]  ;;  %v5960_v13 = vld [vmem:[%s5373_s22 + $0x98] sm:$0x1] }
 0x178   : > { %v2612_v18 = vadd.f32 %v2611_v46, %v2610_v45  ;;  %v2625_v47 = vmul.f32 %v5773_v42, %v5707_v25  ;;  %v1477_v26 = vadd.f32 %v1476_v17, %v5854_v16  ;;  %v2629_v23 = vsel %vm763_vm0, %v2627_v43, 0.0  ;;  %v5967_v17 = vld [vmem:[%s5373_s22 + $0xa8] sm:$0xff] }
 0x179   : > { %v1533_v14 = vadd.f32 %v1532_v60, %v1512_v7  ;;  %v1881_v57 = vadd.f32 %v5816_v32, %v1880_v12  ;;  %v2253_v63 = vmax.f32 %v5912_v49, %v5915_v54  ;;  %v2645_v25 = vsel %vm763_vm0, %v2476_v39, %v2496_v62  ;;  %v5944_v7 = vld [vmem:[%s5373_s22 + $0x78] sm:$0x1] }
 0x17a   : > { %v5937_v36 = vpop.eup %3335  ;;  %v1909_v16 = vmul.f32 %v5744_v10, %v3043_v53  ;;  %v1911_v42 = vmul.f32 %v5759_v8, %v3045_v35  ;;  %v2260_v2 = vmax.f32 %v2251_v58, %v5922_v29  ;;  %v5948_v21 = vadd.f32 %v2555_v6, %v2554_v44  ;;  %v5974_v39 = vld [vmem:[%s5373_s22 + $0xb8] sm:$0x1]  ;;  %v5988_v35 = vld [vmem:[%s5373_s22 + $0xc8] sm:$0xff] }
 0x17b   : > { %v5946_v4 = vpop.eup %3337  ;;  %v5950_v1 = vadd.f32 %v2575_v52, %v2574_v34  ;;  %v2595_v45 = vrot.slane %v2594_v19, 1  ;;  %v2262_v5 = vmax.f32 %v2253_v63, %v5928_v59  ;;  %v2613_v55 = vrot.slane %v2612_v18, 2  ;;  %v3049_v6 = vld [vmem:[%s5127_s18 + $0x2d8] sm:$0xff]  ;;  %v3055_v52 = vld [vmem:[%s5127_s18 + $0x308] sm:$0x1] }
 0x17c   : > { %v2630_v50 = vadd.f32 %v2629_v23, %v2625_v47  ;;  %v1479_v37 = vadd.f32 %v5867_v40, %v1477_v26  ;;  %v2269_v38 = vmax.f32 %v2260_v2, %v5935_v0  ;;  %v2647_v44 = vsel %vm2066_vm1, %v2645_v25, %v2516_v9  ;;  %v3051_v63 = vld [vmem:[%s5127_s18 + $0x2e8] sm:$0xff]  ;;  %v3053_v25 = vld [vmem:[%s5127_s18 + $0x2f8] sm:$0xff] }
 0x17d   : > { %v1534_v34 = vadd.f32 %v1533_v14, %v5876_v3  ;;  %v1882_v30 = vadd.f32 %v5937_v36, %v1881_v57  ;;  %v2271_v46 = vmax.f32 %v2262_v5, %v5944_v7  ;;  %v1883_v40 = vsel %vm763_vm0, %v5946_v4, 0.0  ;;  %v6006_v57 = vld [vmem:[%s5373_s22 + $0xe8] sm:$0xff] }
 0x17e   : > { %v1913_v43 = vmul.f32 %v5786_v28, %v3047_v48  ;;  %v1935_v60 = vadd.f32 %v1911_v42, %v1909_v16  ;;  %v2278_v12 = vmax.f32 %v2269_v38, %v5955_v33  ;;  %v5976_v3 = vadd.f32 %v2595_v45, %v2594_v19  ;;  %v6014_v45 = vld [vmem:[%s5373_s22 + $0xf8] sm:$0x1] }
 0x17f   : > { %v1371_v62 = vadd.f32 %v1370_v27, %v5892_v31  ;;  %v5982_v9 = vadd.f32 %v1423_v41, %v5886_v11  ;;  %v2280_v53 = vmax.f32 %v2271_v46, %v5960_v13  ;;  %v5990_v58 = vadd.f32 %v2613_v55, %v2612_v18  ;;  %v3057_v31 = vld [vmem:[%s5127_s18 + $0x318] sm:$0xff]  ;;  %v3059_v27 = vld [vmem:[%s5127_s18 + $0x328] sm:$0xff] }
 0x180   : > { %v2631_v19 = vrot.slane %v2630_v50, 4  ;;  %v1480_v47 = vrot.slane %v1479_v37, 4  ;;  %v2287_v26 = vmax.f32 %v2278_v12, %v5967_v17  ;;  %v5996_v11 = vld [vmem:[%s5373_s22 + $0xd8] sm:$0x1]  ;;  %v5999_v41 = vsel %vm2069_vm2, %v2647_v44, %v2536_v22  ;;  %v6020_v55 = vld [vmem:[%s5373_s22 + $0x108] sm:$0xff] }
 0x181   : > { %v6002_v23 = vadd.f32 %v5897_v24, %v1534_v34  ;;  %v1884_v14 = vadd.f32 %v1883_v40, %v1882_v30  ;;  %v2289_v18 = vmax.f32 %v2280_v53, %v5974_v39  ;;  %v1915_v16 = vmul.f32 %v5793_v56, %v3049_v6  ;;  %v3061_v30 = vld [vmem:[%s5127_s18 + $0x338] sm:$0xff]  ;;  %v3063_v46 = vld [vmem:[%s5127_s18 + $0x348] sm:$0xff] }
 0x182   : > { %v1921_v42 = vmul.f32 %v5946_v4, %v3055_v52  ;;  %v1936_v22 = vadd.f32 %v1935_v60, %v1913_v43  ;;  %v2296_v2 = vmax.f32 %v2287_v26, %v5988_v35  ;;  %3339 = vrcp.f32 %v1371_v62  ;;  %v6031_v43 = vld [vmem:[%s5373_s22 + $0x118] sm:$0x1]  ;;  %v3067_v52 = vld [vmem:[%s5127_s18 + $0x368] sm:$0xff] }
 0x183   : > { %v1966_v24 = vmul.f32 %v5744_v10, %v3057_v31  ;;  %v1968_v48 = vmul.f32 %v5759_v8, %v3059_v27  ;;  %v2298_v5 = vmax.f32 %v2289_v18, %v5996_v11  ;;  %v6022_v38 = vadd.f32 %v2631_v19, %v2630_v50  ;;  %v3065_v6 = vld [vmem:[%s5127_s18 + $0x358] sm:$0xff] }
 0x184   : > { %v1425_v44 = vrot.slane %v5982_v9, 2  ;;  %v6025_v34 = vadd.f32 %v1480_v47, %v1479_v37  ;;  %v2305_v40 = vmax.f32 %v2296_v2, %v6006_v57  ;;  %v1885_v60 = vrot.slane %v1884_v14, 4 }
 0x185   : > { %v1917_v12 = vmul.f32 %v5816_v32, %v3051_v63  ;;  %v1919_v62 = vmul.f32 %v5937_v36, %v3053_v25  ;;  %v2307_v50 = vmax.f32 %v2298_v5, %v6014_v45  ;;  %v1537_v53 = vrot.slane %v6002_v23, 4 }
 0x186   : > { %v1937_v37 = vadd.f32 %v1936_v22, %v1915_v16  ;;  %v6040_v19 = vsel %vm763_vm0, %v1921_v42, 0.0  ;;  %v6043_v47 = vmax.f32 %v2305_v40, %v6020_v55  ;;  %v1970_v31 = vmul.f32 %v5786_v28, %v3061_v30  ;;  %v3071_v16 = vld [vmem:[%s5127_s18 + $0x388] sm:$0xff] }
 0x187   : > { %v1972_v27 = vmul.f32 %v5793_v56, %v3063_v46  ;;  %v1992_v26 = vadd.f32 %v1968_v48, %v1966_v24  ;;  %v6048_v18 = vmax.f32 %v2307_v50, %v6031_v43  ;;  %v1974_v63 = vmul.f32 %v5816_v32, %v3065_v6 }
 0x188   : > { %v6052_v25 = vmul.f32 %v5937_v36, %v3067_v52  ;;  %v2318_v42 = vsub.f32 %v5900_v61, %v6043_v47  ;;  %v2334_v22 = vsub.f32 %v5903_v51, %v6043_v47  ;;  %v6059_v2 = vadd.f32 %v1885_v60, %v1884_v14  ;;  %v3073_v51 = vld [vmem:[%s5127_s18 + $0x398] sm:$0xff] }
 0x189   : > { %v2320_v24 = vsub.f32 %v5912_v49, %v6048_v18  ;;  %v2336_v48 = vsub.f32 %v5915_v54, %v6048_v18  ;;  %v2350_v5 = vsub.f32 %v5922_v29, %v6043_v47  ;;  %v1938_v30 = vadd.f32 %v1937_v37, %v1917_v12  ;;  %v3075_v37 = vld [vmem:[%s5127_s18 + $0x3a8] sm:$0xff] }
 0x18a   : > { %v2323_v46 = vmul.f32 1.442695, %v2318_v42  ;;  %v2339_v40 = vmul.f32 1.442695, %v2334_v22  ;;  %v2352_v61 = vsub.f32 %v5928_v59, %v6048_v18  ;;  %v1993_v6 = vadd.f32 %v1992_v26, %v1970_v31 }
 0x18b   : > { %v2023_v14 = vmul.f32 %v5744_v10, %v3071_v16  ;;  %v2327_v60 = vmul.f32 1.442695, %v2320_v24  ;;  %v2343_v52 = vmul.f32 1.442695, %v2336_v48  ;;  %v2355_v49 = vmul.f32 1.442695, %v2350_v5 }
 0x18c   : > { %3341 = vpow2.f32 %v2323_v46  ;;  %v2359_v50 = vmul.f32 1.442695, %v2352_v61  ;;  %v2366_v54 = vsub.f32 %v5935_v0, %v6043_v47  ;;  %v6073_v29 = vpop.eup %3339  ;;  %v2368_v12 = vsub.f32 %v5944_v7, %v6048_v18  ;;  %v3069_v24 = vld [vmem:[%s5127_s18 + $0x378] sm:$0x1] }
 0x18d   : > { %3343 = vpow2.f32 %v2327_v60  ;;  %v2382_v59 = vsub.f32 %v5955_v33, %v6043_v47  ;;  %v2384_v10 = vsub.f32 %v5960_v13, %v6048_v18  ;;  %v2025_v31 = vmul.f32 %v5759_v8, %v3073_v51  ;;  %v3077_v46 = vld [vmem:[%s5127_s18 + $0x3b8] sm:$0xff] }
 0x18e   : > { %3345 = vpow2.f32 %v2339_v40  ;;  %v2371_v26 = vmul.f32 1.442695, %v2366_v54  ;;  %v2398_v0 = vsub.f32 %v5967_v17, %v6043_v47  ;;  %v1939_v16 = vadd.f32 %v1938_v30, %v1919_v62 }
 0x18f   : > { %v1994_v42 = vadd.f32 %v1993_v6, %v1972_v27  ;;  %3347 = vpow2.f32 %v2343_v52  ;;  %v2375_v7 = vmul.f32 1.442695, %v2368_v12  ;;  %v2387_v22 = vmul.f32 1.442695, %v2382_v59 }
 0x190   : > { %3349 = vpow2.f32 %v2355_v49  ;;  %v2400_v33 = vsub.f32 %v5974_v39, %v6048_v18  ;;  %v2414_v13 = vsub.f32 %v5988_v35, %v6043_v47  ;;  %v2027_v8 = vmul.f32 %v5786_v28, %v3075_v37 }
 0x191   : > { %3351 = vpow2.f32 %v2359_v50  ;;  %v2391_v48 = vmul.f32 1.442695, %v2384_v10  ;;  %v2416_v17 = vsub.f32 %v5996_v11, %v6048_v18  ;;  %v2049_v62 = vadd.f32 %v2025_v31, %v2023_v14 }
 0x192   : > { %3353 = vpow2.f32 %v2371_v26  ;;  %v2403_v27 = vmul.f32 1.442695, %v2398_v0  ;;  %v2430_v5 = vsub.f32 %v6006_v57, %v6043_v47  ;;  %v1995_v30 = vadd.f32 %v1994_v42, %v1974_v63  ;;  %v3081_v42 = vld [vmem:[%s5127_s18 + $0x3d8] sm:$0xff] }
 0x193   : > { %3355 = vpow2.f32 %v2375_v7  ;;  %v2407_v39 = vmul.f32 1.442695, %v2400_v33  ;;  %v2432_v35 = vsub.f32 %v6014_v45, %v6048_v18  ;;  %v1978_v28 = vmul.f32 %v5946_v4, %v3069_v24  ;;  %v3083_v24 = vld [vmem:[%s5127_s18 + $0x3e8] sm:$0x1] }
 0x194   : > { %3357 = vpow2.f32 %v2387_v22  ;;  %v2419_v40 = vmul.f32 1.442695, %v2414_v13  ;;  %v2446_v11 = vsub.f32 %v6020_v55, %v6043_v47  ;;  %v1887_v61 = vrot.slane %v6059_v2, 2  ;;  %v3079_v55 = vld [vmem:[%s5127_s18 + $0x3c8] sm:$0xff] }
 0x195   : > { %3359 = vpow2.f32 %v2391_v48  ;;  %v2423_v6 = vmul.f32 1.442695, %v2416_v17  ;;  %v2448_v57 = vsub.f32 %v6031_v43, %v6048_v18  ;;  %v1941_v51 = vadd.f32 %v6040_v19, %v1939_v16 }
 0x196   : > { %v6104_v63 = vpop.eup %3341  ;;  %v2029_v45 = vmul.f32 %v5793_v56, %v3077_v46  ;;  %3361 = vpow2.f32 %v2403_v27  ;;  %v2435_v14 = vmul.f32 1.442695, %v2430_v5  ;;  %v1996_v52 = vadd.f32 %v1995_v30, %v6052_v25 }
 0x197   : > { %v6108_v60 = vpop.eup %3343  ;;  %v2050_v47 = vadd.f32 %v2049_v62, %v2027_v8  ;;  %3363 = vpow2.f32 %v2407_v39  ;;  %v2439_v49 = vmul.f32 1.442695, %v2432_v35  ;;  %v1538_v43 = vadd.f32 %v1537_v53, %v6002_v23 }
 0x198   : > { %v6112_v50 = vpop.eup %3345  ;;  %v1997_v19 = vsel %vm763_vm0, %v1978_v28, 0.0  ;;  %3365 = vpow2.f32 %v2419_v40  ;;  %v2451_v56 = vmul.f32 1.442695, %v2446_v11  ;;  %v1888_v54 = vadd.f32 %v1887_v61, %v6059_v2 }
 0x199   : > { %v6118_v18 = vpop.eup %3347  ;;  %v2346_v25 = vadd.f32 %v6112_v50, %v6104_v63  ;;  %3367 = vpow2.f32 %v2423_v6  ;;  %v2455_v12 = vmul.f32 1.442695, %v2448_v57  ;;  %v1942_v10 = vrot.slane %v1941_v51, 4 }
 0x19a   : > { %v6123_v59 = vpop.eup %3349  ;;  %v2031_v37 = vmul.f32 %v5816_v32, %v3079_v55  ;;  %v2348_v23 = vadd.f32 %v6118_v18, %v6108_v60  ;;  %3369 = vpow2.f32 %v2435_v14  ;;  %v1998_v31 = vadd.f32 %v1997_v19, %v1996_v52 }
 0x19b   : > { %v6128_v53 = vpop.eup %3351  ;;  %v2051_v2 = vadd.f32 %v2050_v47, %v2029_v45  ;;  %v2362_v26 = vadd.f32 %v6123_v59, %v2346_v25  ;;  %3371 = vpow2.f32 %v2439_v49  ;;  %v2651_v16 = vsel %vm2072_vm3, %v5999_v41, %v5948_v21 }
 0x19c   : > { %v6131_v0 = vpop.eup %3353  ;;  %v1482_v32 = vrot.slane %v6025_v34, 2  ;;  %v2364_v7 = vadd.f32 %v6128_v53, %v2348_v23  ;;  %3373 = vpow2.f32 %v2451_v56  ;;  %v2633_v33 = vrot.slane %v6022_v38, 2 }
 0x19d   : > { %v6139_v22 = vpop.eup %3355  ;;  %v1426_v13 = vadd.f32 %v1425_v44, %v5982_v9  ;;  %v2378_v8 = vadd.f32 %v6131_v0, %v2362_v26  ;;  %3375 = vpow2.f32 %v2455_v12  ;;  %v1539_v21 = vrot.slane %v1538_v43, 2 }
 0x19e   : > { %v6147_v48 = vpop.eup %3357  ;;  %v1889_v41 = vrot.slane %v1888_v54, 1  ;;  %v1943_v17 = vadd.f32 %v1942_v10, %v1941_v51  ;;  %v2380_v62 = vadd.f32 %v6139_v22, %v2364_v7  ;;  %v1999_v5 = vrot.slane %v1998_v31, 4 }
 0x19f   : > { %v6150_v27 = vpop.eup %3359  ;;  %v2033_v30 = vmul.f32 %v5937_v36, %v3081_v42  ;;  %v2052_v46 = vadd.f32 %v2051_v2, %v2031_v37  ;;  %v2394_v39 = vadd.f32 %v6147_v48, %v2378_v8  ;;  %v2615_v44 = vrot.slane %v5990_v58, 1  ;;  %v6655_v42 = vld [vmem:[#allocation49_spill] sm:$0xff] }
 0x1a0   : > { %v6154_v9 = vpop.eup %3361  ;;  %v1483_v35 = vadd.f32 %v1482_v32, %v6025_v34  ;;  %v2035_v28 = vmul.f32 %v5946_v4, %v3083_v24  ;;  %v2396_v40 = vadd.f32 %v6150_v27, %v2380_v62  ;;  %v2634_v61 = vadd.f32 %v2633_v33, %v6022_v38  ;;  %v6654_v32 = vld [vmem:[#allocation9_spill] sm:$0xff]  ;;  %v6656_v33 = vld [vmem:[#allocation51_spill] sm:$0xff] }
 0x1a1   : > { %v6162_v11 = vpop.eup %3363  ;;  %v2653_v36 = vsel %vm2075_vm4, %v2651_v16, %v5950_v1  ;;  %v1427_v6 = vrot.slane %v1426_v13, 1  ;;  %v2410_v57 = vadd.f32 %v6154_v9, %v2394_v39  ;;  %v1540_v45 = vadd.f32 %v1539_v21, %v1538_v43 }
 0x1a2   : > { %v6168_v51 = vpop.eup %3365  ;;  %v1890_v14 = vadd.f32 %v1889_v41, %v1888_v54  ;;  %v1944_v52 = vrot.slane %v1943_v17, 2  ;;  %v2412_v34 = vadd.f32 %v6162_v11, %v2396_v40  ;;  %v1025_v55 = vmul.f32 %v5821_v20, %v5907_v15 }
 0x1a3   : > { %v6171_v4 = vpop.eup %3367  ;;  %v2000_v47 = vadd.f32 %v1999_v5, %v1998_v31  ;;  %v2053_v38 = vadd.f32 %v2052_v46, %v2033_v30  ;;  %v2426_v49 = vadd.f32 %v6168_v51, %v2410_v57  ;;  %v2655_v19 = vsel %vm2078_vm5, %v2653_v36, %v5976_v3  ;;  %v6659_v57 = vld [vmem:[#allocation52_spill] sm:$0xff] }
 0x1a4   : > { %v6176_v1 = vpop.eup %3369  ;;  %v1484_v43 = vrot.slane %v1483_v35, 1  ;;  %v2054_v56 = vsel %vm763_vm0, %v2035_v28, 0.0  ;;  %v2428_v54 = vadd.f32 %v6171_v4, %v2412_v34  ;;  %v2616_v20 = vadd.f32 %v2615_v44, %v5990_v58  ;;  %v6658_v28 = vld [vmem:[#allocation5_spill] sm:$0xff] }
 0x1a5   : > { %v6184_v25 = vpop.eup %3371  ;;  %v2635_v15 = vrot.slane %v2634_v61, 1  ;;  %v1428_v12 = vadd.f32 %v1427_v6, %v1426_v13  ;;  %v2442_v10 = vadd.f32 %v6176_v1, %v2426_v49  ;;  %v1541_v23 = vrot.slane %v1540_v45, 1  ;;  %v6657_v13 = vld [vmem:[#allocation48_spill] sm:$0xff] }
 0x1a6   : > { %v6188_v37 = vpop.eup %3373  ;;  %3377 = vrcp.f32 %v1890_v14  ;;  %v1945_v3 = vadd.f32 %v1944_v52, %v1943_v17  ;;  %v2444_v31 = vadd.f32 %v6184_v25, %v2428_v54  ;;  %v2001_v26 = vrot.slane %v2000_v47, 2 }
 0x1a7   : > { %v6191_v2 = vpop.eup %3375  ;;  %v2055_v16 = vadd.f32 %v2054_v56, %v2053_v38  ;;  %v2065_v7 = vsel %vm763_vm0, %v6655_v42, %v6654_v32  ;;  %v2458_v58 = vadd.f32 %v6188_v37, %v2442_v10  ;;  %v2062_v24 = vmul.f32 %v6657_v13, %v6656_v33 }
 0x1a8   : > { %v6200_v8 = vstv %s6157_s23  ;;  %v1485_v21 = vadd.f32 %v1484_v43, %v1483_v35  ;;  %v2460_v41 = vadd.f32 %v6191_v2, %v2444_v31  ;;  %v2636_v17 = vadd.f32 %v2635_v15, %v2634_v61 }
 0x1a9   : > { %v2657_v62 = vsel %vm2081_vm6, %v2655_v19, %v2616_v20  ;;  %v1430_v5 = vmul.f32 %v6073_v29, %v1428_v12  ;;  %3379 = vrcp.f32 %v2458_v58  ;;  %v1542_v46 = vadd.f32 %v1541_v23, %v1540_v45 }
 0x1aa   : > { %v1946_v39 = vrot.slane %v1945_v3, 1  ;;  %v2068_v44 = vsel %vm2066_vm1, %v2065_v7, %v1025_v55  ;;  %3381 = vrcp.f32 %v2460_v41  ;;  %v2002_v36 = vadd.f32 %v2001_v26, %v2000_v47 }
 0x1ab   : > { %v2236_v30 = vpop.f32.mrb[0].mxu0  ;;  %v2056_v6 = vrot.slane %v2055_v16, 4  ;;  %v2662_v61 = vmul.f32 %v6200_v8, %v6659_v57  ;;  %v6212_v14 = vstv %s6180_s24  ;;  %v1487_v52 = vmul.f32 %v6073_v29, %v1485_v21 }
 0x1ac   : > { %v2669_v40 = vrot.slane %v2236_v30, %v6658_v28  ;;  %v6207_v35 = vpop.f32.mrb[1].mxu0  ;;  %v2664_v45 = vmul.f32 %v6200_v8, %v2062_v24  ;;  %v2071_v55 = vsel %vm2069_vm2, %v2068_v44, %v1430_v5  ;;  %v1544_v49 = vmul.f32 %v6073_v29, %v1542_v46 }
 0x1ad   : > { %v1947_v47 = vadd.f32 %v1946_v39, %v1945_v3  ;;  %v2003_v56 = vrot.slane %v2002_v36, 1  ;;  %v6220_v54 = vadd.f32 %v2056_v6, %v2055_v16  ;;  %v2074_v15 = vsel %vm2072_vm3, %v2071_v55, %v1487_v52 }
 0x1ae   : > { %v2674_v34 = vmul.f32 %v2669_v40, %v2657_v62  ;;  %v2676_v38 = vmul.f32 %v2669_v40, %v2636_v17  ;;  %v6242_v26 = vsel %vm2075_vm4, %v2074_v15, %v1544_v49 }
 0x1af   : > { %v6238_v3 = vadd.f32 %v2003_v56, %v2002_v36  ;;  %v2058_v31 = vrot.slane %v6220_v54, 2 }
 0x1b0   : > { %v2679_v19 = vmul.f32 %v6212_v14, %v2674_v34  ;;  %v2681_v43 = vmul.f32 %v6212_v14, %v2676_v38  ;;  %v6222_v20 = vpop.eup %3377 }
 0x1b1   : > { %v6236_v23 = vmul.f32 %v6222_v20, %v1947_v47 }
 0x1b2   : > { %v2683_v29 = vadd.f32 %v2679_v19, %v2662_v61  ;;  %v2685_v12 = vadd.f32 %v2681_v43, %v2664_v45 }
 0x1b3   : > { %v6231_v10 = vpop.eup %3379 }
 0x1b4   : > { %2687 = vst [vmem:[%s6228_s27] sm:$0xff] %v2683_v29  ;;  %2689 = vst [vmem:[%s6228_s27 + $0x10] sm:$0x1] %v2685_v12  ;;  %v6244_v16 = vpop.eup %3381  ;;  %v2466_v32 = vmul.f32 %v6231_v10, %v6104_v63  ;;  %v2486_v42 = vmul.f32 %v6231_v10, %v6112_v50  ;;  %v2506_v7 = vmul.f32 %v6231_v10, %v6123_v59 }
 0x1b5   : > { %v2526_v58 = vmul.f32 %v6231_v10, %v6131_v0  ;;  %v2468_v33 = vmul.f32 %v6244_v16, %v6108_v60  ;;  %v2488_v13 = vmul.f32 %v6244_v16, %v6118_v18  ;;  %v2508_v24 = vmul.f32 %v6244_v16, %v6128_v53 }
 0x1b6   : > { %v2528_v63 = vmul.f32 %v6244_v16, %v6139_v22  ;;  %v2546_v50 = vmul.f32 %v6231_v10, %v6147_v48  ;;  %v2548_v59 = vmul.f32 %v6244_v16, %v6150_v27  ;;  %v2566_v0 = vmul.f32 %v6231_v10, %v6154_v9 }
 0x1b7   : > { %v2568_v60 = vmul.f32 %v6244_v16, %v6162_v11  ;;  %v2477_v18 = vsel %vm763_vm0, %v2468_v33, 0.0  ;;  %v2497_v21 = vsel %vm763_vm0, %v2488_v13, 0.0  ;;  %v2517_v53 = vsel %vm763_vm0, %v2508_v24, 0.0 }
 0x1b8   : > { %v2537_v22 = vsel %vm763_vm0, %v2528_v63, 0.0  ;;  %v2478_v41 = vadd.f32 %v2477_v18, %v2466_v32  ;;  %v2498_v17 = vadd.f32 %v2497_v21, %v2486_v42  ;;  %v2518_v48 = vadd.f32 %v2517_v53, %v2506_v7 }
 0x1b9   : > { %v2538_v62 = vadd.f32 %v2537_v22, %v2526_v58  ;;  %v2557_v27 = vsel %vm763_vm0, %v2548_v59, 0.0  ;;  %v2577_v5 = vsel %vm763_vm0, %v2568_v60, 0.0  ;;  %v2586_v9 = vmul.f32 %v6231_v10, %v6168_v51 }
 0x1ba   : > { %v2588_v11 = vmul.f32 %v6244_v16, %v6171_v4  ;;  %v2479_v30 = vrot.slane %v2478_v41, 4  ;;  %v2499_v46 = vrot.slane %v2498_v17, 4  ;;  %v2519_v39 = vrot.slane %v2518_v48, 4 }
 0x1bb   : > { %v2539_v44 = vrot.slane %v2538_v62, 4  ;;  %v2558_v40 = vadd.f32 %v2557_v27, %v2546_v50  ;;  %v2578_v36 = vadd.f32 %v2577_v5, %v2566_v0  ;;  %v2606_v57 = vmul.f32 %v6231_v10, %v6176_v1 }
 0x1bc   : > { %v2597_v6 = vsel %vm763_vm0, %v2588_v11, 0.0  ;;  %v2480_v61 = vadd.f32 %v2479_v30, %v2478_v41  ;;  %v2500_v52 = vadd.f32 %v2499_v46, %v2498_v17  ;;  %v2520_v45 = vadd.f32 %v2519_v39, %v2518_v48 }
 0x1bd   : > { %v2540_v34 = vadd.f32 %v2539_v44, %v2538_v62  ;;  %v2559_v38 = vrot.slane %v2558_v40, 4  ;;  %v2579_v51 = vrot.slane %v2578_v36, 4  ;;  %v2598_v55 = vadd.f32 %v2597_v6, %v2586_v9 }
 0x1be   : > { %v2608_v4 = vmul.f32 %v6244_v16, %v6184_v25  ;;  %v2481_v49 = vrot.slane %v2480_v61, 2  ;;  %v2501_v47 = vrot.slane %v2500_v52, 2  ;;  %v2521_v19 = vrot.slane %v2520_v45, 2 }
 0x1bf   : > { %v2541_v43 = vrot.slane %v2540_v34, 2  ;;  %v2560_v56 = vadd.f32 %v2559_v38, %v2558_v40  ;;  %v2580_v15 = vadd.f32 %v2579_v51, %v2578_v36  ;;  %v2599_v29 = vrot.slane %v2598_v55, 4 }
 0x1c0   : > { %v2617_v12 = vsel %vm763_vm0, %v2608_v4, 0.0  ;;  %v2482_v1 = vadd.f32 %v2481_v49, %v2480_v61  ;;  %v2502_v32 = vadd.f32 %v2501_v47, %v2500_v52  ;;  %v2522_v42 = vadd.f32 %v2521_v19, %v2520_v45 }
 0x1c1   : > { %v2542_v7 = vadd.f32 %v2541_v43, %v2540_v34  ;;  %v2561_v58 = vrot.slane %v2560_v56, 2  ;;  %v2581_v33 = vrot.slane %v2580_v15, 2  ;;  %v2600_v13 = vadd.f32 %v2599_v29, %v2598_v55 }
 0x1c2   : > { %v2618_v24 = vadd.f32 %v2617_v12, %v2606_v57  ;;  %v2483_v63 = vrot.slane %v2482_v1, 1  ;;  %v2503_v50 = vrot.slane %v2502_v32, 1  ;;  %v2523_v25 = vrot.slane %v2522_v42, 1 }
 0x1c3   : > { %v2543_v59 = vrot.slane %v2542_v7, 1  ;;  %v2562_v0 = vadd.f32 %v2561_v58, %v2560_v56  ;;  %v2582_v60 = vadd.f32 %v2581_v33, %v2580_v15  ;;  %v2601_v18 = vrot.slane %v2600_v13, 2 }
 0x1c4   : > { %v2619_v21 = vrot.slane %v2618_v24, 4  ;;  %v2484_v53 = vadd.f32 %v2483_v63, %v2482_v1  ;;  %v2504_v22 = vadd.f32 %v2503_v50, %v2502_v32  ;;  %v2524_v41 = vadd.f32 %v2523_v25, %v2522_v42 }
 0x1c5   : > { %v2544_v17 = vadd.f32 %v2543_v59, %v2542_v7  ;;  %v2563_v48 = vrot.slane %v2562_v0, 1  ;;  %v2583_v62 = vrot.slane %v2582_v60, 1  ;;  %v2602_v27 = vadd.f32 %v2601_v18, %v2600_v13 }
 0x1c6   : > { %v2620_v5 = vadd.f32 %v2619_v21, %v2618_v24  ;;  %v2059_v9 = vadd.f32 %v2058_v31, %v6220_v54  ;;  %v2626_v11 = vmul.f32 %v6231_v10, %v6188_v37  ;;  %v2628_v30 = vmul.f32 %v6244_v16, %v6191_v2 }
 0x1c7   : > { %v2646_v46 = vsel %vm763_vm0, %v2484_v53, %v2504_v22  ;;  %v2564_v39 = vadd.f32 %v2563_v48, %v2562_v0  ;;  %v2584_v44 = vadd.f32 %v2583_v62, %v2582_v60  ;;  %v2603_v40 = vrot.slane %v2602_v27, 1 }
 0x1c8   : > { %v2621_v36 = vrot.slane %v2620_v5, 2  ;;  %v2006_v6 = vmul.f32 %v6222_v20, %v6238_v3  ;;  %v2637_v57 = vsel %vm763_vm0, %v2628_v30, 0.0  ;;  %v2648_v61 = vsel %vm2066_vm1, %v2646_v46, %v2524_v41 }
 0x1c9   : > { %v2604_v54 = vadd.f32 %v2603_v40, %v2602_v27  ;;  %v2638_v52 = vadd.f32 %v2637_v57, %v2626_v11  ;;  %v2650_v37 = vsel %vm2069_vm2, %v2648_v61, %v2544_v17  ;;  %v2080_v2 = vsel %vm2078_vm5, %v6242_v26, %v6236_v23 }
 0x1ca   : > { %v2622_v31 = vadd.f32 %v2621_v36, %v2620_v5  ;;  %v2652_v10 = vsel %vm2072_vm3, %v2650_v37, %v2564_v39  ;;  %v2060_v16 = vrot.slane %v2059_v9, 1  ;;  %v2673_v51 = vrot.slane %v6207_v35, %v6658_v28 }
 0x1cb   : > { %v2639_v34 = vrot.slane %v2638_v52, 4  ;;  %v2654_v3 = vsel %vm2075_vm4, %v2652_v10, %v2584_v44  ;;  %v2083_v55 = vsel %vm2081_vm6, %v2080_v2, %v2006_v6 }
 0x1cc   : > { %v2623_v45 = vrot.slane %v2622_v31, 1  ;;  %v2656_v38 = vsel %vm2078_vm5, %v2654_v3, %v2604_v54  ;;  %v2061_v47 = vadd.f32 %v2060_v16, %v2059_v9  ;;  %v2663_v19 = vmul.f32 %v6200_v8, %v2083_v55 }
 0x1cd   : > { %v2640_v49 = vadd.f32 %v2639_v34, %v2638_v52 }
 0x1ce   : > { %v2624_v4 = vadd.f32 %v2623_v45, %v2622_v31  ;;  %v2063_v29 = vmul.f32 %v6222_v20, %v2061_v47 }
 0x1cf   : > { %v2641_v23 = vrot.slane %v2640_v49, 2 }
 0x1d0   : > { %v2658_v26 = vsel %vm2081_vm6, %v2656_v38, %v2624_v4  ;;  %v2665_v35 = vmul.f32 %v6200_v8, %v2063_v29 }
 0x1d1   : > { %v2675_v43 = vmul.f32 %v2673_v51, %v2658_v26  ;;  %v2642_v56 = vadd.f32 %v2641_v23, %v2640_v49 }
 0x1d3   : > { %v2680_v15 = vmul.f32 %v6212_v14, %v2675_v43  ;;  %v2643_v12 = vrot.slane %v2642_v56, 1 }
 0x1d5   : > { %v2684_v1 = vadd.f32 %v2680_v15, %v2663_v19  ;;  %v2644_v28 = vadd.f32 %v2643_v12, %v2642_v56 }
 0x1d7   : > { %2688 = vst [vmem:[%s6228_s27 + $0x8] sm:$0xff] %v2684_v1  ;;  %v2677_v32 = vmul.f32 %v2673_v51, %v2644_v28 }
 0x1d9   : > { %v2682_v42 = vmul.f32 %v6212_v14, %v2677_v32 }
 0x1db   : > { %v2686_v7 = vadd.f32 %v2682_v42, %v2665_v35 }
 0x1dd   : > { %2690 = vst [vmem:[%s6228_s27 + $0x18] sm:$0x1] %v2686_v7 }
 0x1de PF: > { %s20_s30 = sadd.s32 1, %s3443_s30  }
 0x1df   : > { %p17_p1 = scmp.ge.s32.totalorder %s20_s30, 4  }
 0x1e1   :  { %19 = sbr.rel (!%p17_p1) target bundleno = 1 (0x1), region = 139 }
 0x1e8   :  { %2712 = vsyncpa [#allocation3], 1 }
 0x1e9   :  { %2714 = vsyncpa [#allocation3 + $0x1], 1 }

</bundles_post_ra>
